<compile_context>
chip_gen: v6e
topology: v6e:2x2x1
jax: 0.10.0
libtpu: 0.0.40
codegen_flags: <defaults>
</compile_context>

<pallas_src>
import jax
import jax.numpy as jnp
import numpy as np
from jax.experimental import pallas as pl
from jax.experimental.pallas import tpu as pltpu


# -----------------------------------------------------------------------------
# Fused Pallas kernel: LSTM(25->64) -> LSTM(64->128) -> Linear(128->5)
# -----------------------------------------------------------------------------
def _lstm_recurrence(get_xp, w_hh, B, T, H):
    """Sequential LSTM cell given precomputed input projections.

    get_xp(t) -> (B, 4H) input projection for timestep t (bias folded in).
    w_hh      : (H, 4H) hidden->gates weights, gate order (i, f, o, g).
    Returns list of T hidden states, each (B, H).
    """
    h = jnp.zeros((B, H), jnp.float32)
    c = jnp.zeros((B, H), jnp.float32)
    hs = []
    for t in range(T):  # T is small & static -> fully unrolled
        gates = get_xp(t) + jnp.dot(h, w_hh, preferred_element_type=jnp.float32)
        sig = jax.nn.sigmoid(gates[:, 0:3 * H])      # i, f, o in one EUP pass
        g_g = jnp.tanh(gates[:, 3 * H:4 * H])
        c = sig[:, H:2 * H] * c + sig[:, 0:H] * g_g
        h = sig[:, 2 * H:3 * H] * jnp.tanh(c)
        hs.append(h)
    return hs


def _audio_model_hc_kernel(x_ref, w_ih1_ref, w_hh1_ref, b1_ref,
                           w_ih2_ref, w_hh2_ref, b2_ref,
                           w_fc_ref, b_fc_ref,
                           logits_ref, feats_ref):
    """x_ref: (B, T, I) batch-first input; outputs: logits (B,5), feats (B,128)."""
    B, T, I = x_ref.shape
    H1 = w_hh1_ref.shape[0]
    H2 = w_hh2_ref.shape[0]

    # ---- layer 1: hoisted batched input projection, then recurrence ----------
    x2d = x_ref[...].reshape(B * T, I)                            # layout no-op
    xp1 = (jnp.dot(x2d, w_ih1_ref[...], preferred_element_type=jnp.float32)
           + b1_ref[...]).reshape(B, T, 4 * H1)                   # layout no-op
    hs1 = _lstm_recurrence(lambda t: xp1[:, t, :], w_hh1_ref[...], B, T, H1)

    # ---- layer 2: seq1 stays in VMEM as values; batched projection -----------
    seq1 = jnp.concatenate(hs1, axis=0)            # (T*B, H1), time-major rows
    xp2 = (jnp.dot(seq1, w_ih2_ref[...], preferred_element_type=jnp.float32)
           + b2_ref[...])                                         # (T*B, 4H2)
    hs2 = _lstm_recurrence(lambda t: xp2[t * B:(t + 1) * B, :],
                           w_hh2_ref[...], B, T, H2)

    # ---- head: features == last-timestep hidden state; FC fused --------------
    # TODO(synk): dropout1/dropout2 are identity in eval mode; no RNG dropout.
    feats = hs2[-1]                                               # (B, H2)
    feats_ref[...] = feats
    logits_ref[...] = (jnp.dot(feats, w_fc_ref[...],
                               preferred_element_type=jnp.float32)
                       + b_fc_ref[...])


_VMEM = pl.BlockSpec(memory_space=pltpu.MemorySpace.VMEM)


def _reorder_ifgo_to_ifog(w, H):
    """Re-pack last-dim gate blocks from PyTorch (i,f,g,o) to (i,f,o,g)."""
    return jnp.concatenate(
        [w[..., 0:2 * H], w[..., 3 * H:4 * H], w[..., 2 * H:3 * H]], axis=-1)


@jax.jit
def audio_model_hc_forward(x, params):
    """x: (B, T, input_size) batch-first, like PyTorch. Returns (logits, features)."""
    B = x.shape[0]
    H1 = params["w_hh1"].shape[0]
    H2 = params["w_hh2"].shape[0]
    n_out = params["w_fc"].shape[1]

    # One-time gate-column permutation (tiny, done by XLA outside the kernel)
    # so the kernel can evaluate sigmoid(i|f|o) with a single EUP dispatch.
    w_ih1 = _reorder_ifgo_to_ifog(params["w_ih1"], H1)
    w_hh1 = _reorder_ifgo_to_ifog(params["w_hh1"], H1)
    b1 = _reorder_ifgo_to_ifog(params["b1"], H1)
    w_ih2 = _reorder_ifgo_to_ifog(params["w_ih2"], H2)
    w_hh2 = _reorder_ifgo_to_ifog(params["w_hh2"], H2)
    b2 = _reorder_ifgo_to_ifog(params["b2"], H2)

    # TODO(synk): if B grows, add a batch grid axis with
    # dimension_semantics=("parallel",) so both TensorCores on v7x get work.
    logits, feats = pl.pallas_call(
        _audio_model_hc_kernel,
        out_shape=(jax.ShapeDtypeStruct((B, n_out), jnp.float32),
                   jax.ShapeDtypeStruct((B, H2), jnp.float32)),
        in_specs=[_VMEM] * 9,
        out_specs=(_VMEM, _VMEM),
    )(x.astype(jnp.float32),
      w_ih1, w_hh1, b1,
      w_ih2, w_hh2, b2,
      params["w_fc"], params["b_fc"])
    return logits, feats


# -----------------------------------------------------------------------------
# Pure-JAX reference (same math, PyTorch gate order, no Pallas)
# -----------------------------------------------------------------------------
def _ref_lstm(x_tm, w_ih, w_hh, b):
    T, B, _ = x_tm.shape
    H = w_hh.shape[0]
    h = jnp.zeros((B, H), jnp.float32)
    c = jnp.zeros((B, H), jnp.float32)
    outs = []
    for t in range(T):
        gates = x_tm[t] @ w_ih + h @ w_hh + b
        i_g = jax.nn.sigmoid(gates[:, 0 * H:1 * H])
        f_g = jax.nn.sigmoid(gates[:, 1 * H:2 * H])
        g_g = jnp.tanh(gates[:, 2 * H:3 * H])
        o_g = jax.nn.sigmoid(gates[:, 3 * H:4 * H])
        c = f_g * c + i_g * g_g
        h = o_g * jnp.tanh(c)
        outs.append(h)
    return jnp.stack(outs, axis=0)


def _ref_forward(x, params):
    x_tm = jnp.transpose(x, (1, 0, 2)).astype(jnp.float32)
    seq1 = _ref_lstm(x_tm, params["w_ih1"], params["w_hh1"], params["b1"])
    seq2 = _ref_lstm(seq1, params["w_ih2"], params["w_hh2"], params["b2"])
    feats = seq2[-1]
    logits = feats @ params["w_fc"] + params["b_fc"]
    return logits, feats


# -----------------------------------------------------------------------------
# Deterministic parameter construction (same shapes as the nn.Module __init__)
# Weights kept in PyTorch gate order (i,f,g,o), pre-transposed to (in, 4H).
# -----------------------------------------------------------------------------
def make_params(key, input_size=25, h1=64, h2=128, n_out=5):
    ks = jax.random.split(key, 10)

    def uniform(k, shape, scale):
        return jax.random.uniform(k, shape, jnp.float32, -scale, scale)

    s1 = 1.0 / np.sqrt(h1)
    s2 = 1.0 / np.sqrt(h2)
    sf = 1.0 / np.sqrt(h2)
    # PyTorch stores weight_ih as (4H, I); we pre-transpose to (I, 4H).
    w_ih1 = uniform(ks[0], (input_size, 4 * h1), s1)
    w_hh1 = uniform(ks[1], (h1, 4 * h1), s1)
    b1 = uniform(ks[2], (1, 4 * h1), s1) + uniform(ks[3], (1, 4 * h1), s1)  # b_ih + b_hh
    w_ih2 = uniform(ks[4], (h1, 4 * h2), s2)
    w_hh2 = uniform(ks[5], (h2, 4 * h2), s2)
    b2 = uniform(ks[6], (1, 4 * h2), s2) + uniform(ks[7], (1, 4 * h2), s2)
    w_fc = uniform(ks[8], (h2, n_out), sf)   # stored as (128, 5) == fc.weight.T
    b_fc = uniform(ks[9], (1, n_out), sf)
    return dict(w_ih1=w_ih1, w_hh1=w_hh1, b1=b1,
                w_ih2=w_ih2, w_hh2=w_hh2, b2=b2,
                w_fc=w_fc, b_fc=b_fc)


if __name__ == "__main__":
    key = jax.random.PRNGKey(0)
    k_param, k_x = jax.random.split(key)

    B, T, INPUT = 2, 8, 25
    params = make_params(k_param, input_size=INPUT)
    x = jax.random.normal(k_x, (B, T, INPUT), jnp.float32)

    logits, features = audio_model_hc_forward(x, params)
    logits = jax.block_until_ready(logits)
    features = jax.block_until_ready(features)

    ref_logits, ref_features = _ref_forward(x, params)
    np.testing.assert_allclose(np.asarray(logits), np.asarray(ref_logits),
                               rtol=1e-5, atol=1e-5)
    np.testing.assert_allclose(np.asarray(features), np.asarray(ref_features),
                               rtol=1e-5, atol=1e-5)
    assert logits.shape == (B, 5) and features.shape == (B, 128)
    print("KERNEL_OK")
</pallas_src>

<mosaic_0001>
module attributes {stable_mosaic.version = 11 : i64} {
  func.func @_audio_model_hc_kernel(%arg0: memref<2x8x25xf32, #tpu.memory_space<vmem>>, %arg1: memref<25x256xf32, #tpu.memory_space<vmem>>, %arg2: memref<64x256xf32, #tpu.memory_space<vmem>>, %arg3: memref<1x256xf32, #tpu.memory_space<vmem>>, %arg4: memref<64x512xf32, #tpu.memory_space<vmem>>, %arg5: memref<128x512xf32, #tpu.memory_space<vmem>>, %arg6: memref<1x512xf32, #tpu.memory_space<vmem>>, %arg7: memref<128x5xf32, #tpu.memory_space<vmem>>, %arg8: memref<1x5xf32, #tpu.memory_space<vmem>>, %arg9: memref<2x5xf32, #tpu.memory_space<vmem>>, %arg10: memref<2x128xf32, #tpu.memory_space<vmem>>) attributes {dimension_semantics = [], scalar_prefetch = 0 : i64, scratch_operands = 0 : i64, tpu.core_type = #tpu.core_type<tc>} {
    %c0 = arith.constant 0 : index
    %c0_0 = arith.constant 0 : index
    %c0_1 = arith.constant 0 : index
    %0 = vector.load %arg0[%c0, %c0_0, %c0_1] : memref<2x8x25xf32, #tpu.memory_space<vmem>>, vector<2x8x25xf32>
    %1 = vector.shape_cast %0 : vector<2x8x25xf32> to vector<16x25xf32>
    %c0_2 = arith.constant 0 : index
    %c0_3 = arith.constant 0 : index
    %2 = vector.load %arg1[%c0_2, %c0_3] : memref<25x256xf32, #tpu.memory_space<vmem>>, vector<25x256xf32>
    %cst = arith.constant dense<0.000000e+00> : vector<16x256xf32>
    %3 = tpu.matmul %1, %2, %cst {dimension_numbers = #tpu.dot_dimension_numbers<[1], [0], [0], [1], [0, 0, 1, 1], [], []>} : vector<16x25xf32>, vector<25x256xf32>, vector<16x256xf32> -> vector<16x256xf32>
    %c0_4 = arith.constant 0 : index
    %c0_5 = arith.constant 0 : index
    %4 = vector.load %arg3[%c0_4, %c0_5] : memref<1x256xf32, #tpu.memory_space<vmem>>, vector<1x256xf32>
    %5 = vector.broadcast %4 : vector<1x256xf32> to vector<16x256xf32>
    %6 = arith.addf %3, %5 : vector<16x256xf32>
    %7 = vector.shape_cast %6 : vector<16x256xf32> to vector<2x8x256xf32>
    %c0_6 = arith.constant 0 : index
    %c0_7 = arith.constant 0 : index
    %8 = vector.load %arg2[%c0_6, %c0_7] : memref<64x256xf32, #tpu.memory_space<vmem>>, vector<64x256xf32>
    %cst_8 = arith.constant 0.000000e+00 : f32
    %9 = vector.broadcast %cst_8 : f32 to vector<2x64xf32>
    %cst_9 = arith.constant 0.000000e+00 : f32
    %10 = vector.broadcast %cst_9 : f32 to vector<2x64xf32>
    %11 = vector.extract_strided_slice %7 {offsets = [0, 0, 0], sizes = [2, 1, 256], strides = [1, 1, 1]} : vector<2x8x256xf32> to vector<2x1x256xf32>
    %12 = vector.shape_cast %11 : vector<2x1x256xf32> to vector<2x256xf32>
    %cst_10 = arith.constant dense<0.000000e+00> : vector<2x256xf32>
    %13 = tpu.matmul %9, %8, %cst_10 {dimension_numbers = #tpu.dot_dimension_numbers<[1], [0], [0], [1], [0, 0, 1, 1], [], []>} : vector<2x64xf32>, vector<64x256xf32>, vector<2x256xf32> -> vector<2x256xf32>
    %14 = arith.addf %12, %13 : vector<2x256xf32>
    %15 = vector.extract_strided_slice %14 {offsets = [0, 0], sizes = [2, 192], strides = [1, 1]} : vector<2x256xf32> to vector<2x192xf32>
    %16 = arith.negf %15 : vector<2x192xf32>
    %17 = math.exp %16 : vector<2x192xf32>
    %cst_11 = arith.constant 1.000000e+00 : f32
    %18 = vector.broadcast %cst_11 : f32 to vector<2x192xf32>
    %19 = arith.addf %18, %17 : vector<2x192xf32>
    %20 = arith.divf %18, %19 : vector<2x192xf32>
    %21 = vector.extract_strided_slice %14 {offsets = [0, 192], sizes = [2, 64], strides = [1, 1]} : vector<2x256xf32> to vector<2x64xf32>
    %22 = math.tanh %21 : vector<2x64xf32>
    %23 = vector.extract_strided_slice %20 {offsets = [0, 64], sizes = [2, 64], strides = [1, 1]} : vector<2x192xf32> to vector<2x64xf32>
    %24 = arith.mulf %23, %10 : vector<2x64xf32>
    %25 = vector.extract_strided_slice %20 {offsets = [0, 0], sizes = [2, 64], strides = [1, 1]} : vector<2x192xf32> to vector<2x64xf32>
    %26 = arith.mulf %25, %22 : vector<2x64xf32>
    %27 = arith.addf %24, %26 : vector<2x64xf32>
    %28 = vector.extract_strided_slice %20 {offsets = [0, 128], sizes = [2, 64], strides = [1, 1]} : vector<2x192xf32> to vector<2x64xf32>
    %29 = math.tanh %27 : vector<2x64xf32>
    %30 = arith.mulf %28, %29 : vector<2x64xf32>
    %31 = vector.extract_strided_slice %7 {offsets = [0, 1, 0], sizes = [2, 1, 256], strides = [1, 1, 1]} : vector<2x8x256xf32> to vector<2x1x256xf32>
    %32 = vector.shape_cast %31 : vector<2x1x256xf32> to vector<2x256xf32>
    %cst_12 = arith.constant dense<0.000000e+00> : vector<2x256xf32>
    %33 = tpu.matmul %30, %8, %cst_12 {dimension_numbers = #tpu.dot_dimension_numbers<[1], [0], [0], [1], [0, 0, 1, 1], [], []>} : vector<2x64xf32>, vector<64x256xf32>, vector<2x256xf32> -> vector<2x256xf32>
    %34 = arith.addf %32, %33 : vector<2x256xf32>
    %35 = vector.extract_strided_slice %34 {offsets = [0, 0], sizes = [2, 192], strides = [1, 1]} : vector<2x256xf32> to vector<2x192xf32>
    %36 = arith.negf %35 : vector<2x192xf32>
    %37 = math.exp %36 : vector<2x192xf32>
    %cst_13 = arith.constant 1.000000e+00 : f32
    %38 = vector.broadcast %cst_13 : f32 to vector<2x192xf32>
    %39 = arith.addf %38, %37 : vector<2x192xf32>
    %40 = arith.divf %38, %39 : vector<2x192xf32>
    %41 = vector.extract_strided_slice %34 {offsets = [0, 192], sizes = [2, 64], strides = [1, 1]} : vector<2x256xf32> to vector<2x64xf32>
    %42 = math.tanh %41 : vector<2x64xf32>
    %43 = vector.extract_strided_slice %40 {offsets = [0, 64], sizes = [2, 64], strides = [1, 1]} : vector<2x192xf32> to vector<2x64xf32>
    %44 = arith.mulf %43, %27 : vector<2x64xf32>
    %45 = vector.extract_strided_slice %40 {offsets = [0, 0], sizes = [2, 64], strides = [1, 1]} : vector<2x192xf32> to vector<2x64xf32>
    %46 = arith.mulf %45, %42 : vector<2x64xf32>
    %47 = arith.addf %44, %46 : vector<2x64xf32>
    %48 = vector.extract_strided_slice %40 {offsets = [0, 128], sizes = [2, 64], strides = [1, 1]} : vector<2x192xf32> to vector<2x64xf32>
    %49 = math.tanh %47 : vector<2x64xf32>
    %50 = arith.mulf %48, %49 : vector<2x64xf32>
    %51 = vector.extract_strided_slice %7 {offsets = [0, 2, 0], sizes = [2, 1, 256], strides = [1, 1, 1]} : vector<2x8x256xf32> to vector<2x1x256xf32>
    %52 = vector.shape_cast %51 : vector<2x1x256xf32> to vector<2x256xf32>
    %cst_14 = arith.constant dense<0.000000e+00> : vector<2x256xf32>
    %53 = tpu.matmul %50, %8, %cst_14 {dimension_numbers = #tpu.dot_dimension_numbers<[1], [0], [0], [1], [0, 0, 1, 1], [], []>} : vector<2x64xf32>, vector<64x256xf32>, vector<2x256xf32> -> vector<2x256xf32>
    %54 = arith.addf %52, %53 : vector<2x256xf32>
    %55 = vector.extract_strided_slice %54 {offsets = [0, 0], sizes = [2, 192], strides = [1, 1]} : vector<2x256xf32> to vector<2x192xf32>
    %56 = arith.negf %55 : vector<2x192xf32>
    %57 = math.exp %56 : vector<2x192xf32>
    %cst_15 = arith.constant 1.000000e+00 : f32
    %58 = vector.broadcast %cst_15 : f32 to vector<2x192xf32>
    %59 = arith.addf %58, %57 : vector<2x192xf32>
    %60 = arith.divf %58, %59 : vector<2x192xf32>
    %61 = vector.extract_strided_slice %54 {offsets = [0, 192], sizes = [2, 64], strides = [1, 1]} : vector<2x256xf32> to vector<2x64xf32>
    %62 = math.tanh %61 : vector<2x64xf32>
    %63 = vector.extract_strided_slice %60 {offsets = [0, 64], sizes = [2, 64], strides = [1, 1]} : vector<2x192xf32> to vector<2x64xf32>
    %64 = arith.mulf %63, %47 : vector<2x64xf32>
    %65 = vector.extract_strided_slice %60 {offsets = [0, 0], sizes = [2, 64], strides = [1, 1]} : vector<2x192xf32> to vector<2x64xf32>
    %66 = arith.mulf %65, %62 : vector<2x64xf32>
    %67 = arith.addf %64, %66 : vector<2x64xf32>
    %68 = vector.extract_strided_slice %60 {offsets = [0, 128], sizes = [2, 64], strides = [1, 1]} : vector<2x192xf32> to vector<2x64xf32>
    %69 = math.tanh %67 : vector<2x64xf32>
    %70 = arith.mulf %68, %69 : vector<2x64xf32>
    %71 = vector.extract_strided_slice %7 {offsets = [0, 3, 0], sizes = [2, 1, 256], strides = [1, 1, 1]} : vector<2x8x256xf32> to vector<2x1x256xf32>
    %72 = vector.shape_cast %71 : vector<2x1x256xf32> to vector<2x256xf32>
    %cst_16 = arith.constant dense<0.000000e+00> : vector<2x256xf32>
    %73 = tpu.matmul %70, %8, %cst_16 {dimension_numbers = #tpu.dot_dimension_numbers<[1], [0], [0], [1], [0, 0, 1, 1], [], []>} : vector<2x64xf32>, vector<64x256xf32>, vector<2x256xf32> -> vector<2x256xf32>
    %74 = arith.addf %72, %73 : vector<2x256xf32>
    %75 = vector.extract_strided_slice %74 {offsets = [0, 0], sizes = [2, 192], strides = [1, 1]} : vector<2x256xf32> to vector<2x192xf32>
    %76 = arith.negf %75 : vector<2x192xf32>
    %77 = math.exp %76 : vector<2x192xf32>
    %cst_17 = arith.constant 1.000000e+00 : f32
    %78 = vector.broadcast %cst_17 : f32 to vector<2x192xf32>
    %79 = arith.addf %78, %77 : vector<2x192xf32>
    %80 = arith.divf %78, %79 : vector<2x192xf32>
    %81 = vector.extract_strided_slice %74 {offsets = [0, 192], sizes = [2, 64], strides = [1, 1]} : vector<2x256xf32> to vector<2x64xf32>
    %82 = math.tanh %81 : vector<2x64xf32>
    %83 = vector.extract_strided_slice %80 {offsets = [0, 64], sizes = [2, 64], strides = [1, 1]} : vector<2x192xf32> to vector<2x64xf32>
    %84 = arith.mulf %83, %67 : vector<2x64xf32>
    %85 = vector.extract_strided_slice %80 {offsets = [0, 0], sizes = [2, 64], strides = [1, 1]} : vector<2x192xf32> to vector<2x64xf32>
    %86 = arith.mulf %85, %82 : vector<2x64xf32>
    %87 = arith.addf %84, %86 : vector<2x64xf32>
    %88 = vector.extract_strided_slice %80 {offsets = [0, 128], sizes = [2, 64], strides = [1, 1]} : vector<2x192xf32> to vector<2x64xf32>
    %89 = math.tanh %87 : vector<2x64xf32>
    %90 = arith.mulf %88, %89 : vector<2x64xf32>
    %91 = vector.extract_strided_slice %7 {offsets = [0, 4, 0], sizes = [2, 1, 256], strides = [1, 1, 1]} : vector<2x8x256xf32> to vector<2x1x256xf32>
    %92 = vector.shape_cast %91 : vector<2x1x256xf32> to vector<2x256xf32>
    %cst_18 = arith.constant dense<0.000000e+00> : vector<2x256xf32>
    %93 = tpu.matmul %90, %8, %cst_18 {dimension_numbers = #tpu.dot_dimension_numbers<[1], [0], [0], [1], [0, 0, 1, 1], [], []>} : vector<2x64xf32>, vector<64x256xf32>, vector<2x256xf32> -> vector<2x256xf32>
    %94 = arith.addf %92, %93 : vector<2x256xf32>
    %95 = vector.extract_strided_slice %94 {offsets = [0, 0], sizes = [2, 192], strides = [1, 1]} : vector<2x256xf32> to vector<2x192xf32>
    %96 = arith.negf %95 : vector<2x192xf32>
    %97 = math.exp %96 : vector<2x192xf32>
    %cst_19 = arith.constant 1.000000e+00 : f32
    %98 = vector.broadcast %cst_19 : f32 to vector<2x192xf32>
    %99 = arith.addf %98, %97 : vector<2x192xf32>
    %100 = arith.divf %98, %99 : vector<2x192xf32>
    %101 = vector.extract_strided_slice %94 {offsets = [0, 192], sizes = [2, 64], strides = [1, 1]} : vector<2x256xf32> to vector<2x64xf32>
    %102 = math.tanh %101 : vector<2x64xf32>
    %103 = vector.extract_strided_slice %100 {offsets = [0, 64], sizes = [2, 64], strides = [1, 1]} : vector<2x192xf32> to vector<2x64xf32>
    %104 = arith.mulf %103, %87 : vector<2x64xf32>
    %105 = vector.extract_strided_slice %100 {offsets = [0, 0], sizes = [2, 64], strides = [1, 1]} : vector<2x192xf32> to vector<2x64xf32>
    %106 = arith.mulf %105, %102 : vector<2x64xf32>
    %107 = arith.addf %104, %106 : vector<2x64xf32>
    %108 = vector.extract_strided_slice %100 {offsets = [0, 128], sizes = [2, 64], strides = [1, 1]} : vector<2x192xf32> to vector<2x64xf32>
    %109 = math.tanh %107 : vector<2x64xf32>
    %110 = arith.mulf %108, %109 : vector<2x64xf32>
    %111 = vector.extract_strided_slice %7 {offsets = [0, 5, 0], sizes = [2, 1, 256], strides = [1, 1, 1]} : vector<2x8x256xf32> to vector<2x1x256xf32>
    %112 = vector.shape_cast %111 : vector<2x1x256xf32> to vector<2x256xf32>
    %cst_20 = arith.constant dense<0.000000e+00> : vector<2x256xf32>
    %113 = tpu.matmul %110, %8, %cst_20 {dimension_numbers = #tpu.dot_dimension_numbers<[1], [0], [0], [1], [0, 0, 1, 1], [], []>} : vector<2x64xf32>, vector<64x256xf32>, vector<2x256xf32> -> vector<2x256xf32>
    %114 = arith.addf %112, %113 : vector<2x256xf32>
    %115 = vector.extract_strided_slice %114 {offsets = [0, 0], sizes = [2, 192], strides = [1, 1]} : vector<2x256xf32> to vector<2x192xf32>
    %116 = arith.negf %115 : vector<2x192xf32>
    %117 = math.exp %116 : vector<2x192xf32>
    %cst_21 = arith.constant 1.000000e+00 : f32
    %118 = vector.broadcast %cst_21 : f32 to vector<2x192xf32>
    %119 = arith.addf %118, %117 : vector<2x192xf32>
    %120 = arith.divf %118, %119 : vector<2x192xf32>
    %121 = vector.extract_strided_slice %114 {offsets = [0, 192], sizes = [2, 64], strides = [1, 1]} : vector<2x256xf32> to vector<2x64xf32>
    %122 = math.tanh %121 : vector<2x64xf32>
    %123 = vector.extract_strided_slice %120 {offsets = [0, 64], sizes = [2, 64], strides = [1, 1]} : vector<2x192xf32> to vector<2x64xf32>
    %124 = arith.mulf %123, %107 : vector<2x64xf32>
    %125 = vector.extract_strided_slice %120 {offsets = [0, 0], sizes = [2, 64], strides = [1, 1]} : vector<2x192xf32> to vector<2x64xf32>
    %126 = arith.mulf %125, %122 : vector<2x64xf32>
    %127 = arith.addf %124, %126 : vector<2x64xf32>
    %128 = vector.extract_strided_slice %120 {offsets = [0, 128], sizes = [2, 64], strides = [1, 1]} : vector<2x192xf32> to vector<2x64xf32>
    %129 = math.tanh %127 : vector<2x64xf32>
    %130 = arith.mulf %128, %129 : vector<2x64xf32>
    %131 = vector.extract_strided_slice %7 {offsets = [0, 6, 0], sizes = [2, 1, 256], strides = [1, 1, 1]} : vector<2x8x256xf32> to vector<2x1x256xf32>
    %132 = vector.shape_cast %131 : vector<2x1x256xf32> to vector<2x256xf32>
    %cst_22 = arith.constant dense<0.000000e+00> : vector<2x256xf32>
    %133 = tpu.matmul %130, %8, %cst_22 {dimension_numbers = #tpu.dot_dimension_numbers<[1], [0], [0], [1], [0, 0, 1, 1], [], []>} : vector<2x64xf32>, vector<64x256xf32>, vector<2x256xf32> -> vector<2x256xf32>
    %134 = arith.addf %132, %133 : vector<2x256xf32>
    %135 = vector.extract_strided_slice %134 {offsets = [0, 0], sizes = [2, 192], strides = [1, 1]} : vector<2x256xf32> to vector<2x192xf32>
    %136 = arith.negf %135 : vector<2x192xf32>
    %137 = math.exp %136 : vector<2x192xf32>
    %cst_23 = arith.constant 1.000000e+00 : f32
    %138 = vector.broadcast %cst_23 : f32 to vector<2x192xf32>
    %139 = arith.addf %138, %137 : vector<2x192xf32>
    %140 = arith.divf %138, %139 : vector<2x192xf32>
    %141 = vector.extract_strided_slice %134 {offsets = [0, 192], sizes = [2, 64], strides = [1, 1]} : vector<2x256xf32> to vector<2x64xf32>
    %142 = math.tanh %141 : vector<2x64xf32>
    %143 = vector.extract_strided_slice %140 {offsets = [0, 64], sizes = [2, 64], strides = [1, 1]} : vector<2x192xf32> to vector<2x64xf32>
    %144 = arith.mulf %143, %127 : vector<2x64xf32>
    %145 = vector.extract_strided_slice %140 {offsets = [0, 0], sizes = [2, 64], strides = [1, 1]} : vector<2x192xf32> to vector<2x64xf32>
    %146 = arith.mulf %145, %142 : vector<2x64xf32>
    %147 = arith.addf %144, %146 : vector<2x64xf32>
    %148 = vector.extract_strided_slice %140 {offsets = [0, 128], sizes = [2, 64], strides = [1, 1]} : vector<2x192xf32> to vector<2x64xf32>
    %149 = math.tanh %147 : vector<2x64xf32>
    %150 = arith.mulf %148, %149 : vector<2x64xf32>
    %151 = vector.extract_strided_slice %7 {offsets = [0, 7, 0], sizes = [2, 1, 256], strides = [1, 1, 1]} : vector<2x8x256xf32> to vector<2x1x256xf32>
    %152 = vector.shape_cast %151 : vector<2x1x256xf32> to vector<2x256xf32>
    %cst_24 = arith.constant dense<0.000000e+00> : vector<2x256xf32>
    %153 = tpu.matmul %150, %8, %cst_24 {dimension_numbers = #tpu.dot_dimension_numbers<[1], [0], [0], [1], [0, 0, 1, 1], [], []>} : vector<2x64xf32>, vector<64x256xf32>, vector<2x256xf32> -> vector<2x256xf32>
    %154 = arith.addf %152, %153 : vector<2x256xf32>
    %155 = vector.extract_strided_slice %154 {offsets = [0, 0], sizes = [2, 192], strides = [1, 1]} : vector<2x256xf32> to vector<2x192xf32>
    %156 = arith.negf %155 : vector<2x192xf32>
    %157 = math.exp %156 : vector<2x192xf32>
    %cst_25 = arith.constant 1.000000e+00 : f32
    %158 = vector.broadcast %cst_25 : f32 to vector<2x192xf32>
    %159 = arith.addf %158, %157 : vector<2x192xf32>
    %160 = arith.divf %158, %159 : vector<2x192xf32>
    %161 = vector.extract_strided_slice %154 {offsets = [0, 192], sizes = [2, 64], strides = [1, 1]} : vector<2x256xf32> to vector<2x64xf32>
    %162 = math.tanh %161 : vector<2x64xf32>
    %163 = vector.extract_strided_slice %160 {offsets = [0, 64], sizes = [2, 64], strides = [1, 1]} : vector<2x192xf32> to vector<2x64xf32>
    %164 = arith.mulf %163, %147 : vector<2x64xf32>
    %165 = vector.extract_strided_slice %160 {offsets = [0, 0], sizes = [2, 64], strides = [1, 1]} : vector<2x192xf32> to vector<2x64xf32>
    %166 = arith.mulf %165, %162 : vector<2x64xf32>
    %167 = arith.addf %164, %166 : vector<2x64xf32>
    %168 = vector.extract_strided_slice %160 {offsets = [0, 128], sizes = [2, 64], strides = [1, 1]} : vector<2x192xf32> to vector<2x64xf32>
    %169 = math.tanh %167 : vector<2x64xf32>
    %170 = arith.mulf %168, %169 : vector<2x64xf32>
    %171 = tpu.concatenate %30, %50, %70, %90, %110, %130, %150, %170 in 0 : vector<2x64xf32>, vector<2x64xf32>, vector<2x64xf32>, vector<2x64xf32>, vector<2x64xf32>, vector<2x64xf32>, vector<2x64xf32>, vector<2x64xf32> -> vector<16x64xf32>
    %c0_26 = arith.constant 0 : index
    %c0_27 = arith.constant 0 : index
    %172 = vector.load %arg4[%c0_26, %c0_27] : memref<64x512xf32, #tpu.memory_space<vmem>>, vector<64x512xf32>
    %cst_28 = arith.constant dense<0.000000e+00> : vector<16x512xf32>
    %173 = tpu.matmul %171, %172, %cst_28 {dimension_numbers = #tpu.dot_dimension_numbers<[1], [0], [0], [1], [0, 0, 1, 1], [], []>} : vector<16x64xf32>, vector<64x512xf32>, vector<16x512xf32> -> vector<16x512xf32>
    %c0_29 = arith.constant 0 : index
    %c0_30 = arith.constant 0 : index
    %174 = vector.load %arg6[%c0_29, %c0_30] : memref<1x512xf32, #tpu.memory_space<vmem>>, vector<1x512xf32>
    %175 = vector.broadcast %174 : vector<1x512xf32> to vector<16x512xf32>
    %176 = arith.addf %173, %175 : vector<16x512xf32>
    %c0_31 = arith.constant 0 : index
    %c0_32 = arith.constant 0 : index
    %177 = vector.load %arg5[%c0_31, %c0_32] : memref<128x512xf32, #tpu.memory_space<vmem>>, vector<128x512xf32>
    %cst_33 = arith.constant 0.000000e+00 : f32
    %178 = vector.broadcast %cst_33 : f32 to vector<2x128xf32>
    %cst_34 = arith.constant 0.000000e+00 : f32
    %179 = vector.broadcast %cst_34 : f32 to vector<2x128xf32>
    %180 = vector.extract_strided_slice %176 {offsets = [0, 0], sizes = [2, 512], strides = [1, 1]} : vector<16x512xf32> to vector<2x512xf32>
    %cst_35 = arith.constant dense<0.000000e+00> : vector<2x512xf32>
    %181 = tpu.matmul %178, %177, %cst_35 {dimension_numbers = #tpu.dot_dimension_numbers<[1], [0], [0], [1], [0, 0, 1, 1], [], []>} : vector<2x128xf32>, vector<128x512xf32>, vector<2x512xf32> -> vector<2x512xf32>
    %182 = arith.addf %180, %181 : vector<2x512xf32>
    %183 = vector.extract_strided_slice %182 {offsets = [0, 0], sizes = [2, 384], strides = [1, 1]} : vector<2x512xf32> to vector<2x384xf32>
    %184 = arith.negf %183 : vector<2x384xf32>
    %185 = math.exp %184 : vector<2x384xf32>
    %cst_36 = arith.constant 1.000000e+00 : f32
    %186 = vector.broadcast %cst_36 : f32 to vector<2x384xf32>
    %187 = arith.addf %186, %185 : vector<2x384xf32>
    %188 = arith.divf %186, %187 : vector<2x384xf32>
    %189 = vector.extract_strided_slice %182 {offsets = [0, 384], sizes = [2, 128], strides = [1, 1]} : vector<2x512xf32> to vector<2x128xf32>
    %190 = math.tanh %189 : vector<2x128xf32>
    %191 = vector.extract_strided_slice %188 {offsets = [0, 128], sizes = [2, 128], strides = [1, 1]} : vector<2x384xf32> to vector<2x128xf32>
    %192 = arith.mulf %191, %179 : vector<2x128xf32>
    %193 = vector.extract_strided_slice %188 {offsets = [0, 0], sizes = [2, 128], strides = [1, 1]} : vector<2x384xf32> to vector<2x128xf32>
    %194 = arith.mulf %193, %190 : vector<2x128xf32>
    %195 = arith.addf %192, %194 : vector<2x128xf32>
    %196 = vector.extract_strided_slice %188 {offsets = [0, 256], sizes = [2, 128], strides = [1, 1]} : vector<2x384xf32> to vector<2x128xf32>
    %197 = math.tanh %195 : vector<2x128xf32>
    %198 = arith.mulf %196, %197 : vector<2x128xf32>
    %199 = vector.extract_strided_slice %176 {offsets = [2, 0], sizes = [2, 512], strides = [1, 1]} : vector<16x512xf32> to vector<2x512xf32>
    %cst_37 = arith.constant dense<0.000000e+00> : vector<2x512xf32>
    %200 = tpu.matmul %198, %177, %cst_37 {dimension_numbers = #tpu.dot_dimension_numbers<[1], [0], [0], [1], [0, 0, 1, 1], [], []>} : vector<2x128xf32>, vector<128x512xf32>, vector<2x512xf32> -> vector<2x512xf32>
    %201 = arith.addf %199, %200 : vector<2x512xf32>
    %202 = vector.extract_strided_slice %201 {offsets = [0, 0], sizes = [2, 384], strides = [1, 1]} : vector<2x512xf32> to vector<2x384xf32>
    %203 = arith.negf %202 : vector<2x384xf32>
    %204 = math.exp %203 : vector<2x384xf32>
    %cst_38 = arith.constant 1.000000e+00 : f32
    %205 = vector.broadcast %cst_38 : f32 to vector<2x384xf32>
    %206 = arith.addf %205, %204 : vector<2x384xf32>
    %207 = arith.divf %205, %206 : vector<2x384xf32>
    %208 = vector.extract_strided_slice %201 {offsets = [0, 384], sizes = [2, 128], strides = [1, 1]} : vector<2x512xf32> to vector<2x128xf32>
    %209 = math.tanh %208 : vector<2x128xf32>
    %210 = vector.extract_strided_slice %207 {offsets = [0, 128], sizes = [2, 128], strides = [1, 1]} : vector<2x384xf32> to vector<2x128xf32>
    %211 = arith.mulf %210, %195 : vector<2x128xf32>
    %212 = vector.extract_strided_slice %207 {offsets = [0, 0], sizes = [2, 128], strides = [1, 1]} : vector<2x384xf32> to vector<2x128xf32>
    %213 = arith.mulf %212, %209 : vector<2x128xf32>
    %214 = arith.addf %211, %213 : vector<2x128xf32>
    %215 = vector.extract_strided_slice %207 {offsets = [0, 256], sizes = [2, 128], strides = [1, 1]} : vector<2x384xf32> to vector<2x128xf32>
    %216 = math.tanh %214 : vector<2x128xf32>
    %217 = arith.mulf %215, %216 : vector<2x128xf32>
    %218 = vector.extract_strided_slice %176 {offsets = [4, 0], sizes = [2, 512], strides = [1, 1]} : vector<16x512xf32> to vector<2x512xf32>
    %cst_39 = arith.constant dense<0.000000e+00> : vector<2x512xf32>
    %219 = tpu.matmul %217, %177, %cst_39 {dimension_numbers = #tpu.dot_dimension_numbers<[1], [0], [0], [1], [0, 0, 1, 1], [], []>} : vector<2x128xf32>, vector<128x512xf32>, vector<2x512xf32> -> vector<2x512xf32>
    %220 = arith.addf %218, %219 : vector<2x512xf32>
    %221 = vector.extract_strided_slice %220 {offsets = [0, 0], sizes = [2, 384], strides = [1, 1]} : vector<2x512xf32> to vector<2x384xf32>
    %222 = arith.negf %221 : vector<2x384xf32>
    %223 = math.exp %222 : vector<2x384xf32>
    %cst_40 = arith.constant 1.000000e+00 : f32
    %224 = vector.broadcast %cst_40 : f32 to vector<2x384xf32>
    %225 = arith.addf %224, %223 : vector<2x384xf32>
    %226 = arith.divf %224, %225 : vector<2x384xf32>
    %227 = vector.extract_strided_slice %220 {offsets = [0, 384], sizes = [2, 128], strides = [1, 1]} : vector<2x512xf32> to vector<2x128xf32>
    %228 = math.tanh %227 : vector<2x128xf32>
    %229 = vector.extract_strided_slice %226 {offsets = [0, 128], sizes = [2, 128], strides = [1, 1]} : vector<2x384xf32> to vector<2x128xf32>
    %230 = arith.mulf %229, %214 : vector<2x128xf32>
    %231 = vector.extract_strided_slice %226 {offsets = [0, 0], sizes = [2, 128], strides = [1, 1]} : vector<2x384xf32> to vector<2x128xf32>
    %232 = arith.mulf %231, %228 : vector<2x128xf32>
    %233 = arith.addf %230, %232 : vector<2x128xf32>
    %234 = vector.extract_strided_slice %226 {offsets = [0, 256], sizes = [2, 128], strides = [1, 1]} : vector<2x384xf32> to vector<2x128xf32>
    %235 = math.tanh %233 : vector<2x128xf32>
    %236 = arith.mulf %234, %235 : vector<2x128xf32>
    %237 = vector.extract_strided_slice %176 {offsets = [6, 0], sizes = [2, 512], strides = [1, 1]} : vector<16x512xf32> to vector<2x512xf32>
    %cst_41 = arith.constant dense<0.000000e+00> : vector<2x512xf32>
    %238 = tpu.matmul %236, %177, %cst_41 {dimension_numbers = #tpu.dot_dimension_numbers<[1], [0], [0], [1], [0, 0, 1, 1], [], []>} : vector<2x128xf32>, vector<128x512xf32>, vector<2x512xf32> -> vector<2x512xf32>
    %239 = arith.addf %237, %238 : vector<2x512xf32>
    %240 = vector.extract_strided_slice %239 {offsets = [0, 0], sizes = [2, 384], strides = [1, 1]} : vector<2x512xf32> to vector<2x384xf32>
    %241 = arith.negf %240 : vector<2x384xf32>
    %242 = math.exp %241 : vector<2x384xf32>
    %cst_42 = arith.constant 1.000000e+00 : f32
    %243 = vector.broadcast %cst_42 : f32 to vector<2x384xf32>
    %244 = arith.addf %243, %242 : vector<2x384xf32>
    %245 = arith.divf %243, %244 : vector<2x384xf32>
    %246 = vector.extract_strided_slice %239 {offsets = [0, 384], sizes = [2, 128], strides = [1, 1]} : vector<2x512xf32> to vector<2x128xf32>
    %247 = math.tanh %246 : vector<2x128xf32>
    %248 = vector.extract_strided_slice %245 {offsets = [0, 128], sizes = [2, 128], strides = [1, 1]} : vector<2x384xf32> to vector<2x128xf32>
    %249 = arith.mulf %248, %233 : vector<2x128xf32>
    %250 = vector.extract_strided_slice %245 {offsets = [0, 0], sizes = [2, 128], strides = [1, 1]} : vector<2x384xf32> to vector<2x128xf32>
    %251 = arith.mulf %250, %247 : vector<2x128xf32>
    %252 = arith.addf %249, %251 : vector<2x128xf32>
    %253 = vector.extract_strided_slice %245 {offsets = [0, 256], sizes = [2, 128], strides = [1, 1]} : vector<2x384xf32> to vector<2x128xf32>
    %254 = math.tanh %252 : vector<2x128xf32>
    %255 = arith.mulf %253, %254 : vector<2x128xf32>
    %256 = vector.extract_strided_slice %176 {offsets = [8, 0], sizes = [2, 512], strides = [1, 1]} : vector<16x512xf32> to vector<2x512xf32>
    %cst_43 = arith.constant dense<0.000000e+00> : vector<2x512xf32>
    %257 = tpu.matmul %255, %177, %cst_43 {dimension_numbers = #tpu.dot_dimension_numbers<[1], [0], [0], [1], [0, 0, 1, 1], [], []>} : vector<2x128xf32>, vector<128x512xf32>, vector<2x512xf32> -> vector<2x512xf32>
    %258 = arith.addf %256, %257 : vector<2x512xf32>
    %259 = vector.extract_strided_slice %258 {offsets = [0, 0], sizes = [2, 384], strides = [1, 1]} : vector<2x512xf32> to vector<2x384xf32>
    %260 = arith.negf %259 : vector<2x384xf32>
    %261 = math.exp %260 : vector<2x384xf32>
    %cst_44 = arith.constant 1.000000e+00 : f32
    %262 = vector.broadcast %cst_44 : f32 to vector<2x384xf32>
    %263 = arith.addf %262, %261 : vector<2x384xf32>
    %264 = arith.divf %262, %263 : vector<2x384xf32>
    %265 = vector.extract_strided_slice %258 {offsets = [0, 384], sizes = [2, 128], strides = [1, 1]} : vector<2x512xf32> to vector<2x128xf32>
    %266 = math.tanh %265 : vector<2x128xf32>
    %267 = vector.extract_strided_slice %264 {offsets = [0, 128], sizes = [2, 128], strides = [1, 1]} : vector<2x384xf32> to vector<2x128xf32>
    %268 = arith.mulf %267, %252 : vector<2x128xf32>
    %269 = vector.extract_strided_slice %264 {offsets = [0, 0], sizes = [2, 128], strides = [1, 1]} : vector<2x384xf32> to vector<2x128xf32>
    %270 = arith.mulf %269, %266 : vector<2x128xf32>
    %271 = arith.addf %268, %270 : vector<2x128xf32>
    %272 = vector.extract_strided_slice %264 {offsets = [0, 256], sizes = [2, 128], strides = [1, 1]} : vector<2x384xf32> to vector<2x128xf32>
    %273 = math.tanh %271 : vector<2x128xf32>
    %274 = arith.mulf %272, %273 : vector<2x128xf32>
    %275 = vector.extract_strided_slice %176 {offsets = [10, 0], sizes = [2, 512], strides = [1, 1]} : vector<16x512xf32> to vector<2x512xf32>
    %cst_45 = arith.constant dense<0.000000e+00> : vector<2x512xf32>
    %276 = tpu.matmul %274, %177, %cst_45 {dimension_numbers = #tpu.dot_dimension_numbers<[1], [0], [0], [1], [0, 0, 1, 1], [], []>} : vector<2x128xf32>, vector<128x512xf32>, vector<2x512xf32> -> vector<2x512xf32>
    %277 = arith.addf %275, %276 : vector<2x512xf32>
    %278 = vector.extract_strided_slice %277 {offsets = [0, 0], sizes = [2, 384], strides = [1, 1]} : vector<2x512xf32> to vector<2x384xf32>
    %279 = arith.negf %278 : vector<2x384xf32>
    %280 = math.exp %279 : vector<2x384xf32>
    %cst_46 = arith.constant 1.000000e+00 : f32
    %281 = vector.broadcast %cst_46 : f32 to vector<2x384xf32>
    %282 = arith.addf %281, %280 : vector<2x384xf32>
    %283 = arith.divf %281, %282 : vector<2x384xf32>
    %284 = vector.extract_strided_slice %277 {offsets = [0, 384], sizes = [2, 128], strides = [1, 1]} : vector<2x512xf32> to vector<2x128xf32>
    %285 = math.tanh %284 : vector<2x128xf32>
    %286 = vector.extract_strided_slice %283 {offsets = [0, 128], sizes = [2, 128], strides = [1, 1]} : vector<2x384xf32> to vector<2x128xf32>
    %287 = arith.mulf %286, %271 : vector<2x128xf32>
    %288 = vector.extract_strided_slice %283 {offsets = [0, 0], sizes = [2, 128], strides = [1, 1]} : vector<2x384xf32> to vector<2x128xf32>
    %289 = arith.mulf %288, %285 : vector<2x128xf32>
    %290 = arith.addf %287, %289 : vector<2x128xf32>
    %291 = vector.extract_strided_slice %283 {offsets = [0, 256], sizes = [2, 128], strides = [1, 1]} : vector<2x384xf32> to vector<2x128xf32>
    %292 = math.tanh %290 : vector<2x128xf32>
    %293 = arith.mulf %291, %292 : vector<2x128xf32>
    %294 = vector.extract_strided_slice %176 {offsets = [12, 0], sizes = [2, 512], strides = [1, 1]} : vector<16x512xf32> to vector<2x512xf32>
    %cst_47 = arith.constant dense<0.000000e+00> : vector<2x512xf32>
    %295 = tpu.matmul %293, %177, %cst_47 {dimension_numbers = #tpu.dot_dimension_numbers<[1], [0], [0], [1], [0, 0, 1, 1], [], []>} : vector<2x128xf32>, vector<128x512xf32>, vector<2x512xf32> -> vector<2x512xf32>
    %296 = arith.addf %294, %295 : vector<2x512xf32>
    %297 = vector.extract_strided_slice %296 {offsets = [0, 0], sizes = [2, 384], strides = [1, 1]} : vector<2x512xf32> to vector<2x384xf32>
    %298 = arith.negf %297 : vector<2x384xf32>
    %299 = math.exp %298 : vector<2x384xf32>
    %cst_48 = arith.constant 1.000000e+00 : f32
    %300 = vector.broadcast %cst_48 : f32 to vector<2x384xf32>
    %301 = arith.addf %300, %299 : vector<2x384xf32>
    %302 = arith.divf %300, %301 : vector<2x384xf32>
    %303 = vector.extract_strided_slice %296 {offsets = [0, 384], sizes = [2, 128], strides = [1, 1]} : vector<2x512xf32> to vector<2x128xf32>
    %304 = math.tanh %303 : vector<2x128xf32>
    %305 = vector.extract_strided_slice %302 {offsets = [0, 128], sizes = [2, 128], strides = [1, 1]} : vector<2x384xf32> to vector<2x128xf32>
    %306 = arith.mulf %305, %290 : vector<2x128xf32>
    %307 = vector.extract_strided_slice %302 {offsets = [0, 0], sizes = [2, 128], strides = [1, 1]} : vector<2x384xf32> to vector<2x128xf32>
    %308 = arith.mulf %307, %304 : vector<2x128xf32>
    %309 = arith.addf %306, %308 : vector<2x128xf32>
    %310 = vector.extract_strided_slice %302 {offsets = [0, 256], sizes = [2, 128], strides = [1, 1]} : vector<2x384xf32> to vector<2x128xf32>
    %311 = math.tanh %309 : vector<2x128xf32>
    %312 = arith.mulf %310, %311 : vector<2x128xf32>
    %313 = vector.extract_strided_slice %176 {offsets = [14, 0], sizes = [2, 512], strides = [1, 1]} : vector<16x512xf32> to vector<2x512xf32>
    %cst_49 = arith.constant dense<0.000000e+00> : vector<2x512xf32>
    %314 = tpu.matmul %312, %177, %cst_49 {dimension_numbers = #tpu.dot_dimension_numbers<[1], [0], [0], [1], [0, 0, 1, 1], [], []>} : vector<2x128xf32>, vector<128x512xf32>, vector<2x512xf32> -> vector<2x512xf32>
    %315 = arith.addf %313, %314 : vector<2x512xf32>
    %316 = vector.extract_strided_slice %315 {offsets = [0, 0], sizes = [2, 384], strides = [1, 1]} : vector<2x512xf32> to vector<2x384xf32>
    %317 = arith.negf %316 : vector<2x384xf32>
    %318 = math.exp %317 : vector<2x384xf32>
    %cst_50 = arith.constant 1.000000e+00 : f32
    %319 = vector.broadcast %cst_50 : f32 to vector<2x384xf32>
    %320 = arith.addf %319, %318 : vector<2x384xf32>
    %321 = arith.divf %319, %320 : vector<2x384xf32>
    %322 = vector.extract_strided_slice %315 {offsets = [0, 384], sizes = [2, 128], strides = [1, 1]} : vector<2x512xf32> to vector<2x128xf32>
    %323 = math.tanh %322 : vector<2x128xf32>
    %324 = vector.extract_strided_slice %321 {offsets = [0, 128], sizes = [2, 128], strides = [1, 1]} : vector<2x384xf32> to vector<2x128xf32>
    %325 = arith.mulf %324, %309 : vector<2x128xf32>
    %326 = vector.extract_strided_slice %321 {offsets = [0, 0], sizes = [2, 128], strides = [1, 1]} : vector<2x384xf32> to vector<2x128xf32>
    %327 = arith.mulf %326, %323 : vector<2x128xf32>
    %328 = arith.addf %325, %327 : vector<2x128xf32>
    %329 = vector.extract_strided_slice %321 {offsets = [0, 256], sizes = [2, 128], strides = [1, 1]} : vector<2x384xf32> to vector<2x128xf32>
    %330 = math.tanh %328 : vector<2x128xf32>
    %331 = arith.mulf %329, %330 : vector<2x128xf32>
    %c0_51 = arith.constant 0 : index
    %c0_52 = arith.constant 0 : index
    %332 = vector.load %arg10[%c0_51, %c0_52] : memref<2x128xf32, #tpu.memory_space<vmem>>, vector<2x128xf32>
    tpu.vector_store %arg10[%c0_51, %c0_52], %331 {strides = array<i32>} : memref<2x128xf32, #tpu.memory_space<vmem>>, vector<2x128xf32>,
    %c0_53 = arith.constant 0 : index
    %c0_54 = arith.constant 0 : index
    %333 = vector.load %arg7[%c0_53, %c0_54] : memref<128x5xf32, #tpu.memory_space<vmem>>, vector<128x5xf32>
    %cst_55 = arith.constant dense<0.000000e+00> : vector<2x5xf32>
    %334 = tpu.matmul %331, %333, %cst_55 {dimension_numbers = #tpu.dot_dimension_numbers<[1], [0], [0], [1], [0, 0, 1, 1], [], []>} : vector<2x128xf32>, vector<128x5xf32>, vector<2x5xf32> -> vector<2x5xf32>
    %c0_56 = arith.constant 0 : index
    %c0_57 = arith.constant 0 : index
    %335 = vector.load %arg8[%c0_56, %c0_57] : memref<1x5xf32, #tpu.memory_space<vmem>>, vector<1x5xf32>
    %336 = vector.broadcast %335 : vector<1x5xf32> to vector<2x5xf32>
    %337 = arith.addf %334, %336 : vector<2x5xf32>
    %c0_58 = arith.constant 0 : index
    %c0_59 = arith.constant 0 : index
    %338 = vector.load %arg9[%c0_58, %c0_59] : memref<2x5xf32, #tpu.memory_space<vmem>>, vector<2x5xf32>
    tpu.vector_store %arg9[%c0_58, %c0_59], %337 {strides = array<i32>} : memref<2x5xf32, #tpu.memory_space<vmem>>, vector<2x5xf32>,
    return
  }
}

</mosaic_0001>

<bundles_post_ra>
// kernel: audio_model_hc_forward.1
= control target key start
LH: loop header
LB: loop body
LE: loop exit
PB: predicated region body
PF: predicated region fallthrough
CT: control target
= control target key end

     0   :  { %16 = vsyncpa [#allocation3], 0  ;;  %vm65_vm0 = vcmask 1040384   ;;  %v5896_v5 = vmov 0.0   ;;  %vm58_vm1 = vcmask 203776   ;;  %s5883_s0 = inlined_call_operand.vmem [shape: f32[2,8,25], index: 0, kind: input, shape index: {}]   ;;  %s5884_s1 = inlined_call_operand.vmem [shape: f32[25,256], index: 1, kind: input, shape index: {}]   ;;  %s5885_s2 = inlined_call_operand.vmem [shape: f32[64,256], index: 2, kind: input, shape index: {}]   ;;  %s5886_s3 = inlined_call_operand.vmem [shape: f32[1,256], index: 3, kind: input, shape index: {}]   ;;  %s5887_s4 = inlined_call_operand.vmem [shape: f32[64,512], index: 4, kind: input, shape index: {}]   ;;  %s5888_s5 = inlined_call_operand.vmem [shape: f32[128,512], index: 5, kind: input, shape index: {}]   ;;  %s5889_s6 = inlined_call_operand.vmem [shape: f32[1,512], index: 6, kind: input, shape index: {}]   ;;  %s5890_s7 = inlined_call_operand.vmem [shape: f32[128,5], index: 7, kind: input, shape index: {}]   ;;  %s5891_s8 = inlined_call_operand.vmem [shape: f32[1,5], index: 8, kind: input, shape index: {}]   ;;  %s5892_s9 = inlined_call_operand.hbm [shape: f32[2,5], index: 9, kind: output, shape index: {0}]   ;;  %s5893_s10 = inlined_call_operand.hbm [shape: f32[2,128], index: 10, kind: output, shape index: {1}]  }
   0x1   :  { %v45_v0 = vld [vmem:[%s5884_s1 + $0x38] sm:$0x1]  ;;  %v44_v1 = vld [vmem:[%s5884_s1 + $0x30] sm:$0x1]  ;;  %v43_v2 = vld [vmem:[%s5884_s1 + $0x28] sm:$0xff]  ;;  %136 = vmatprep.mubr.f32.mxu0 %v5896_v5  ;;  %538 = vmatprep.mubr.f32.mxu1 %v5896_v5 }
   0x2   :  { %3327 = vmatprep.subr.msk.mxu0 %vm65_vm0, %v45_v0  ;;  %v42_v3 = vld [vmem:[%s5884_s1 + $0x20] sm:$0xff]  ;;  %v41_v4 = vld [vmem:[%s5884_s1 + $0x18] sm:$0xff]  ;;  %v40_v6 = vld [vmem:[%s5884_s1 + $0x10] sm:$0xff] }
   0x3   :  { %3328 = vmatpush1.msk.msra.mxu0 %vm65_vm0, %v44_v1  ;;  %v3968_v7 = vld [vmem:[%s5885_s2 + $0x78] sm:$0xff]  ;;  %v39_v8 = vld [vmem:[%s5884_s1 + $0x8] sm:$0xff]  ;;  %v3977_v9 = vld [vmem:[%s5885_s2 + $0x70] sm:$0xff] }
   0x4   :  { %98 = vmatprep.subr.mxu0 %v43_v2  ;;  %490 = vmatprep.subr.mxu1 %v3968_v7  ;;  %v38_v10 = vld [vmem:[%s5884_s1] sm:$0xff]  ;;  %v3986_v11 = vld [vmem:[%s5885_s2 + $0x68] sm:$0xff]  ;;  %v4001_v14 = vld [vmem:[%s5885_s2 + $0x58] sm:$0xff] }
   0x5   :  { %99 = vmatpush1.msra.mxu0 %v42_v3  ;;  %491 = vmatpush1.msra.mxu1 %v3977_v9  ;;  %v36_v12 = vld [vmem:[%s5883_s0] sm:$0xff] }
   0x6   :  { %100 = vmatprep.subr.mxu0 %v41_v4  ;;  %v3995_v13 = vld [vmem:[%s5885_s2 + $0x60] sm:$0xff]  ;;  %492 = vmatprep.subr.mxu1 %v3986_v11 }
   0x7   :  { %101 = vmatpush1.msra.mxu0 %v40_v6  ;;  %493 = vmatpush1.msra.mxu1 %v3995_v13 }
   0x8   :  { %102 = vmatprep.subr.mxu0 %v39_v8  ;;  %494 = vmatprep.subr.mxu1 %v4001_v14 }
   0x9   :  { %103 = vmatpush1.msra.mxu0 %v38_v10 }
   0xa   :  { %3329 = vmatmul.mubr.msk.f32.vlgmr.msra.gmra.mxu0 %vm58_vm1, %v36_v12  ;;  %185 = vmatprep.subr.mxu0 %v3968_v7 }
   0xb   :  { %17 = vsyncpa [#allocation5], 0  ;;  %186 = vmatpush1.msra.mxu0 %v3977_v9  ;;  %v4011_v15 = vld [vmem:[%s5885_s2 + $0x50] sm:$0xff]  ;;  %142 = vmatprep.mubr.f32.mxu0 %v5896_v5  ;;  %v37_v16 = vld [vmem:[%s5883_s0 + $0x8] sm:$0xff]  ;;  %v48_v28 = vlaneseq  ;;  %s3887_s24 = smov 64   ;;  %vm315_vm2 = vcmask 1041409  }
   0xc   :  { %187 = vmatprep.subr.mxu0 %v3986_v11  ;;  %v4021_v17 = vld [vmem:[%s5885_s2 + $0x48] sm:$0xff]  ;;  %495 = vmatpush1.msra.mxu1 %v4011_v15  ;;  %v4030_v18 = vld [vmem:[%s5885_s2 + $0x40] sm:$0xff]  ;;  %v4037_v19 = vld [vmem:[%s5885_s2 + $0x38] sm:$0xff]  ;;  %vm165_vm3 = vcmask 523264   ;;  %vm1418_vm4 = vcmask 1043459   ;;  %vm1445_vm5 = vcmask 1041408  }
   0xd   :  { %188 = vmatpush1.msra.mxu0 %v3995_v13  ;;  %496 = vmatprep.subr.mxu1 %v4021_v17  ;;  %v4044_v20 = vld [vmem:[%s5885_s2 + $0x30] sm:$0xff]  ;;  %v4051_v21 = vld [vmem:[%s5885_s2 + $0x28] sm:$0xff]  ;;  %v4058_v22 = vld [vmem:[%s5885_s2 + $0x20] sm:$0xff]  ;;  %v4114_v30 = vshrl.u32 %v48_v28, 7  ;;  %vm1423_vm6 = vcmask 1045509   ;;  %vm1447_vm7 = vcmask 1043456  }
   0xe   :  { %189 = vmatprep.subr.mxu0 %v4001_v14  ;;  %3330 = vmatmul.mubr.msk.f32.gmra.mxu0 %vm58_vm1, %v37_v16  ;;  %v4065_v23 = vld [vmem:[%s5885_s2 + $0x18] sm:$0xff]  ;;  %v4072_v24 = vld [vmem:[%s5885_s2 + $0x10] sm:$0xff]  ;;  %v4079_v25 = vld [vmem:[%s5885_s2 + $0x8] sm:$0xff]  ;;  %vm1428_vm8 = vcmask 1047559   ;;  %vm1449_vm9 = vcmask 1045504   ;;  %vm3888_vm10 = vmmov 0  }
   0xf   :  { %190 = vmatpush1.msra.mxu0 %v4011_v15  ;;  %233 = vmatprep.mubr.f32.mxu0 %v5896_v5  ;;  %v4086_v26 = vld [vmem:[%s5885_s2] sm:$0xff]  ;;  %6001 = vst [vmem:[#allocation8_spill] sm:$0xff] %v4114_v30  ;;  %v5894_v32 = vsub.s32 1, %v4114_v30  ;;  %v5895_v45 = vsub.s32 0, %v4114_v30  ;;  %v4878_v30 = vld [vmem:[%s5888_s5 + $0x8] sm:$0xff] }
  0x10   :  { %191 = vmatprep.subr.mxu0 %v4021_v17  ;;  %497 = vmatpush1.msra.mxu1 %v4030_v18  ;;  %v46_v34 = vld [vmem:[%s5886_s3] sm:$0x3]  ;;  %6020 = vst [vmem:[#allocation27_spill] sm:$0xff] %v4878_v30 }
  0x11   :  { %192 = vmatpush1.msra.mxu0 %v4030_v18  ;;  %498 = vmatprep.subr.mxu1 %v4037_v19  ;;  %v55_v36 = vrot.slane %v46_v34, %v5894_v32  ;;  %v51_v46 = vrot.slane %v46_v34, %v5895_v45  ;;  %v4861_v32 = vld [vmem:[%s5888_s5 + $0x38] sm:$0xff]  ;;  %v4866_v45 = vld [vmem:[%s5888_s5 + $0x20] sm:$0xff] }
  0x12   :  { %193 = vmatprep.subr.mxu0 %v4037_v19  ;;  %499 = vmatpush1.msra.mxu1 %v4044_v20  ;;  %6017 = vst [vmem:[#allocation24_spill] sm:$0xff] %v4861_v32  ;;  %6018 = vst [vmem:[#allocation25_spill] sm:$0xff] %v4866_v45 }
  0x13   :  { %194 = vmatpush1.msra.mxu0 %v4044_v20  ;;  %500 = vmatprep.subr.mxu1 %v4051_v21 }
  0x14   :  { %195 = vmatprep.subr.mxu0 %v4051_v21  ;;  %501 = vmatpush1.msra.mxu1 %v4058_v22 }
  0x15   :  { %196 = vmatpush1.msra.mxu0 %v4058_v22  ;;  %502 = vmatprep.subr.mxu1 %v4065_v23 }
  0x16   :  { %197 = vmatprep.subr.mxu0 %v4065_v23  ;;  %503 = vmatpush1.msra.mxu1 %v4072_v24 }
  0x17   :  { %198 = vmatpush1.msra.mxu0 %v4072_v24  ;;  %504 = vmatprep.subr.mxu1 %v4079_v25 }
  0x18   :  { %199 = vmatprep.subr.mxu0 %v4079_v25  ;;  %505 = vmatpush1.msra.mxu1 %v4086_v26 }
  0x19   :  { %200 = vmatpush1.msra.mxu0 %v4086_v26  ;;  %806 = vmatprep.subr.mxu1 %v3968_v7 }
  0x1a   :  { %234 = vmatmul.mubr.f32.vlgmr.msra.gmra.mxu0 %v5896_v5  ;;  %335 = vmatprep.subr.mxu0 %v3968_v7 }
  0x1b   :  { %336 = vmatpush1.msra.mxu0 %v3977_v9  ;;  %383 = vmatprep.mubr.f32.mxu0 %v5896_v5 }
  0x1c   :  { %337 = vmatprep.subr.mxu0 %v3986_v11 }
  0x1d   :  { %338 = vmatpush1.msra.mxu0 %v3995_v13 }
  0x1e   :  { %339 = vmatprep.subr.mxu0 %v4001_v14 }
  0x1f   :  { %340 = vmatpush1.msra.mxu0 %v4011_v15 }
  0x20   :  { %341 = vmatprep.subr.mxu0 %v4021_v17 }
  0x21   :  { %342 = vmatpush1.msra.mxu0 %v4030_v18 }
  0x22   :  { %343 = vmatprep.subr.mxu0 %v4037_v19 }
  0x23   :  { %344 = vmatpush1.msra.mxu0 %v4044_v20 }
  0x24   :  { %345 = vmatprep.subr.mxu0 %v4051_v21 }
  0x25   :  { %346 = vmatpush1.msra.mxu0 %v4058_v22 }
  0x26   :  { %347 = vmatprep.subr.mxu0 %v4065_v23 }
  0x27   :  { %348 = vmatpush1.msra.mxu0 %v4072_v24 }
  0x28   :  { %349 = vmatprep.subr.mxu0 %v4079_v25 }
  0x29   :  { %350 = vmatpush1.msra.mxu0 %v4086_v26 }
  0x2a   :  { %648 = vmatprep.subr.mxu0 %v3968_v7 }
  0xca   :  { %v138_v27 = vpop.f32.mrf.mxu0 }
  0xcb   :  { %v4136_v50 = vadd.f32 %v138_v27, %v51_v46 }
  0xcc   :  { %v140_v29 = vpop.f32.mrf.mxu0 }
  0xcd   :  { %v4125_v41 = vadd.f32 %v140_v29, %v55_v36 }
  0xce   :  { %v144_v31 = vpop.f32.mrf.mxu0 }
  0xcf   :  { %v4133_v48 = vadd.f32 %v144_v31, %v51_v46 }
  0xd0   :  { %v146_v33 = vpop.f32.mrf.mxu0 }
  0xd1   :  { %v4122_v39 = vadd.f32 %v146_v33, %v55_v36 }
  0xda   :  { %v235_v35 = vpop.f32.mrf.mxu0 }
  0xdb   :  { %v242_v47 = vrot.slane %v235_v35, 1  ;;  %v248_v51 = vadd.f32 %v235_v35, %v4136_v50 }
  0xdc   :  { %v237_v37 = vpop.f32.mrf.mxu0 }
  0xdd   :  { %v243_v38 = vrot.slane %v237_v37, 1  ;;  %v249_v42 = vadd.f32 %v237_v37, %v4125_v41  ;;  %v250_v49 = vadd.f32 %v242_v47, %v4133_v48  ;;  %v3331_v53 = vmul.f32 -1.442695, %v248_v51 }
  0xdf   :  { %v251_v40 = vadd.f32 %v243_v38, %v4122_v39  ;;  %v3333_v52 = vmul.f32 -1.442695, %v250_v49  ;;  %v3332_v16 = vmul.f32 -1.442695, %v249_v42 }
  0xe1   :  { %3456 = vtanh.f32 %v251_v40  ;;  %v3334_v12 = vmul.f32 -1.442695, %v251_v40 }
  0xe2   :  { %3458 = vtanh.f32 %v249_v42 }
  0xe3   :  { %3460 = vpow2.f32 %v3333_v52 }
  0xe4   :  { %3462 = vpow2.f32 %v3331_v53 }
  0xee   :  { %v3457_v43 = vpop.eup %3456 }
  0xef   :  { %284 = vrot.lane.b32.xlu0 %v3457_v43, %s3887_s24  ;;  %v3459_v44 = vpop.eup %3458 }
  0xf0   :  { %v3461_v54 = vpop.eup %3460 }
  0xf1   :  { %v266_v55 = vadd.f32 1.0, %v3461_v54  ;;  %v3463_v56 = vpop.eup %3462 }
  0xf2   :  { %v264_v57 = vadd.f32 1.0, %v3463_v56 }
  0xf3   :  { %282 = vrot.lane.b32.xlu0 %v3459_v44, %s3887_s24  ;;  %3464 = vrcp.f32 %v266_v55 }
  0xf4   :  { %3466 = vrcp.f32 %v264_v57 }
 0x100   :  { %v3465_v58 = vpop.eup %3464 }
 0x101   :  { %v3467_v61 = vpop.eup %3466  ;;  %v279_v0 = vmul.f32 0.0, %v3465_v58 }
 0x102   :  { %v278_v3 = vmul.f32 0.0, %v3467_v61 }
 0x161   :  { %v285_v59 = vpop.permute.xlu0 %284 }
 0x162   :  { %v289_v60 = vmul.f32 %v3465_v58, %v285_v59 }
 0x164   :  { %294 = vrot.lane.b32.xlu1 %v289_v60, %s3887_s24 }
 0x165   :  { %v283_v62 = vpop.permute.xlu0 %282 }
 0x166   :  { %v288_v63 = vmul.f32 %v3467_v61, %v283_v62 }
 0x168   :  { %292 = vrot.lane.b32.xlu1 %v288_v63, %s3887_s24 }
 0x1d6   :  { %v295_v1 = vpop.permute.xlu1 %294 }
 0x1d7   :  { %v4141_v2 = vadd.f32 %v295_v1, %v279_v0 }
 0x1d9   :  { %3468 = vtanh.f32 %v4141_v2 }
 0x1da   :  { %v293_v4 = vpop.permute.xlu1 %292 }
 0x1db   :  { %v4144_v6 = vadd.f32 %v293_v4, %v278_v3 }
 0x1dd   :  { %3470 = vtanh.f32 %v4144_v6 }
 0x1de   :  { %3472 = vpow2.f32 %v3334_v12 }
 0x1df   :  { %3474 = vpow2.f32 %v3332_v16  ;;  %v430_v16 = vrot.slane %v4144_v6, 7 }
 0x1e6   :  { %v3469_v8 = vpop.eup %3468 }
 0x1e7   :  { %306 = vrot.lane.b32.xlu0 %v3469_v8, %s3887_s24  ;;  %v431_v8 = vrot.slane %v4141_v2, 7 }
 0x1ea   :  { %v3471_v10 = vpop.eup %3470 }
 0x1eb   :  { %304 = vrot.lane.b32.xlu1 %v3471_v10, %s3887_s24  ;;  %v3473_v27 = vpop.eup %3472 }
 0x1ec   :  { %v267_v28 = vadd.f32 1.0, %v3473_v27  ;;  %v3475_v29 = vpop.eup %3474 }
 0x1ed   :  { %v265_v31 = vadd.f32 1.0, %v3475_v29 }
 0x1ee   :  { %3476 = vrcp.f32 %v267_v28 }
 0x1ef   :  { %3478 = vrcp.f32 %v265_v31 }
 0x1fb   :  { %v3477_v33 = vpop.eup %3476 }
 0x1fc   :  { %v3479_v36 = vpop.eup %3478 }
 0x259   :  { %v307_v34 = vpop.permute.xlu0 %306 }
 0x25a   :  { %v311_v35 = vmul.f32 %v3477_v33, %v307_v34 }
 0x25c   :  { %v314_v38 = vrot.slane %v311_v35, 7 }
 0x25d   :  { %v305_v37 = vpop.permute.xlu1 %304 }
 0x25e   :  { %v310_v43 = vmul.f32 %v3479_v36, %v305_v37 }
 0x260   :  { %v4150_v40 = vsel %vm315_vm2, %v314_v38, %v310_v43 }
 0x261   :  { %3335 = vmatmul.mubr.msk.f32.vlgmr.msra.gmra.mxu0 %vm165_vm3, %v4150_v40 }
 0x262   :  { %649 = vmatpush1.msra.mxu0 %v3977_v9  ;;  %696 = vmatprep.mubr.f32.mxu0 %v5896_v5 }
 0x263   :  { %650 = vmatprep.subr.mxu0 %v3986_v11 }
 0x264   :  { %651 = vmatpush1.msra.mxu0 %v3995_v13 }
 0x265   :  { %652 = vmatprep.subr.mxu0 %v4001_v14 }
 0x266   :  { %653 = vmatpush1.msra.mxu0 %v4011_v15 }
 0x267   :  { %654 = vmatprep.subr.mxu0 %v4021_v17 }
 0x268   :  { %655 = vmatpush1.msra.mxu0 %v4030_v18 }
 0x269   :  { %656 = vmatprep.subr.mxu0 %v4037_v19 }
 0x26a   :  { %657 = vmatpush1.msra.mxu0 %v4044_v20 }
 0x26b   :  { %658 = vmatprep.subr.mxu0 %v4051_v21 }
 0x26c   :  { %659 = vmatpush1.msra.mxu0 %v4058_v22 }
 0x26d   :  { %660 = vmatprep.subr.mxu0 %v4065_v23 }
 0x26e   :  { %661 = vmatpush1.msra.mxu0 %v4072_v24 }
 0x26f   :  { %662 = vmatprep.subr.mxu0 %v4079_v25 }
 0x270   :  { %663 = vmatpush1.msra.mxu0 %v4086_v26 }
 0x271   :  { %964 = vmatprep.subr.mxu0 %v3968_v7 }
 0x321   :  { %v385_v42 = vpop.f32.mrf.mxu0 }
 0x322   :  { %v392_v53 = vrot.slane %v385_v42, 7  ;;  %v400_v54 = vadd.f32 %v385_v42, %v4133_v48 }
 0x323   :  { %v387_v44 = vpop.f32.mrf.mxu0 }
 0x324   :  { %v393_v46 = vrot.slane %v387_v44, 7  ;;  %v401_v47 = vadd.f32 %v387_v44, %v4122_v39  ;;  %v398_v55 = vadd.f32 %v392_v53, %v4136_v50  ;;  %v3338_v56 = vmul.f32 -1.442695, %v400_v54 }
 0x326   :  { %v399_v49 = vadd.f32 %v393_v46, %v4125_v41  ;;  %3480 = vtanh.f32 %v401_v47  ;;  %v3336_v57 = vmul.f32 -1.442695, %v398_v55  ;;  %v3339_v2 = vmul.f32 -1.442695, %v401_v47 }
 0x328   :  { %3482 = vtanh.f32 %v399_v49  ;;  %v3337_v35 = vmul.f32 -1.442695, %v399_v49 }
 0x329   :  { %3484 = vpow2.f32 %v3338_v56 }
 0x32a   :  { %3486 = vpow2.f32 %v3336_v57 }
 0x333   :  { %v3481_v51 = vpop.eup %3480 }
 0x334   :  { %440 = vrot.lane.b32.xlu1 %v3481_v51, %s3887_s24 }
 0x335   :  { %v3483_v52 = vpop.eup %3482 }
 0x336   :  { %438 = vrot.lane.b32.xlu0 %v3483_v52, %s3887_s24  ;;  %v3485_v58 = vpop.eup %3484 }
 0x337   :  { %v416_v59 = vadd.f32 1.0, %v3485_v58  ;;  %v3487_v60 = vpop.eup %3486 }
 0x338   :  { %v414_v61 = vadd.f32 1.0, %v3487_v60 }
 0x339   :  { %3488 = vrcp.f32 %v416_v59 }
 0x33a   :  { %3490 = vrcp.f32 %v414_v61 }
 0x346   :  { %v3489_v62 = vpop.eup %3488 }
 0x347   :  { %v3491_v1 = vpop.eup %3490  ;;  %v435_v10 = vmul.f32 %v3489_v62, %v431_v8 }
 0x348   :  { %v434_v28 = vmul.f32 %v3491_v1, %v430_v16 }
 0x3a6   :  { %v441_v63 = vpop.permute.xlu1 %440 }
 0x3a7   :  { %v445_v0 = vmul.f32 %v3489_v62, %v441_v63 }
 0x3a8   :  { %v439_v3 = vpop.permute.xlu0 %438 }
 0x3a9   :  { %450 = vrot.lane.b32.xlu1 %v445_v0, %s3887_s24  ;;  %v444_v4 = vmul.f32 %v3491_v1, %v439_v3 }
 0x3ab   :  { %448 = vrot.lane.b32.xlu0 %v444_v4, %s3887_s24 }
 0x41b   :  { %v451_v12 = vpop.permute.xlu1 %450 }
 0x41c   :  { %v4181_v27 = vadd.f32 %v451_v12, %v435_v10 }
 0x41d   :  { %v449_v29 = vpop.permute.xlu0 %448 }
 0x41e   :  { %3492 = vtanh.f32 %v4181_v27  ;;  %v4184_v31 = vadd.f32 %v449_v29, %v434_v28 }
 0x420   :  { %3494 = vtanh.f32 %v4184_v31 }
 0x421   :  { %3496 = vpow2.f32 %v3339_v2 }
 0x422   :  { %3498 = vpow2.f32 %v3337_v35 }
 0x42b   :  { %v3493_v33 = vpop.eup %3492 }
 0x42c   :  { %462 = vrot.lane.b32.xlu1 %v3493_v33, %s3887_s24 }
 0x42d   :  { %v3495_v34 = vpop.eup %3494 }
 0x42e   :  { %460 = vrot.lane.b32.xlu0 %v3495_v34, %s3887_s24  ;;  %v3497_v6 = vpop.eup %3496 }
 0x42f   :  { %v3499_v36 = vpop.eup %3498  ;;  %v417_v37 = vadd.f32 1.0, %v3497_v6 }
 0x430   :  { %v415_v38 = vadd.f32 1.0, %v3499_v36 }
 0x431   :  { %3500 = vrcp.f32 %v417_v37  ;;  %v587_v37 = vrot.slane %v4184_v31, 7 }
 0x432   :  { %3502 = vrcp.f32 %v415_v38  ;;  %v588_v38 = vrot.slane %v4181_v27, 7 }
 0x43e   :  { %v3501_v42 = vpop.eup %3500 }
 0x43f   :  { %v3503_v46 = vpop.eup %3502 }
 0x49e   :  { %v463_v43 = vpop.permute.xlu1 %462 }
 0x49f   :  { %v467_v44 = vmul.f32 %v3501_v42, %v463_v43 }
 0x4a0   :  { %v461_v51 = vpop.permute.xlu0 %460 }
 0x4a1   :  { %v466_v52 = vmul.f32 %v3503_v46, %v461_v51  ;;  %v1417_v53 = vrot.slane %v467_v44, 6 }
 0x4a3   :  { %v470_v54 = vrot.slane %v466_v52, 1  ;;  %v1416_v55 = vrot.slane %v466_v52, 7 }
 0x4a5   :  { %v4190_v47 = vsel %vm1418_vm4, %v1417_v53, %v1416_v55  ;;  %v471_v49 = vsel %vm315_vm2, %v467_v44, %v470_v54 }
 0x4a6   :  { %3340 = vmatmul.mubr.msk.f32.vlgmr.msra.gmra.mxu1 %vm165_vm3, %v471_v49 }
 0x4a7   :  { %807 = vmatpush1.msra.mxu1 %v3977_v9  ;;  %854 = vmatprep.mubr.f32.mxu1 %v5896_v5 }
 0x4a8   :  { %808 = vmatprep.subr.mxu1 %v3986_v11 }
 0x4a9   :  { %809 = vmatpush1.msra.mxu1 %v3995_v13 }
 0x4aa   :  { %810 = vmatprep.subr.mxu1 %v4001_v14 }
 0x4ab   :  { %811 = vmatpush1.msra.mxu1 %v4011_v15 }
 0x4ac   :  { %812 = vmatprep.subr.mxu1 %v4021_v17 }
 0x4ad   :  { %813 = vmatpush1.msra.mxu1 %v4030_v18 }
 0x4ae   :  { %814 = vmatprep.subr.mxu1 %v4037_v19 }
 0x4af   :  { %815 = vmatpush1.msra.mxu1 %v4044_v20 }
 0x4b0   :  { %816 = vmatprep.subr.mxu1 %v4051_v21 }
 0x4b1   :  { %817 = vmatpush1.msra.mxu1 %v4058_v22 }
 0x4b2   :  { %818 = vmatprep.subr.mxu1 %v4065_v23 }
 0x4b3   :  { %819 = vmatpush1.msra.mxu1 %v4072_v24 }
 0x4b4   :  { %820 = vmatprep.subr.mxu1 %v4079_v25 }
 0x4b5   :  { %821 = vmatpush1.msra.mxu1 %v4086_v26 }
 0x4b6   :  { %1122 = vmatprep.subr.mxu1 %v3968_v7 }
 0x566   :  { %v540_v56 = vpop.f32.mrf.mxu1 }
 0x567   :  { %v547_v0 = vrot.slane %v540_v56, 6  ;;  %v549_v1 = vrot.slane %v540_v56, 7 }
 0x568   :  { %v542_v57 = vpop.f32.mrf.mxu1 }
 0x569   :  { %v548_v58 = vrot.slane %v542_v57, 6  ;;  %v550_v59 = vrot.slane %v542_v57, 7  ;;  %v555_v3 = vadd.f32 %v547_v0, %v4136_v50  ;;  %v557_v4 = vadd.f32 %v549_v1, %v4133_v48 }
 0x56b   :  { %v556_v60 = vadd.f32 %v548_v58, %v4125_v41  ;;  %v558_v61 = vadd.f32 %v550_v59, %v4122_v39  ;;  %v3341_v8 = vmul.f32 -1.442695, %v555_v3  ;;  %v3343_v10 = vmul.f32 -1.442695, %v557_v4 }
 0x56d   :  { %3504 = vtanh.f32 %v556_v60  ;;  %v3342_v31 = vmul.f32 -1.442695, %v556_v60  ;;  %v3344_v27 = vmul.f32 -1.442695, %v558_v61 }
 0x56e   :  { %3506 = vtanh.f32 %v558_v61 }
 0x56f   :  { %3508 = vpow2.f32 %v3341_v8  ;;  %v1446_v8 = vsel %vm1445_vm5, %v4150_v40, %v4190_v47 }
 0x570   :  { %3510 = vpow2.f32 %v3343_v10 }
 0x57a   :  { %v3505_v62 = vpop.eup %3504 }
 0x57b   :  { %v3507_v63 = vpop.eup %3506  ;;  %595 = vrot.lane.b32.xlu0 %v3505_v62, %s3887_s24 }
 0x57c   :  { %597 = vrot.lane.b32.xlu1 %v3507_v63, %s3887_s24  ;;  %v3509_v12 = vpop.eup %3508 }
 0x57d   :  { %v3511_v16 = vpop.eup %3510  ;;  %v571_v28 = vadd.f32 1.0, %v3509_v12 }
 0x57e   :  { %v573_v29 = vadd.f32 1.0, %v3511_v16 }
 0x57f   :  { %3512 = vrcp.f32 %v571_v28 }
 0x580   :  { %3514 = vrcp.f32 %v573_v29 }
 0x58c   :  { %v3513_v33 = vpop.eup %3512 }
 0x58d   :  { %v3515_v2 = vpop.eup %3514  ;;  %v591_v43 = vmul.f32 %v3513_v33, %v587_v37 }
 0x58e   :  { %v592_v42 = vmul.f32 %v3515_v2, %v588_v38 }
 0x5ed   :  { %v596_v34 = vpop.permute.xlu0 %595 }
 0x5ee   :  { %v598_v35 = vpop.permute.xlu1 %597  ;;  %v601_v6 = vmul.f32 %v3513_v33, %v596_v34 }
 0x5ef   :  { %v602_v36 = vmul.f32 %v3515_v2, %v598_v35 }
 0x5f0   :  { %605 = vrot.lane.b32.xlu0 %v601_v6, %s3887_s24 }
 0x5f1   :  { %607 = vrot.lane.b32.xlu1 %v602_v36, %s3887_s24 }
 0x662   :  { %v606_v44 = vpop.permute.xlu0 %605 }
 0x663   :  { %v608_v46 = vpop.permute.xlu1 %607  ;;  %v4221_v51 = vadd.f32 %v606_v44, %v591_v43 }
 0x664   :  { %v4223_v52 = vadd.f32 %v608_v46, %v592_v42 }
 0x665   :  { %3516 = vtanh.f32 %v4221_v51 }
 0x666   :  { %3518 = vtanh.f32 %v4223_v52 }
 0x667   :  { %3520 = vpow2.f32 %v3342_v31 }
 0x668   :  { %3522 = vpow2.f32 %v3344_v27 }
 0x672   :  { %v3517_v53 = vpop.eup %3516 }
 0x673   :  { %v3519_v54 = vpop.eup %3518  ;;  %617 = vrot.lane.b32.xlu0 %v3517_v53, %s3887_s24 }
 0x674   :  { %619 = vrot.lane.b32.xlu1 %v3519_v54, %s3887_s24  ;;  %v3521_v55 = vpop.eup %3520 }
 0x675   :  { %v3523_v49 = vpop.eup %3522  ;;  %v572_v56 = vadd.f32 1.0, %v3521_v55 }
 0x676   :  { %v574_v57 = vadd.f32 1.0, %v3523_v49 }
 0x677   :  { %3524 = vrcp.f32 %v572_v56 }
 0x678   :  { %3526 = vrcp.f32 %v574_v57  ;;  %v745_v57 = vrot.slane %v4221_v51, 7 }
 0x684   :  { %v3525_v58 = vpop.eup %3524 }
 0x685   :  { %v3527_v62 = vpop.eup %3526 }
 0x6e5   :  { %v618_v59 = vpop.permute.xlu0 %617 }
 0x6e6   :  { %v620_v63 = vpop.permute.xlu1 %619  ;;  %v623_v0 = vmul.f32 %v3525_v58, %v618_v59  ;;  %v746_v58 = vrot.slane %v4223_v52, 7 }
 0x6e7   :  { %v624_v1 = vmul.f32 %v3527_v62, %v620_v63 }
 0x6e8   :  { %v627_v3 = vrot.slane %v623_v0, 2  ;;  %v1421_v4 = vrot.slane %v623_v0, 6 }
 0x6e9   :  { %v628_v60 = vrot.slane %v624_v1, 1  ;;  %v1422_v61 = vrot.slane %v624_v1, 5 }
 0x6eb   :  { %v1424_v10 = vsel %vm1423_vm6, %v1422_v61, %v1421_v4  ;;  %v629_v12 = vsel %vm315_vm2, %v628_v60, %v627_v3 }
 0x6ec   :  { %3345 = vmatmul.mubr.msk.f32.vlgmr.msra.gmra.mxu0 %vm165_vm3, %v629_v12  ;;  %v4236_v16 = vsel %vm1447_vm7, %v1446_v8, %v1424_v10 }
 0x6ed   :  { %965 = vmatpush1.msra.mxu0 %v3977_v9  ;;  %1012 = vmatprep.mubr.f32.mxu0 %v5896_v5 }
 0x6ee   :  { %966 = vmatprep.subr.mxu0 %v3986_v11 }
 0x6ef   :  { %967 = vmatpush1.msra.mxu0 %v3995_v13 }
 0x6f0   :  { %968 = vmatprep.subr.mxu0 %v4001_v14 }
 0x6f1   :  { %969 = vmatpush1.msra.mxu0 %v4011_v15 }
 0x6f2   :  { %970 = vmatprep.subr.mxu0 %v4021_v17 }
 0x6f3   :  { %971 = vmatpush1.msra.mxu0 %v4030_v18 }
 0x6f4   :  { %972 = vmatprep.subr.mxu0 %v4037_v19 }
 0x6f5   :  { %973 = vmatpush1.msra.mxu0 %v4044_v20 }
 0x6f6   :  { %974 = vmatprep.subr.mxu0 %v4051_v21 }
 0x6f7   :  { %975 = vmatpush1.msra.mxu0 %v4058_v22 }
 0x6f8   :  { %976 = vmatprep.subr.mxu0 %v4065_v23 }
 0x6f9   :  { %977 = vmatpush1.msra.mxu0 %v4072_v24 }
 0x6fa   :  { %978 = vmatprep.subr.mxu0 %v4079_v25 }
 0x6fb   :  { %979 = vmatpush1.msra.mxu0 %v4086_v26 }
 0x6fc   :  { %1280 = vmatprep.subr.mxu0 %v3968_v7 }
 0x7ac   :  { %v698_v40 = vpop.f32.mrf.mxu0 }
 0x7ad   :  { %v705_v6 = vrot.slane %v698_v40, 5  ;;  %v707_v36 = vrot.slane %v698_v40, 6 }
 0x7ae   :  { %v700_v47 = vpop.f32.mrf.mxu0 }
 0x7af   :  { %v706_v28 = vrot.slane %v700_v47, 5  ;;  %v708_v29 = vrot.slane %v700_v47, 6  ;;  %v713_v7 = vadd.f32 %v705_v6, %v4136_v50  ;;  %v715_v37 = vadd.f32 %v707_v36, %v4133_v48 }
 0x7b1   :  { %v714_v33 = vadd.f32 %v706_v28, %v4125_v41  ;;  %v716_v34 = vadd.f32 %v708_v29, %v4122_v39  ;;  %v3346_v38 = vmul.f32 -1.442695, %v713_v7  ;;  %v3348_v43 = vmul.f32 -1.442695, %v715_v37 }
 0x7b3   :  { %3528 = vtanh.f32 %v714_v33  ;;  %v3347_v51 = vmul.f32 -1.442695, %v714_v33  ;;  %v3349_v52 = vmul.f32 -1.442695, %v716_v34 }
 0x7b4   :  { %3530 = vtanh.f32 %v716_v34 }
 0x7b5   :  { %3532 = vpow2.f32 %v3346_v38 }
 0x7b6   :  { %3534 = vpow2.f32 %v3348_v43 }
 0x7c0   :  { %v3529_v2 = vpop.eup %3528 }
 0x7c1   :  { %v3531_v35 = vpop.eup %3530  ;;  %753 = vrot.lane.b32.xlu0 %v3529_v2, %s3887_s24 }
 0x7c2   :  { %755 = vrot.lane.b32.xlu1 %v3531_v35, %s3887_s24  ;;  %v3533_v42 = vpop.eup %3532 }
 0x7c3   :  { %v3535_v44 = vpop.eup %3534  ;;  %v729_v46 = vadd.f32 1.0, %v3533_v42 }
 0x7c4   :  { %v731_v53 = vadd.f32 1.0, %v3535_v44 }
 0x7c5   :  { %3536 = vrcp.f32 %v729_v46 }
 0x7c6   :  { %3538 = vrcp.f32 %v731_v53 }
 0x7d2   :  { %v3537_v54 = vpop.eup %3536 }
 0x7d3   :  { %v3539_v27 = vpop.eup %3538  ;;  %v749_v59 = vmul.f32 %v3537_v54, %v745_v57 }
 0x7d4   :  { %v750_v62 = vmul.f32 %v3539_v27, %v746_v58 }
 0x833   :  { %v754_v31 = vpop.permute.xlu0 %753 }
 0x834   :  { %v756_v55 = vpop.permute.xlu1 %755  ;;  %v759_v49 = vmul.f32 %v3537_v54, %v754_v31 }
 0x835   :  { %v760_v56 = vmul.f32 %v3539_v27, %v756_v55 }
 0x836   :  { %763 = vrot.lane.b32.xlu0 %v759_v49, %s3887_s24 }
 0x837   :  { %765 = vrot.lane.b32.xlu1 %v760_v56, %s3887_s24 }
 0x8a8   :  { %v764_v63 = vpop.permute.xlu0 %763 }
 0x8a9   :  { %v766_v0 = vpop.permute.xlu1 %765  ;;  %v4265_v1 = vadd.f32 %v764_v63, %v749_v59 }
 0x8aa   :  { %v4267_v3 = vadd.f32 %v766_v0, %v750_v62 }
 0x8ab   :  { %3540 = vtanh.f32 %v4265_v1 }
 0x8ac   :  { %3542 = vtanh.f32 %v4267_v3 }
 0x8ad   :  { %3544 = vpow2.f32 %v3347_v51 }
 0x8ae   :  { %3546 = vpow2.f32 %v3349_v52 }
 0x8b8   :  { %v3541_v4 = vpop.eup %3540 }
 0x8b9   :  { %v3543_v60 = vpop.eup %3542  ;;  %775 = vrot.lane.b32.xlu0 %v3541_v4, %s3887_s24 }
 0x8ba   :  { %777 = vrot.lane.b32.xlu1 %v3543_v60, %s3887_s24  ;;  %v3545_v61 = vpop.eup %3544 }
 0x8bb   :  { %v3547_v8 = vpop.eup %3546  ;;  %v730_v10 = vadd.f32 1.0, %v3545_v61  ;;  %v903_v61 = vrot.slane %v4265_v1, 7 }
 0x8bc   :  { %v732_v12 = vadd.f32 1.0, %v3547_v8  ;;  %v904_v8 = vrot.slane %v4267_v3, 7 }
 0x8bd   :  { %3548 = vrcp.f32 %v730_v10 }
 0x8be   :  { %3550 = vrcp.f32 %v732_v12 }
 0x8ca   :  { %v3549_v40 = vpop.eup %3548 }
 0x8cb   :  { %v3551_v28 = vpop.eup %3550 }
 0x92b   :  { %v776_v47 = vpop.permute.xlu0 %775 }
 0x92c   :  { %v778_v29 = vpop.permute.xlu1 %777  ;;  %v781_v2 = vmul.f32 %v3549_v40, %v776_v47 }
 0x92d   :  { %v782_v35 = vmul.f32 %v3551_v28, %v778_v29 }
 0x92e   :  { %v785_v6 = vrot.slane %v781_v2, 3  ;;  %v1426_v36 = vrot.slane %v781_v2, 5 }
 0x92f   :  { %v786_v7 = vrot.slane %v782_v35, 2  ;;  %v1427_v33 = vrot.slane %v782_v35, 4 }
 0x931   :  { %v1429_v34 = vsel %vm1428_vm8, %v1427_v33, %v1426_v36  ;;  %v787_v37 = vsel %vm315_vm2, %v786_v7, %v785_v6 }
 0x932   :  { %3350 = vmatmul.mubr.msk.f32.vlgmr.msra.gmra.mxu1 %vm165_vm3, %v787_v37  ;;  %v4278_v38 = vsel %vm1449_vm9, %v4236_v16, %v1429_v34 }
 0x933   :  { %1123 = vmatpush1.msra.mxu1 %v3977_v9  ;;  %1170 = vmatprep.mubr.f32.mxu1 %v5896_v5 }
 0x934   :  { %1124 = vmatprep.subr.mxu1 %v3986_v11 }
 0x935   :  { %1125 = vmatpush1.msra.mxu1 %v3995_v13 }
 0x936   :  { %1126 = vmatprep.subr.mxu1 %v4001_v14 }
 0x937   :  { %1127 = vmatpush1.msra.mxu1 %v4011_v15 }
 0x938   :  { %1128 = vmatprep.subr.mxu1 %v4021_v17 }
 0x939   :  { %1129 = vmatpush1.msra.mxu1 %v4030_v18 }
 0x93a   :  { %1130 = vmatprep.subr.mxu1 %v4037_v19 }
 0x93b   :  { %1131 = vmatpush1.msra.mxu1 %v4044_v20 }
 0x93c   :  { %1132 = vmatprep.subr.mxu1 %v4051_v21 }
 0x93d   :  { %1133 = vmatpush1.msra.mxu1 %v4058_v22 }
 0x93e   :  { %1134 = vmatprep.subr.mxu1 %v4065_v23 }
 0x93f   :  { %1135 = vmatpush1.msra.mxu1 %v4072_v24 }
 0x940   :  { %1136 = vmatprep.subr.mxu1 %v4079_v25 }
 0x941   :  { %1137 = vmatpush1.msra.mxu1 %v4086_v26 }
 0x9f2   :  { %v856_v9 = vpop.f32.mrf.mxu1 }
 0x9f3   :  { %v863_v54 = vrot.slane %v856_v9, 4  ;;  %v865_v31 = vrot.slane %v856_v9, 5 }
 0x9f4   :  { %v858_v11 = vpop.f32.mrf.mxu1 }
 0x9f5   :  { %v864_v16 = vrot.slane %v858_v11, 4  ;;  %v866_v43 = vrot.slane %v858_v11, 5  ;;  %v871_v27 = vadd.f32 %v863_v54, %v4136_v50  ;;  %v873_v55 = vadd.f32 %v865_v31, %v4133_v48 }
 0x9f7   :  { %v872_v42 = vadd.f32 %v864_v16, %v4125_v41  ;;  %v874_v44 = vadd.f32 %v866_v43, %v4122_v39  ;;  %v3351_v49 = vmul.f32 -1.442695, %v871_v27  ;;  %v3353_v56 = vmul.f32 -1.442695, %v873_v55 }
 0x9f9   :  { %3552 = vtanh.f32 %v872_v42  ;;  %v3352_v1 = vmul.f32 -1.442695, %v872_v42  ;;  %v3354_v3 = vmul.f32 -1.442695, %v874_v44  ;;  %v3776_v42 = vld [vmem:[%s5885_s2 + $0x70] sm:$0xff] }
 0x9fa   :  { %3554 = vtanh.f32 %v874_v44  ;;  %v3777_v44 = vld [vmem:[%s5885_s2 + $0x68] sm:$0xff] }
 0x9fb   :  { %3556 = vpow2.f32 %v3351_v49 }
 0x9fc   :  { %3558 = vpow2.f32 %v3353_v56 }
 0xa06   :  { %v3553_v46 = vpop.eup %3552 }
 0xa07   :  { %v3555_v53 = vpop.eup %3554  ;;  %911 = vrot.lane.b32.xlu0 %v3553_v46, %s3887_s24 }
 0xa08   :  { %913 = vrot.lane.b32.xlu1 %v3555_v53, %s3887_s24  ;;  %v3557_v57 = vpop.eup %3556 }
 0xa09   :  { %v3559_v58 = vpop.eup %3558  ;;  %v887_v59 = vadd.f32 1.0, %v3557_v57 }
 0xa0a   :  { %v889_v62 = vadd.f32 1.0, %v3559_v58 }
 0xa0b   :  { %3560 = vrcp.f32 %v887_v59 }
 0xa0c   :  { %3562 = vrcp.f32 %v889_v62 }
 0xa18   :  { %v3561_v63 = vpop.eup %3560 }
 0xa19   :  { %v3563_v4 = vpop.eup %3562  ;;  %v907_v10 = vmul.f32 %v3561_v63, %v903_v61 }
 0xa1a   :  { %v908_v12 = vmul.f32 %v3563_v4, %v904_v8 }
 0xa79   :  { %v912_v0 = vpop.permute.xlu0 %911 }
 0xa7a   :  { %v914_v60 = vpop.permute.xlu1 %913  ;;  %v917_v51 = vmul.f32 %v3561_v63, %v912_v0 }
 0xa7b   :  { %v918_v52 = vmul.f32 %v3563_v4, %v914_v60 }
 0xa7c   :  { %921 = vrot.lane.b32.xlu0 %v917_v51, %s3887_s24 }
 0xa7d   :  { %923 = vrot.lane.b32.xlu1 %v918_v52, %s3887_s24 }
 0xaee   :  { %v922_v40 = vpop.permute.xlu0 %921 }
 0xaef   :  { %v924_v47 = vpop.permute.xlu1 %923  ;;  %v4306_v28 = vadd.f32 %v922_v40, %v907_v10  ;;  %v1483_v40 = vld [vmem:[%s5887_s4 + $0xe8] sm:$0xff] }
 0xaf0   :  { %v4308_v29 = vadd.f32 %v924_v47, %v908_v12  ;;  %1530 = vmatprep.subr.mxu1 %v1483_v40 }
 0xaf1   :  { %3564 = vtanh.f32 %v4306_v28  ;;  %v1061_v4 = vrot.slane %v4306_v28, 7 }
 0xaf2   :  { %3566 = vtanh.f32 %v4308_v29  ;;  %v1062_v60 = vrot.slane %v4308_v29, 7 }
 0xaf3   :  { %3568 = vpow2.f32 %v3352_v1 }
 0xaf4   :  { %3570 = vpow2.f32 %v3354_v3 }
 0xafe   :  { %v3565_v2 = vpop.eup %3564 }
 0xaff   :  { %v3567_v35 = vpop.eup %3566  ;;  %933 = vrot.lane.b32.xlu0 %v3565_v2, %s3887_s24 }
 0xb00   :  { %935 = vrot.lane.b32.xlu1 %v3567_v35, %s3887_s24  ;;  %v3569_v6 = vpop.eup %3568 }
 0xb01   :  { %v3571_v36 = vpop.eup %3570  ;;  %v888_v7 = vadd.f32 1.0, %v3569_v6 }
 0xb02   :  { %v890_v33 = vadd.f32 1.0, %v3571_v36 }
 0xb03   :  { %3572 = vrcp.f32 %v888_v7 }
 0xb04   :  { %3574 = vrcp.f32 %v890_v33 }
 0xb10   :  { %v3573_v34 = vpop.eup %3572 }
 0xb11   :  { %v3575_v9 = vpop.eup %3574 }
 0xb71   :  { %v934_v37 = vpop.permute.xlu0 %933 }
 0xb72   :  { %v936_v11 = vpop.permute.xlu1 %935  ;;  %v939_v16 = vmul.f32 %v3573_v34, %v934_v37 }
 0xb73   :  { %v940_v43 = vmul.f32 %v3575_v9, %v936_v11 }
 0xb74   :  { %v943_v46 = vrot.slane %v939_v16, 4 }
 0xb75   :  { %v944_v53 = vrot.slane %v940_v43, 3 }
 0xb77   :  { %v4315_v54 = vsel %vm315_vm2, %v944_v53, %v943_v46  ;;  %v1482_v53 = vld [vmem:[%s5887_s4 + $0xe0] sm:$0xff] }
 0xb78   :  { %3355 = vmatmul.mubr.msk.f32.vlgmr.msra.gmra.mxu0 %vm165_vm3, %v4315_v54 }
 0xb79   :  { %1281 = vmatpush1.msra.mxu0 %v3776_v42  ;;  %1328 = vmatprep.mubr.f32.mxu0 %v5896_v5 }
 0xb7a   :  { %1282 = vmatprep.subr.mxu0 %v3777_v44 }
 0xb7b   :  { %1283 = vmatpush1.msra.mxu0 %v3995_v13 }
 0xb7c   :  { %1284 = vmatprep.subr.mxu0 %v4001_v14 }
 0xb7d   :  { %1285 = vmatpush1.msra.mxu0 %v4011_v15 }
 0xb7e   :  { %1286 = vmatprep.subr.mxu0 %v4021_v17 }
 0xb7f   :  { %1287 = vmatpush1.msra.mxu0 %v4030_v18 }
 0xb80   :  { %1288 = vmatprep.subr.mxu0 %v4037_v19 }
 0xb81   :  { %1289 = vmatpush1.msra.mxu0 %v4044_v20 }
 0xb82   :  { %1290 = vmatprep.subr.mxu0 %v4051_v21 }
 0xb83   :  { %1291 = vmatpush1.msra.mxu0 %v4058_v22 }
 0xb84   :  { %1292 = vmatprep.subr.mxu0 %v4065_v23 }
 0xb85   :  { %1293 = vmatpush1.msra.mxu0 %v4072_v24 }
 0xb86   :  { %1294 = vmatprep.subr.mxu0 %v4079_v25 }
 0xb87   :  { %1295 = vmatpush1.msra.mxu0 %v4086_v26 }
 0xc38   :  { %v1014_v13 = vpop.f32.mrf.mxu0 }
 0xc39   :  { %v1021_v22 = vrot.slane %v1014_v13, 3  ;;  %v1023_v23 = vrot.slane %v1014_v13, 4  ;;  %v1479_v13 = vld [vmem:[%s5887_s4 + $0xc8] sm:$0xff] }
 0xc3a   :  { %v1016_v14 = vpop.f32.mrf.mxu0 }
 0xc3b   :  { %v1022_v15 = vrot.slane %v1016_v14, 3  ;;  %v1024_v17 = vrot.slane %v1016_v14, 4  ;;  %v1029_v24 = vadd.f32 %v1021_v22, %v4136_v50  ;;  %v1031_v25 = vadd.f32 %v1023_v23, %v4133_v48  ;;  %v1478_v14 = vld [vmem:[%s5887_s4 + $0xc0] sm:$0xff]  ;;  %v1463_v22 = vld [vmem:[%s5887_s4 + $0x48] sm:$0xff] }
 0xc3c   :  { %v1462_v23 = vld [vmem:[%s5887_s4 + $0x40] sm:$0xff] }
 0xc3d   :  { %v1030_v18 = vadd.f32 %v1022_v15, %v4125_v41  ;;  %v1032_v19 = vadd.f32 %v1024_v17, %v4122_v39  ;;  %v3356_v26 = vmul.f32 -1.442695, %v1029_v24  ;;  %v3358_v31 = vmul.f32 -1.442695, %v1031_v25  ;;  %v1475_v15 = vld [vmem:[%s5887_s4 + $0xa8] sm:$0xff]  ;;  %v1474_v17 = vld [vmem:[%s5887_s4 + $0xa0] sm:$0xff] }
 0xc3e   :  { %v1459_v24 = vld [vmem:[%s5887_s4 + $0x28] sm:$0xff]  ;;  %v1458_v25 = vld [vmem:[%s5887_s4 + $0x20] sm:$0xff] }
 0xc3f   :  { %3576 = vtanh.f32 %v1030_v18  ;;  %v3357_v29 = vmul.f32 -1.442695, %v1030_v18  ;;  %v3359_v2 = vmul.f32 -1.442695, %v1032_v19  ;;  %v1471_v18 = vld [vmem:[%s5887_s4 + $0x88] sm:$0xff] }
 0xc40   :  { %3578 = vtanh.f32 %v1032_v19  ;;  %v1470_v19 = vld [vmem:[%s5887_s4 + $0x80] sm:$0xff] }
 0xc41   :  { %3580 = vpow2.f32 %v3356_v26  ;;  %v1455_v26 = vld [vmem:[%s5887_s4 + $0x8] sm:$0xff] }
 0xc42   :  { %3582 = vpow2.f32 %v3358_v31  ;;  %v1454_v31 = vld [vmem:[%s5887_s4] sm:$0xff] }
 0xc4c   :  { %v3577_v20 = vpop.eup %3576 }
 0xc4d   :  { %v3579_v21 = vpop.eup %3578  ;;  %1069 = vrot.lane.b32.xlu0 %v3577_v20, %s3887_s24  ;;  %v1467_v20 = vld [vmem:[%s5887_s4 + $0x68] sm:$0xff] }
 0xc4e   :  { %1071 = vrot.lane.b32.xlu1 %v3579_v21, %s3887_s24  ;;  %v3581_v27 = vpop.eup %3580  ;;  %v1466_v21 = vld [vmem:[%s5887_s4 + $0x60] sm:$0xff] }
 0xc4f   :  { %v3583_v55 = vpop.eup %3582  ;;  %v1045_v49 = vadd.f32 1.0, %v3581_v27 }
 0xc50   :  { %v1047_v56 = vadd.f32 1.0, %v3583_v55 }
 0xc51   :  { %3584 = vrcp.f32 %v1045_v49 }
 0xc52   :  { %3586 = vrcp.f32 %v1047_v56 }
 0xc5e   :  { %v3585_v57 = vpop.eup %3584 }
 0xc5f   :  { %v3587_v59 = vpop.eup %3586  ;;  %v1065_v51 = vmul.f32 %v3585_v57, %v1061_v4 }
 0xc60   :  { %v1066_v52 = vmul.f32 %v3587_v59, %v1062_v60 }
 0xcbf   :  { %v1070_v58 = vpop.permute.xlu0 %1069 }
 0xcc0   :  { %v1072_v62 = vpop.permute.xlu1 %1071  ;;  %v1075_v63 = vmul.f32 %v3585_v57, %v1070_v58 }
 0xcc1   :  { %v1076_v0 = vmul.f32 %v3587_v59, %v1072_v62 }
 0xcc2   :  { %1079 = vrot.lane.b32.xlu0 %v1075_v63, %s3887_s24 }
 0xcc3   :  { %1081 = vrot.lane.b32.xlu1 %v1076_v0, %s3887_s24 }
 0xd34   :  { %v1080_v61 = vpop.permute.xlu0 %1079 }
 0xd35   :  { %v1082_v8 = vpop.permute.xlu1 %1081  ;;  %v4349_v10 = vadd.f32 %v1080_v61, %v1065_v51 }
 0xd36   :  { %v4351_v12 = vadd.f32 %v1082_v8, %v1066_v52 }
 0xd37   :  { %3588 = vtanh.f32 %v4349_v10 }
 0xd38   :  { %3590 = vtanh.f32 %v4351_v12 }
 0xd39   :  { %3592 = vpow2.f32 %v3357_v29 }
 0xd3a   :  { %3594 = vpow2.f32 %v3359_v2 }
 0xd44   :  { %v3589_v47 = vpop.eup %3588 }
 0xd45   :  { %v3591_v28 = vpop.eup %3590  ;;  %1091 = vrot.lane.b32.xlu0 %v3589_v47, %s3887_s24 }
 0xd46   :  { %1093 = vrot.lane.b32.xlu1 %v3591_v28, %s3887_s24  ;;  %v3593_v35 = vpop.eup %3592 }
 0xd47   :  { %v3595_v1 = vpop.eup %3594  ;;  %v1046_v3 = vadd.f32 1.0, %v3593_v35 }
 0xd48   :  { %v1048_v6 = vadd.f32 1.0, %v3595_v1 }
 0xd49   :  { %3596 = vrcp.f32 %v1046_v3 }
 0xd4a   :  { %3598 = vrcp.f32 %v1048_v6  ;;  %v1219_v6 = vrot.slane %v4349_v10, 7 }
 0xd56   :  { %v3597_v36 = vpop.eup %3596 }
 0xd57   :  { %v3599_v33 = vpop.eup %3598 }
 0xdb7   :  { %v1092_v7 = vpop.permute.xlu0 %1091 }
 0xdb8   :  { %v1094_v34 = vpop.permute.xlu1 %1093  ;;  %v1097_v37 = vmul.f32 %v3597_v36, %v1092_v7  ;;  %v1220_v36 = vrot.slane %v4351_v12, 7 }
 0xdb9   :  { %v1098_v9 = vmul.f32 %v3599_v33, %v1094_v34 }
 0xdba   :  { %v1101_v11 = vrot.slane %v1097_v37, 5  ;;  %v1432_v16 = vrot.slane %v1097_v37, 3 }
 0xdbb   :  { %v1102_v43 = vrot.slane %v1098_v9, 4  ;;  %v1433_v46 = vrot.slane %v1098_v9, 2 }
 0xdbd   :  { %v4364_v42 = vsel %vm1418_vm4, %v1433_v46, %v1432_v16  ;;  %v1103_v44 = vsel %vm315_vm2, %v1102_v43, %v1101_v11  ;;  %v1485_v16 = vld [vmem:[%s5887_s4 + $0xf8] sm:$0xff] }
 0xdbe   :  { %3360 = vmatmul.mubr.msk.f32.vlgmr.msra.gmra.mxu1 %vm165_vm3, %v1103_v44  ;;  %1607 = vmatprep.subr.mxu0 %v1485_v16 }
 0xdbf   :  { %1531 = vmatpush1.msra.mxu1 %v1482_v53  ;;  %1578 = vmatprep.mubr.f32.mxu1 %v5896_v5 }
 0xdc0   :  { %1532 = vmatprep.subr.mxu1 %v1479_v13 }
 0xdc1   :  { %1533 = vmatpush1.msra.mxu1 %v1478_v14 }
 0xdc2   :  { %1534 = vmatprep.subr.mxu1 %v1475_v15 }
 0xdc3   :  { %1535 = vmatpush1.msra.mxu1 %v1474_v17 }
 0xdc4   :  { %1536 = vmatprep.subr.mxu1 %v1471_v18 }
 0xdc5   :  { %1537 = vmatpush1.msra.mxu1 %v1470_v19 }
 0xdc6   :  { %1538 = vmatprep.subr.mxu1 %v1467_v20 }
 0xdc7   :  { %1539 = vmatpush1.msra.mxu1 %v1466_v21 }
 0xdc8   :  { %1540 = vmatprep.subr.mxu1 %v1463_v22 }
 0xdc9   :  { %1541 = vmatpush1.msra.mxu1 %v1462_v23 }
 0xdca   :  { %1542 = vmatprep.subr.mxu1 %v1459_v24 }
 0xdcb   :  { %1543 = vmatpush1.msra.mxu1 %v1458_v25 }
 0xdcc   :  { %1544 = vmatprep.subr.mxu1 %v1455_v26  ;;  %v1484_v26 = vld [vmem:[%s5887_s4 + $0xf0] sm:$0xff] }
 0xdcd   :  { %1545 = vmatpush1.msra.mxu1 %v1454_v31 }
 0xdce   :  { %3370 = vmatmul.mubr.msk.f32.vlgmr.msra.gmra.mxu1 %vm165_vm3, %v4278_v38 }
 0xdcf   :  { %1584 = vmatprep.mubr.f32.mxu1 %v5896_v5 }
 0xe7e   :  { %v1172_v27 = vpop.f32.mrf.mxu1 }
 0xe7f   :  { %v1179_v63 = vrot.slane %v1172_v27, 2  ;;  %v1181_v0 = vrot.slane %v1172_v27, 3 }
 0xe80   :  { %v1174_v55 = vpop.f32.mrf.mxu1 }
 0xe81   :  { %v1180_v49 = vrot.slane %v1174_v55, 2  ;;  %v1182_v56 = vrot.slane %v1174_v55, 3  ;;  %v1187_v4 = vadd.f32 %v1179_v63, %v4136_v50  ;;  %v1189_v60 = vadd.f32 %v1181_v0, %v4133_v48  ;;  %v1481_v55 = vld [vmem:[%s5887_s4 + $0xd8] sm:$0xff]  ;;  %v1468_v63 = vld [vmem:[%s5887_s4 + $0x70] sm:$0xff] }
 0xe82   :  { %v1465_v0 = vld [vmem:[%s5887_s4 + $0x58] sm:$0xff] }
 0xe83   :  { %v1188_v57 = vadd.f32 %v1180_v49, %v4125_v41  ;;  %v1190_v58 = vadd.f32 %v1182_v56, %v4122_v39  ;;  %v3361_v51 = vmul.f32 -1.442695, %v1187_v4  ;;  %v3363_v52 = vmul.f32 -1.442695, %v1189_v60  ;;  %v1480_v56 = vld [vmem:[%s5887_s4 + $0xd0] sm:$0xff]  ;;  %v1461_v60 = vld [vmem:[%s5887_s4 + $0x38] sm:$0xff] }
 0xe84   :  { %v1451_v49 = vsel %vm1445_vm5, %v4315_v54, %v4364_v42  ;;  %v1476_v54 = vld [vmem:[%s5887_s4 + $0xb0] sm:$0xff]  ;;  %v1473_v42 = vld [vmem:[%s5887_s4 + $0x98] sm:$0xff] }
 0xe85   :  { %3600 = vtanh.f32 %v1188_v57  ;;  %v3362_v12 = vmul.f32 -1.442695, %v1188_v57  ;;  %v3364_v46 = vmul.f32 -1.442695, %v1190_v58  ;;  %v1464_v4 = vld [vmem:[%s5887_s4 + $0x50] sm:$0xff] }
 0xe86   :  { %3602 = vtanh.f32 %v1190_v58  ;;  %v1477_v58 = vld [vmem:[%s5887_s4 + $0xb8] sm:$0xff] }
 0xe87   :  { %3604 = vpow2.f32 %v3361_v51  ;;  %v1460_v51 = vld [vmem:[%s5887_s4 + $0x30] sm:$0xff] }
 0xe88   :  { %3606 = vpow2.f32 %v3363_v52  ;;  %v1457_v52 = vld [vmem:[%s5887_s4 + $0x18] sm:$0xff] }
 0xe92   :  { %v3601_v59 = vpop.eup %3600 }
 0xe93   :  { %v3603_v62 = vpop.eup %3602  ;;  %1227 = vrot.lane.b32.xlu0 %v3601_v59, %s3887_s24  ;;  %v1472_v59 = vld [vmem:[%s5887_s4 + $0x90] sm:$0xff] }
 0xe94   :  { %1229 = vrot.lane.b32.xlu1 %v3603_v62, %s3887_s24  ;;  %v3605_v61 = vpop.eup %3604  ;;  %v1469_v62 = vld [vmem:[%s5887_s4 + $0x78] sm:$0xff] }
 0xe95   :  { %v3607_v8 = vpop.eup %3606  ;;  %v1203_v40 = vadd.f32 1.0, %v3605_v61  ;;  %v1456_v61 = vld [vmem:[%s5887_s4 + $0x10] sm:$0xff] }
 0xe96   :  { %v1205_v47 = vadd.f32 1.0, %v3607_v8 }
 0xe97   :  { %3608 = vrcp.f32 %v1203_v40 }
 0xe98   :  { %3610 = vrcp.f32 %v1205_v47 }
 0xea4   :  { %v3609_v28 = vpop.eup %3608 }
 0xea5   :  { %v3611_v2 = vpop.eup %3610  ;;  %v1223_v7 = vmul.f32 %v3609_v28, %v1219_v6 }
 0xea6   :  { %v1224_v33 = vmul.f32 %v3611_v2, %v1220_v36 }
 0xf05   :  { %v1228_v29 = vpop.permute.xlu0 %1227 }
 0xf06   :  { %v1230_v35 = vpop.permute.xlu1 %1229  ;;  %v1233_v1 = vmul.f32 %v3609_v28, %v1228_v29 }
 0xf07   :  { %v1234_v3 = vmul.f32 %v3611_v2, %v1230_v35 }
 0xf08   :  { %1237 = vrot.lane.b32.xlu0 %v1233_v1, %s3887_s24 }
 0xf09   :  { %1239 = vrot.lane.b32.xlu1 %v1234_v3, %s3887_s24 }
 0xf7a   :  { %v1238_v34 = vpop.permute.xlu0 %1237 }
 0xf7b   :  { %v1240_v37 = vpop.permute.xlu1 %1239  ;;  %v4424_v9 = vadd.f32 %v1238_v34, %v1223_v7 }
 0xf7c   :  { %v4426_v11 = vadd.f32 %v1240_v37, %v1224_v33 }
 0xf7d   :  { %3612 = vtanh.f32 %v4424_v9 }
 0xf7e   :  { %3614 = vtanh.f32 %v4426_v11 }
 0xf7f   :  { %3616 = vpow2.f32 %v3362_v12 }
 0xf80   :  { %3618 = vpow2.f32 %v3364_v46  ;;  %v4516_v46 = vld [vmem:[%s5888_s5 + $0x1e8] sm:$0xff] }
 0xf81   :  { %6002 = vst [vmem:[#allocation9_spill] sm:$0xff] %v4516_v46  ;;  %1732 = vmatprep.subr.mxu1 %v4516_v46 }
 0xf8a   :  { %v3613_v10 = vpop.eup %3612 }
 0xf8b   :  { %v3615_v43 = vpop.eup %3614  ;;  %1249 = vrot.lane.b32.xlu0 %v3613_v10, %s3887_s24 }
 0xf8c   :  { %1251 = vrot.lane.b32.xlu1 %v3615_v43, %s3887_s24  ;;  %v3617_v53 = vpop.eup %3616 }
 0xf8d   :  { %v3619_v44 = vpop.eup %3618  ;;  %v1204_v13 = vadd.f32 1.0, %v3617_v53  ;;  %v4521_v53 = vld [vmem:[%s5888_s5 + $0x1f8] sm:$0xff] }
 0xf8e   :  { %v1206_v14 = vadd.f32 1.0, %v3619_v44  ;;  %6003 = vst [vmem:[#allocation10_spill] sm:$0xff] %v4521_v53  ;;  %v4526_v44 = vld [vmem:[%s5888_s5 + $0x1e0] sm:$0xff] }
 0xf8f   :  { %3620 = vrcp.f32 %v1204_v13  ;;  %v4533_v13 = vld [vmem:[%s5888_s5 + $0x1f0] sm:$0xff]  ;;  %1733 = vmatpush1.msra.mxu1 %v4526_v44 }
 0xf90   :  { %3622 = vrcp.f32 %v1206_v14  ;;  %v4538_v14 = vld [vmem:[%s5888_s5 + $0x1c8] sm:$0xff] }
 0xf91   :  { %1734 = vmatprep.subr.mxu1 %v4538_v14 }
 0xf9c   :  { %v3621_v15 = vpop.eup %3620 }
 0xf9d   :  { %v3623_v18 = vpop.eup %3622 }
 0xffd   :  { %v1250_v17 = vpop.permute.xlu0 %1249 }
 0xffe   :  { %v1252_v19 = vpop.permute.xlu1 %1251  ;;  %v1255_v20 = vmul.f32 %v3621_v15, %v1250_v17  ;;  %v4543_v15 = vld [vmem:[%s5888_s5 + $0x1d8] sm:$0xff]  ;;  %v4550_v17 = vld [vmem:[%s5888_s5 + $0x1c0] sm:$0xff] }
 0xfff   :  { %v1256_v21 = vmul.f32 %v3623_v18, %v1252_v19  ;;  %v4555_v18 = vld [vmem:[%s5888_s5 + $0x1d0] sm:$0xff]  ;;  %v4560_v19 = vld [vmem:[%s5888_s5 + $0x1a8] sm:$0xff]  ;;  %1735 = vmatpush1.msra.mxu1 %v4550_v17 }
0x1000   :  { %v1259_v22 = vrot.slane %v1255_v20, 6  ;;  %v1436_v23 = vrot.slane %v1255_v20, 2  ;;  %v4567_v20 = vld [vmem:[%s5888_s5 + $0x1b8] sm:$0xff]  ;;  %1736 = vmatprep.subr.mxu1 %v4560_v19 }
0x1001   :  { %v1260_v24 = vrot.slane %v1256_v21, 5  ;;  %v1437_v25 = vrot.slane %v1256_v21, 1  ;;  %v4572_v21 = vld [vmem:[%s5888_s5 + $0x1a0] sm:$0xff] }
0x1002   :  { %1737 = vmatpush1.msra.mxu1 %v4572_v21 }
0x1003   :  { %v1438_v31 = vsel %vm1423_vm6, %v1437_v25, %v1436_v23  ;;  %v1261_v27 = vsel %vm315_vm2, %v1260_v24, %v1259_v22  ;;  %v4577_v22 = vld [vmem:[%s5888_s5 + $0x1b0] sm:$0xff]  ;;  %v4584_v23 = vld [vmem:[%s5888_s5 + $0x188] sm:$0xff]  ;;  %v4589_v24 = vld [vmem:[%s5888_s5 + $0x198] sm:$0xff] }
0x1004   :  { %3365 = vmatmul.mubr.msk.f32.vlgmr.msra.gmra.mxu0 %vm165_vm3, %v1261_v27  ;;  %v4451_v57 = vsel %vm1447_vm7, %v1451_v49, %v1438_v31  ;;  %v4596_v25 = vld [vmem:[%s5888_s5 + $0x180] sm:$0xff]  ;;  %v4608_v31 = vld [vmem:[%s5888_s5 + $0x168] sm:$0xff]  ;;  %v4613_v27 = vld [vmem:[%s5888_s5 + $0x178] sm:$0xff]  ;;  %1738 = vmatprep.subr.mxu1 %v4584_v23 }
0x1005   :  { %1608 = vmatpush1.msra.mxu0 %v1484_v26  ;;  %1655 = vmatprep.mubr.f32.mxu0 %v5896_v5  ;;  %v4601_v26 = vld [vmem:[%s5888_s5 + $0x190] sm:$0xff] }
0x1006   :  { %1609 = vmatprep.subr.mxu0 %v1481_v55  ;;  %v4620_v55 = vld [vmem:[%s5888_s5 + $0x160] sm:$0xff]  ;;  %v4625_v49 = vld [vmem:[%s5888_s5 + $0x170] sm:$0xff]  ;;  %1739 = vmatpush1.msra.mxu1 %v4596_v25 }
0x1007   :  { %1610 = vmatpush1.msra.mxu0 %v1480_v56  ;;  %v4632_v56 = vld [vmem:[%s5888_s5 + $0x148] sm:$0xff]  ;;  %1740 = vmatprep.subr.mxu1 %v4608_v31 }
0x1008   :  { %1611 = vmatprep.subr.mxu0 %v1477_v58  ;;  %v4637_v58 = vld [vmem:[%s5888_s5 + $0x158] sm:$0xff]  ;;  %1741 = vmatpush1.msra.mxu1 %v4620_v55 }
0x1009   :  { %1612 = vmatpush1.msra.mxu0 %v1476_v54  ;;  %v4644_v54 = vld [vmem:[%s5888_s5 + $0x140] sm:$0xff]  ;;  %1742 = vmatprep.subr.mxu1 %v4632_v56 }
0x100a   :  { %1613 = vmatprep.subr.mxu0 %v1473_v42  ;;  %v4649_v42 = vld [vmem:[%s5888_s5 + $0x150] sm:$0xff]  ;;  %1743 = vmatpush1.msra.mxu1 %v4644_v54 }
0x100b   :  { %1614 = vmatpush1.msra.mxu0 %v1472_v59  ;;  %v4656_v59 = vld [vmem:[%s5888_s5 + $0x128] sm:$0xff] }
0x100c   :  { %1615 = vmatprep.subr.mxu0 %v1469_v62  ;;  %v4661_v62 = vld [vmem:[%s5888_s5 + $0x138] sm:$0xff]  ;;  %1744 = vmatprep.subr.mxu1 %v4656_v59 }
0x100d   :  { %1616 = vmatpush1.msra.mxu0 %v1468_v63  ;;  %v4668_v63 = vld [vmem:[%s5888_s5 + $0x120] sm:$0xff] }
0x100e   :  { %1617 = vmatprep.subr.mxu0 %v1465_v0  ;;  %v4673_v0 = vld [vmem:[%s5888_s5 + $0x130] sm:$0xff]  ;;  %1745 = vmatpush1.msra.mxu1 %v4668_v63 }
0x100f   :  { %1618 = vmatpush1.msra.mxu0 %v1464_v4  ;;  %v4680_v4 = vld [vmem:[%s5888_s5 + $0x108] sm:$0xff] }
0x1010   :  { %1619 = vmatprep.subr.mxu0 %v1461_v60  ;;  %v4685_v60 = vld [vmem:[%s5888_s5 + $0x118] sm:$0xff]  ;;  %1746 = vmatprep.subr.mxu1 %v4680_v4 }
0x1011   :  { %1620 = vmatpush1.msra.mxu0 %v1460_v51  ;;  %v4692_v51 = vld [vmem:[%s5888_s5 + $0x100] sm:$0xff] }
0x1012   :  { %1621 = vmatprep.subr.mxu0 %v1457_v52  ;;  %v4697_v52 = vld [vmem:[%s5888_s5 + $0x110] sm:$0xff]  ;;  %1747 = vmatpush1.msra.mxu1 %v4692_v51 }
0x1013   :  { %1622 = vmatpush1.msra.mxu0 %v1456_v61  ;;  %v4704_v61 = vld [vmem:[%s5888_s5 + $0xe8] sm:$0xff] }
0x1014   :  { %3372 = vmatmul.mubr.msk.f32.vlgmr.msra.gmra.mxu0 %vm165_vm3, %v4278_v38  ;;  %1803 = vmatprep.subr.mxu0 %v4521_v53 }
0x1015   :  { %1661 = vmatprep.mubr.f32.mxu0 %v5896_v5  ;;  %1804 = vmatpush1.msra.mxu0 %v4533_v13  ;;  %v4873_v5 = vld [vmem:[%s5888_s5 + $0x30] sm:$0xff] }
0x1016   :  { %1805 = vmatprep.subr.mxu0 %v4543_v15  ;;  %1748 = vmatprep.subr.mxu1 %v4704_v61  ;;  %6019 = vst [vmem:[#allocation26_spill] sm:$0xff] %v4873_v5 }
0x1017   :  { %1806 = vmatpush1.msra.mxu0 %v4555_v18 }
0x1018   :  { %1807 = vmatprep.subr.mxu0 %v4567_v20 }
0x1019   :  { %1808 = vmatpush1.msra.mxu0 %v4577_v22 }
0x101a   :  { %1809 = vmatprep.subr.mxu0 %v4589_v24 }
0x101b   :  { %1810 = vmatpush1.msra.mxu0 %v4601_v26 }
0x101c   :  { %1811 = vmatprep.subr.mxu0 %v4613_v27 }
0x101d   :  { %1812 = vmatpush1.msra.mxu0 %v4625_v49 }
0x101e   :  { %1813 = vmatprep.subr.mxu0 %v4637_v58 }
0x101f   :  { %1814 = vmatpush1.msra.mxu0 %v4649_v42 }
0x1020   :  { %1815 = vmatprep.subr.mxu0 %v4661_v62 }
0x1021   :  { %1816 = vmatpush1.msra.mxu0 %v4673_v0 }
0x1022   :  { %1817 = vmatprep.subr.mxu0 %v4685_v60 }
0x1023   :  { %1818 = vmatpush1.msra.mxu0 %v4697_v52 }
0x10c4   :  { %v1330_v8 = vpop.f32.mrf.mxu0 }
0x10c5   :  { %v1337_v38 = vrot.slane %v1330_v8, 1  ;;  %v1339_v3 = vrot.slane %v1330_v8, 2  ;;  %v4709_v8 = vld [vmem:[%s5888_s5 + $0xf8] sm:$0xff] }
0x10c6   :  { %v1332_v40 = vpop.f32.mrf.mxu0  ;;  %1819 = vmatprep.subr.mxu0 %v4709_v8 }
0x10c7   :  { %v1338_v47 = vrot.slane %v1332_v40, 1  ;;  %v1340_v28 = vrot.slane %v1332_v40, 2  ;;  %v1345_v6 = vadd.f32 %v1337_v38, %v4136_v50  ;;  %v4716_v40 = vld [vmem:[%s5888_s5 + $0xe0] sm:$0xff]  ;;  %v4745_v38 = vld [vmem:[%s5888_s5 + $0xd0] sm:$0xff] }
0x10c8   :  { %1749 = vmatpush1.msra.mxu1 %v4716_v40 }
0x10c9   :  { %v4494_v29 = vadd.f32 %v1338_v47, %v4125_v41  ;;  %v4497_v2 = vadd.f32 %v1340_v28, %v4122_v39  ;;  %v1347_v41 = vadd.f32 %v1339_v3, %v4133_v48  ;;  %v3366_v36 = vmul.f32 -1.442695, %v1345_v6  ;;  %v4721_v47 = vld [vmem:[%s5888_s5 + $0xf0] sm:$0xff]  ;;  %v4728_v28 = vld [vmem:[%s5888_s5 + $0xc8] sm:$0xff]  ;;  %v4757_v6 = vld [vmem:[%s5888_s5 + $0xb8] sm:$0xff] }
0x10ca   :  { %1820 = vmatpush1.msra.mxu0 %v4721_v47  ;;  %v4752_v3 = vld [vmem:[%s5888_s5 + $0xa8] sm:$0xff]  ;;  %1750 = vmatprep.subr.mxu1 %v4728_v28 }
0x10cb   :  { %3624 = vtanh.f32 %v4494_v29  ;;  %v3368_v7 = vmul.f32 -1.442695, %v1347_v41  ;;  %v4764_v41 = vld [vmem:[%s5888_s5 + $0xa0] sm:$0xff] }
0x10cc   :  { %3626 = vtanh.f32 %v4497_v2 }
0x10cd   :  { %3628 = vpow2.f32 %v3366_v36  ;;  %v4769_v36 = vld [vmem:[%s5888_s5 + $0xb0] sm:$0xff] }
0x10ce   :  { %3630 = vpow2.f32 %v3368_v7  ;;  %v1377_v7 = vrot.slane %v4424_v9, 7  ;;  %v4789_v9 = vld [vmem:[%s5888_s5 + $0x98] sm:$0xff] }
0x10cf   :  { %6005 = vst [vmem:[#allocation12_spill] sm:$0xff] %v4789_v9 }
0x10d8   :  { %v3625_v35 = vpop.eup %3624 }
0x10d9   :  { %v3627_v1 = vpop.eup %3626  ;;  %1385 = vrot.lane.b32.xlu0 %v3625_v35, %s3887_s24  ;;  %v4733_v35 = vld [vmem:[%s5888_s5 + $0xd8] sm:$0xff] }
0x10da   :  { %1387 = vrot.lane.b32.xlu1 %v3627_v1, %s3887_s24  ;;  %v3629_v39 = vpop.eup %3628  ;;  %v4740_v1 = vld [vmem:[%s5888_s5 + $0xc0] sm:$0xff]  ;;  %1821 = vmatprep.subr.mxu0 %v4733_v35 }
0x10db   :  { %v3631_v33 = vpop.eup %3630  ;;  %v1361_v34 = vadd.f32 1.0, %v3629_v39  ;;  %1751 = vmatpush1.msra.mxu1 %v4740_v1  ;;  %1822 = vmatpush1.msra.mxu0 %v4745_v38  ;;  %v1378_v39 = vrot.slane %v4426_v11, 7  ;;  %v4796_v11 = vld [vmem:[%s5888_s5 + $0x80] sm:$0xff] }
0x10dc   :  { %v1363_v37 = vadd.f32 1.0, %v3631_v33  ;;  %1752 = vmatprep.subr.mxu1 %v4752_v3  ;;  %1823 = vmatprep.subr.mxu0 %v4757_v6  ;;  %6006 = vst [vmem:[#allocation13_spill] sm:$0xff] %v4796_v11 }
0x10dd   :  { %3632 = vrcp.f32 %v1361_v34  ;;  %1753 = vmatpush1.msra.mxu1 %v4764_v41  ;;  %1824 = vmatpush1.msra.mxu0 %v4769_v36 }
0x10de   :  { %3634 = vrcp.f32 %v1363_v37  ;;  %1825 = vmatprep.subr.mxu0 %v4789_v9 }
0x10ea   :  { %v4505_v16 = vpop.eup %3632 }
0x10eb   :  { %v4507_v43 = vpop.eup %3634  ;;  %v1381_v33 = vmul.f32 %v4505_v16, %v1377_v7  ;;  %v4813_v7 = vld [vmem:[%s5888_s5 + $0x78] sm:$0xff] }
0x10ec   :  { %v1382_v34 = vmul.f32 %v4507_v43, %v1378_v39  ;;  %6009 = vst [vmem:[#allocation16_spill] sm:$0xff] %v4813_v7  ;;  %v4820_v39 = vld [vmem:[%s5888_s5 + $0x60] sm:$0xff] }
0x10ed   :  { %6010 = vst [vmem:[#allocation17_spill] sm:$0xff] %v4820_v39 }
0x114b   :  { %v1386_v10 = vpop.permute.xlu0 %1385 }
0x114c   :  { %v1388_v12 = vpop.permute.xlu1 %1387  ;;  %v1391_v50 = vmul.f32 %v4505_v16, %v1386_v10  ;;  %v4801_v16 = vld [vmem:[%s5888_s5 + $0x90] sm:$0xff] }
0x114d   :  { %v1392_v48 = vmul.f32 %v4507_v43, %v1388_v12  ;;  %6007 = vst [vmem:[#allocation14_spill] sm:$0xff] %v4801_v16  ;;  %1826 = vmatpush1.msra.mxu0 %v4801_v16  ;;  %v4808_v43 = vld [vmem:[%s5888_s5 + $0x68] sm:$0xff] }
0x114e   :  { %1395 = vrot.lane.b32.xlu0 %v1391_v50, %s3887_s24  ;;  %6008 = vst [vmem:[#allocation15_spill] sm:$0xff] %v4808_v43  ;;  %1827 = vmatprep.subr.mxu0 %v4813_v7 }
0x114f   :  { %1397 = vrot.lane.b32.xlu1 %v1392_v48, %s3887_s24  ;;  %v4784_v48 = vld [vmem:[%s5888_s5 + $0x88] sm:$0xff] }
0x1150   :  { %6004 = vst [vmem:[#allocation11_spill] sm:$0xff] %v4784_v48  ;;  %1754 = vmatprep.subr.mxu1 %v4784_v48 }
0x1151   :  { %1755 = vmatpush1.msra.mxu1 %v4796_v11 }
0x1152   :  { %1756 = vmatprep.subr.mxu1 %v4808_v43 }
0x1153   :  { %1757 = vmatpush1.msra.mxu1 %v4820_v39 }
0x11c0   :  { %v1396_v37 = vpop.permute.xlu0 %1395 }
0x11c1   :  { %v1398_v10 = vpop.permute.xlu1 %1397  ;;  %v1401_v12 = vadd.f32 %v1396_v37, %v1381_v33  ;;  %v4825_v33 = vld [vmem:[%s5888_s5 + $0x70] sm:$0xff]  ;;  %v4837_v37 = vld [vmem:[%s5888_s5 + $0x58] sm:$0xff] }
0x11c2   :  { %v1402_v50 = vadd.f32 %v1398_v10, %v1382_v34  ;;  %6011 = vst [vmem:[#allocation18_spill] sm:$0xff] %v4825_v33  ;;  %1828 = vmatpush1.msra.mxu0 %v4825_v33  ;;  %v4832_v34 = vld [vmem:[%s5888_s5 + $0x48] sm:$0xff]  ;;  %6013 = vst [vmem:[#allocation20_spill] sm:$0xff] %v4837_v37  ;;  %v4842_v10 = vld [vmem:[%s5888_s5 + $0x40] sm:$0xff] }
0x11c3   :  { %3636 = vtanh.f32 %v1401_v12  ;;  %6012 = vst [vmem:[#allocation19_spill] sm:$0xff] %v4832_v34  ;;  %6014 = vst [vmem:[#allocation21_spill] sm:$0xff] %v4842_v10  ;;  %1758 = vmatprep.subr.mxu1 %v4832_v34  ;;  %1829 = vmatprep.subr.mxu0 %v4837_v37  ;;  %v4849_v12 = vld [vmem:[%s5888_s5 + $0x50] sm:$0xff] }
0x11c4   :  { %3638 = vtanh.f32 %v1402_v50  ;;  %6015 = vst [vmem:[#allocation22_spill] sm:$0xff] %v4849_v12  ;;  %1759 = vmatpush1.msra.mxu1 %v4842_v10  ;;  %1830 = vmatpush1.msra.mxu0 %v4849_v12  ;;  %v4856_v50 = vld [vmem:[%s5888_s5 + $0x28] sm:$0xff]  ;;  %v4883_v12 = vld [vmem:[%s5888_s5 + $0x18] sm:$0xff]  ;;  %v3367_v10 = vmul.f32 -1.442695, %v4494_v29 }
0x11c5   :  { %6016 = vst [vmem:[#allocation23_spill] sm:$0xff] %v4856_v50  ;;  %1760 = vmatprep.subr.mxu1 %v4856_v50  ;;  %1831 = vmatprep.subr.mxu0 %v4861_v32  ;;  %6021 = vst [vmem:[#allocation28_spill] sm:$0xff] %v4883_v12  ;;  %v4890_v32 = vld [vmem:[%s5888_s5] sm:$0xff]  ;;  %v4895_v50 = vld [vmem:[%s5888_s5 + $0x10] sm:$0xff] }
0x11c6   :  { %1761 = vmatpush1.msra.mxu1 %v4866_v45  ;;  %1832 = vmatpush1.msra.mxu0 %v4873_v5  ;;  %6022 = vst [vmem:[#allocation29_spill] sm:$0xff] %v4890_v32  ;;  %6023 = vst [vmem:[#allocation30_spill] sm:$0xff] %v4895_v50  ;;  %3640 = vpow2.f32 %v3367_v10  ;;  %v6035_v10 = vld [vmem:[#allocation26_spill] sm:$0xff] }
0x11c7   :  { %1762 = vmatprep.subr.mxu1 %v4878_v30  ;;  %1833 = vmatprep.subr.mxu0 %v4883_v12  ;;  %v3369_v30 = vmul.f32 -1.442695, %v4497_v2 }
0x11c8   :  { %1763 = vmatpush1.msra.mxu1 %v4890_v32  ;;  %1834 = vmatpush1.msra.mxu0 %v4895_v50 }
0x11c9   :  { %1902 = vmatprep.subr.mxu1 %v4516_v46  ;;  %1973 = vmatprep.subr.mxu0 %v4521_v53  ;;  %3642 = vpow2.f32 %v3369_v30  ;;  %v6024_v30 = vmov 0.0   ;;  %v6027_v2 = vld [vmem:[#allocation18_spill] sm:$0xff] }
0x11d0   :  { %v3637_v5 = vpop.eup %3636 }
0x11d1   :  { %v3639_v45 = vpop.eup %3638  ;;  %1407 = vrot.lane.b32.xlu0 %v3637_v5, %s3887_s24 }
0x11d2   :  { %1409 = vrot.lane.b32.xlu1 %v3639_v45, %s3887_s24 }
0x11d3   :  { %v3641_v12 = vpop.eup %3640 }
0x11d4   :  { %v1362_v37 = vadd.f32 1.0, %v3641_v12  ;;  %v6036_v12 = vld [vmem:[#allocation27_spill] sm:$0xff] }
0x11d6   :  { %v3643_v32 = vpop.eup %3642  ;;  %3644 = vrcp.f32 %v1362_v37  ;;  %v6034_v37 = vld [vmem:[#allocation25_spill] sm:$0xff] }
0x11d7   :  { %v1364_v50 = vadd.f32 1.0, %v3643_v32  ;;  %v6025_v32 = vld [vmem:[#allocation16_spill] sm:$0xff] }
0x11d9   :  { %3646 = vrcp.f32 %v1364_v50  ;;  %v6037_v50 = vld [vmem:[#allocation28_spill] sm:$0xff] }
0x11e3   :  { %v3645_v46 = vpop.eup %3644 }
0x11e6   :  { %v3647_v39 = vpop.eup %3646 }
0x1243   :  { %v1408_v53 = vpop.permute.xlu0 %1407 }
0x1244   :  { %v1410_v34 = vpop.permute.xlu1 %1409  ;;  %v1413_v33 = vmul.f32 %v3645_v46, %v1408_v53  ;;  %v6028_v46 = vld [vmem:[#allocation19_spill] sm:$0xff]  ;;  %v6029_v53 = vld [vmem:[#allocation20_spill] sm:$0xff] }
0x1245   :  { %v1414_v5 = vmul.f32 %v3647_v39, %v1410_v34  ;;  %v6031_v39 = vld [vmem:[#allocation22_spill] sm:$0xff]  ;;  %v6033_v34 = vld [vmem:[#allocation24_spill] sm:$0xff] }
0x1246   :  { %v1442_v7 = vrot.slane %v1413_v33, 1  ;;  %v6032_v33 = vld [vmem:[#allocation23_spill] sm:$0xff] }
0x1248   :  { %v1443_v45 = vsel %vm1428_vm8, %v1414_v5, %v1442_v7  ;;  %v6030_v7 = vld [vmem:[#allocation21_spill] sm:$0xff] }
0x1249   :  { %v1453_v29 = vsel %vm1449_vm9, %v4451_v57, %v1443_v45  ;;  %v6026_v57 = vld [vmem:[#allocation17_spill] sm:$0xff]  ;;  %v6039_v45 = vld [vmem:[#allocation30_spill] sm:$0xff] }
0x124a   :  { %3371 = vmatmul.mubr.msk.f32.gmra.mxu1 %vm165_vm3, %v1453_v29  ;;  %3373 = vmatmul.mubr.msk.f32.gmra.mxu0 %vm165_vm3, %v1453_v29  ;;  %v6038_v5 = vld [vmem:[#allocation29_spill] sm:$0xff] }
0x124b   :  { %1796 = vmatprep.mubr.f32.mxu1 %v6024_v30  ;;  %1867 = vmatprep.mubr.f32.mxu0 %v6024_v30  ;;  %v6040_v29 = vld [vmem:[#allocation9_spill] sm:$0xff] }
0x124e   :  { %1797 = vmatmul.mubr.f32.vlgmr.msra.gmra.mxu1 %v6024_v30  ;;  %1868 = vmatmul.mubr.f32.vlgmr.msra.gmra.mxu0 %v6024_v30 }
0x124f   :  { %1903 = vmatpush1.msra.mxu1 %v4526_v44  ;;  %1974 = vmatpush1.msra.mxu0 %v4533_v13 }
0x1250   :  { %1904 = vmatprep.subr.mxu1 %v4538_v14  ;;  %1975 = vmatprep.subr.mxu0 %v4543_v15 }
0x1251   :  { %1905 = vmatpush1.msra.mxu1 %v4550_v17  ;;  %1976 = vmatpush1.msra.mxu0 %v4555_v18 }
0x1252   :  { %1906 = vmatprep.subr.mxu1 %v4560_v19  ;;  %1977 = vmatprep.subr.mxu0 %v4567_v20 }
0x1253   :  { %1907 = vmatpush1.msra.mxu1 %v4572_v21  ;;  %1978 = vmatpush1.msra.mxu0 %v4577_v22 }
0x1254   :  { %1908 = vmatprep.subr.mxu1 %v4584_v23  ;;  %1979 = vmatprep.subr.mxu0 %v4589_v24 }
0x1255   :  { %1909 = vmatpush1.msra.mxu1 %v4596_v25  ;;  %1980 = vmatpush1.msra.mxu0 %v4601_v26 }
0x1256   :  { %1910 = vmatprep.subr.mxu1 %v4608_v31  ;;  %1981 = vmatprep.subr.mxu0 %v4613_v27 }
0x1257   :  { %1911 = vmatpush1.msra.mxu1 %v4620_v55  ;;  %1982 = vmatpush1.msra.mxu0 %v4625_v49 }
0x1258   :  { %1912 = vmatprep.subr.mxu1 %v4632_v56  ;;  %1983 = vmatprep.subr.mxu0 %v4637_v58 }
0x1259   :  { %1913 = vmatpush1.msra.mxu1 %v4644_v54  ;;  %1984 = vmatpush1.msra.mxu0 %v4649_v42 }
0x125a   :  { %1914 = vmatprep.subr.mxu1 %v4656_v59  ;;  %1985 = vmatprep.subr.mxu0 %v4661_v62 }
0x125b   :  { %1915 = vmatpush1.msra.mxu1 %v4668_v63  ;;  %1986 = vmatpush1.msra.mxu0 %v4673_v0 }
0x125c   :  { %1916 = vmatprep.subr.mxu1 %v4680_v4  ;;  %1987 = vmatprep.subr.mxu0 %v4685_v60 }
0x125d   :  { %1917 = vmatpush1.msra.mxu1 %v4692_v51  ;;  %1988 = vmatpush1.msra.mxu0 %v4697_v52 }
0x125e   :  { %1918 = vmatprep.subr.mxu1 %v4704_v61  ;;  %1989 = vmatprep.subr.mxu0 %v4709_v8 }
0x125f   :  { %1919 = vmatpush1.msra.mxu1 %v4716_v40  ;;  %1990 = vmatpush1.msra.mxu0 %v4721_v47 }
0x1260   :  { %1920 = vmatprep.subr.mxu1 %v4728_v28  ;;  %1991 = vmatprep.subr.mxu0 %v4733_v35 }
0x1261   :  { %1921 = vmatpush1.msra.mxu1 %v4740_v1  ;;  %1992 = vmatpush1.msra.mxu0 %v4745_v38 }
0x1262   :  { %1922 = vmatprep.subr.mxu1 %v4752_v3  ;;  %1993 = vmatprep.subr.mxu0 %v4757_v6 }
0x1263   :  { %1923 = vmatpush1.msra.mxu1 %v4764_v41  ;;  %1994 = vmatpush1.msra.mxu0 %v4769_v36 }
0x1264   :  { %1924 = vmatprep.subr.mxu1 %v4784_v48  ;;  %1995 = vmatprep.subr.mxu0 %v4789_v9 }
0x1265   :  { %1925 = vmatpush1.msra.mxu1 %v4796_v11  ;;  %1996 = vmatpush1.msra.mxu0 %v4801_v16 }
0x1266   :  { %1926 = vmatprep.subr.mxu1 %v4808_v43  ;;  %1997 = vmatprep.subr.mxu0 %v6025_v32 }
0x1267   :  { %1927 = vmatpush1.msra.mxu1 %v6026_v57  ;;  %1998 = vmatpush1.msra.mxu0 %v6027_v2 }
0x1268   :  { %1928 = vmatprep.subr.mxu1 %v6028_v46  ;;  %1999 = vmatprep.subr.mxu0 %v6029_v53 }
0x1269   :  { %1929 = vmatpush1.msra.mxu1 %v6030_v7  ;;  %2000 = vmatpush1.msra.mxu0 %v6031_v39 }
0x126a   :  { %1930 = vmatprep.subr.mxu1 %v6032_v33  ;;  %2001 = vmatprep.subr.mxu0 %v6033_v34  ;;  %v6041_v33 = vld [vmem:[#allocation10_spill] sm:$0xff]  ;;  %v1580_v34 = vpop.f32.mrf.mxu1 }
0x126b   :  { %1931 = vmatpush1.msra.mxu1 %v6034_v37  ;;  %2002 = vmatpush1.msra.mxu0 %v6035_v10  ;;  %v1486_v10 = vld [vmem:[%s5889_s6] sm:$0xf]  ;;  %v6042_v37 = vld [vmem:[#allocation8_spill] sm:$0xff] }
0x126c   :  { %1932 = vmatprep.subr.mxu1 %v6036_v12  ;;  %2003 = vmatprep.subr.mxu0 %v6037_v50  ;;  %v1582_v12 = vpop.f32.mrf.mxu1  ;;  %v6043_v50 = vsub.s32 0, %v6042_v37 }
0x126d   :  { %1933 = vmatpush1.msra.mxu1 %v6038_v5  ;;  %1966 = vmatprep.mubr.f32.mxu1 %v6024_v30  ;;  %v1657_v5 = vpop.f32.mrf.mxu0 }
0x126e   :  { %2004 = vmatpush1.msra.mxu0 %v6039_v45  ;;  %2037 = vmatprep.mubr.f32.mxu0 %v6024_v30  ;;  %v4987_v39 = vrot.slane %v1486_v10, %v6043_v50  ;;  %v6046_v45 = vsub.s32 1, %v6042_v37 }
0x126f   :  { %2090 = vmatprep.subr.mxu1 %v6040_v29  ;;  %2161 = vmatprep.subr.mxu0 %v6041_v33  ;;  %v1659_v53 = vpop.f32.mrf.mxu0 }
0x1270   :  { %6044 = vst [vmem:[#allocation8_spill] sm:$0xff] %v4987_v39  ;;  %v4993_v30 = vrot.slane %v1486_v10, %v6046_v45  ;;  %v4998_v33 = vadd.f32 %v1580_v34, %v4987_v39 }
0x1272   :  { %6047 = vst [vmem:[#allocation32_spill] sm:$0xff] %v4993_v30  ;;  %v5001_v2 = vadd.f32 %v1582_v12, %v4993_v30  ;;  %v1502_v12 = vsub.s32 3, %v6042_v37 }
0x1274   :  { %6049 = vst [vmem:[#allocation34_spill] sm:$0xff] %v5001_v2 }
0x130a   :  { %v4989_v7 = vpop.f32.mrf.mxu1  ;;  %v5003_v57 = vpop.f32.mrf.mxu0 }
0x130b   :  { %6045 = vst [vmem:[#allocation31_spill] sm:$0xff] %v4989_v7  ;;  %6050 = vst [vmem:[#allocation35_spill] sm:$0xff] %v5003_v57  ;;  %v1498_v7 = vsub.s32 2, %v6042_v37 }
0x130c   :  { %v4995_v29 = vpop.f32.mrf.mxu1  ;;  %v5008_v16 = vpop.f32.mrf.mxu0 }
0x130d   :  { %6048 = vst [vmem:[#allocation33_spill] sm:$0xff] %v4995_v29  ;;  %6051 = vst [vmem:[#allocation36_spill] sm:$0xff] %v5008_v16  ;;  %v5010_v29 = vrot.slane %v1486_v10, %v1498_v7 }
0x130e   :  { %v1798_v46 = vpop.f32.mrf.mxu1  ;;  %v1869_v30 = vpop.f32.mrf.mxu0 }
0x130f   :  { %v1874_v50 = vadd.f32 %v1798_v46, %v4998_v33  ;;  %6052 = vst [vmem:[#allocation37_spill] sm:$0xff] %v5010_v29  ;;  %v5014_v57 = vadd.f32 %v1657_v5, %v5010_v29  ;;  %v5016_v46 = vrot.slane %v1486_v10, %v1502_v12 }
0x1310   :  { %v1800_v32 = vpop.f32.mrf.mxu1 }
0x1311   :  { %v3374_v43 = vmul.f32 -1.442695, %v1874_v50  ;;  %v1875_v45 = vadd.f32 %v1800_v32, %v5001_v2  ;;  %6053 = vst [vmem:[#allocation38_spill] sm:$0xff] %v5014_v57  ;;  %6054 = vst [vmem:[#allocation39_spill] sm:$0xff] %v5016_v46  ;;  %v1876_v39 = vadd.f32 %v1869_v30, %v5014_v57  ;;  %v1871_v50 = vpop.f32.mrf.mxu0  ;;  %v5020_v32 = vadd.f32 %v1659_v53, %v5016_v46  ;;  %v6070_v46 = vld [vmem:[#allocation29_spill] sm:$0xff] }
0x1313   :  { %3648 = vpow2.f32 %v3374_v43  ;;  %v3375_v34 = vmul.f32 -1.442695, %v1875_v45  ;;  %v3376_v16 = vmul.f32 -1.442695, %v1876_v39  ;;  %v1877_v7 = vadd.f32 %v1871_v50, %v5020_v32 }
0x1315   :  { %3650 = vpow2.f32 %v3375_v34 }
0x1316   :  { %3652 = vpow2.f32 %v3376_v16  ;;  %v6055_v16 = vld [vmem:[#allocation14_spill] sm:$0xff] }
0x1320   :  { %v3649_v43 = vpop.eup %3648 }
0x1321   :  { %v1887_v45 = vadd.f32 1.0, %v3649_v43 }
0x1322   :  { %v3651_v34 = vpop.eup %3650 }
0x1323   :  { %3654 = vrcp.f32 %v1887_v45  ;;  %v1888_v37 = vadd.f32 1.0, %v3651_v34  ;;  %v3653_v5 = vpop.eup %3652  ;;  %v6060_v45 = vld [vmem:[#allocation19_spill] sm:$0xff]  ;;  %v6061_v34 = vld [vmem:[#allocation20_spill] sm:$0xff] }
0x1324   :  { %3656 = vtanh.f32 %v1877_v7  ;;  %v1889_v30 = vadd.f32 1.0, %v3653_v5  ;;  %v6059_v7 = vld [vmem:[#allocation18_spill] sm:$0xff] }
0x1325   :  { %3658 = vrcp.f32 %v1888_v37  ;;  %v6062_v37 = vld [vmem:[#allocation21_spill] sm:$0xff]  ;;  %v6063_v5 = vld [vmem:[#allocation22_spill] sm:$0xff] }
0x1326   :  { %3660 = vrcp.f32 %v1889_v30  ;;  %v6066_v30 = vld [vmem:[#allocation25_spill] sm:$0xff] }
0x1330   :  { %v3655_v10 = vpop.eup %3654 }
0x1331   :  { %v3657_v12 = vpop.eup %3656 }
0x1332   :  { %v3659_v29 = vpop.eup %3658  ;;  %v1898_v2 = vmul.f32 %v3657_v12, %v3655_v10  ;;  %v6064_v10 = vld [vmem:[#allocation23_spill] sm:$0xff]  ;;  %v6065_v12 = vld [vmem:[#allocation24_spill] sm:$0xff] }
0x1333   :  { %v1897_v57 = vmul.f32 0.0, %v3659_v29  ;;  %v3661_v39 = vpop.eup %3660  ;;  %v6058_v29 = vld [vmem:[#allocation17_spill] sm:$0xff] }
0x1335   :  { %v5023_v53 = vadd.f32 %v1898_v2, %v1897_v57  ;;  %v6056_v57 = vld [vmem:[#allocation15_spill] sm:$0xff]  ;;  %v6057_v2 = vld [vmem:[#allocation16_spill] sm:$0xff] }
0x1337   :  { %3662 = vtanh.f32 %v5023_v53 }
0x1344   :  { %v3663_v50 = vpop.eup %3662 }
0x1345   :  { %v1901_v43 = vmul.f32 %v3663_v50, %v3661_v39  ;;  %v6067_v39 = vld [vmem:[#allocation26_spill] sm:$0xff]  ;;  %v6068_v50 = vld [vmem:[#allocation27_spill] sm:$0xff] }
0x1347   :  { %1967 = vmatmul.mubr.f32.vlgmr.msra.gmra.mxu1 %v1901_v43  ;;  %2038 = vmatmul.mubr.f32.vlgmr.msra.gmra.mxu0 %v1901_v43  ;;  %v6069_v43 = vld [vmem:[#allocation28_spill] sm:$0xff] }
0x1348   :  { %2091 = vmatpush1.msra.mxu1 %v4526_v44  ;;  %2162 = vmatpush1.msra.mxu0 %v4533_v13 }
0x1349   :  { %2092 = vmatprep.subr.mxu1 %v4538_v14  ;;  %2163 = vmatprep.subr.mxu0 %v4543_v15 }
0x134a   :  { %2093 = vmatpush1.msra.mxu1 %v4550_v17  ;;  %2164 = vmatpush1.msra.mxu0 %v4555_v18 }
0x134b   :  { %2094 = vmatprep.subr.mxu1 %v4560_v19  ;;  %2165 = vmatprep.subr.mxu0 %v4567_v20 }
0x134c   :  { %2095 = vmatpush1.msra.mxu1 %v4572_v21  ;;  %2166 = vmatpush1.msra.mxu0 %v4577_v22 }
0x134d   :  { %2096 = vmatprep.subr.mxu1 %v4584_v23  ;;  %2167 = vmatprep.subr.mxu0 %v4589_v24 }
0x134e   :  { %2097 = vmatpush1.msra.mxu1 %v4596_v25  ;;  %2168 = vmatpush1.msra.mxu0 %v4601_v26 }
0x134f   :  { %2098 = vmatprep.subr.mxu1 %v4608_v31  ;;  %2169 = vmatprep.subr.mxu0 %v4613_v27 }
0x1350   :  { %2099 = vmatpush1.msra.mxu1 %v4620_v55  ;;  %2170 = vmatpush1.msra.mxu0 %v4625_v49 }
0x1351   :  { %2100 = vmatprep.subr.mxu1 %v4632_v56  ;;  %2171 = vmatprep.subr.mxu0 %v4637_v58 }
0x1352   :  { %2101 = vmatpush1.msra.mxu1 %v4644_v54  ;;  %2172 = vmatpush1.msra.mxu0 %v4649_v42 }
0x1353   :  { %2102 = vmatprep.subr.mxu1 %v4656_v59  ;;  %2173 = vmatprep.subr.mxu0 %v4661_v62 }
0x1354   :  { %2103 = vmatpush1.msra.mxu1 %v4668_v63  ;;  %2174 = vmatpush1.msra.mxu0 %v4673_v0 }
0x1355   :  { %2104 = vmatprep.subr.mxu1 %v4680_v4  ;;  %2175 = vmatprep.subr.mxu0 %v4685_v60 }
0x1356   :  { %2105 = vmatpush1.msra.mxu1 %v4692_v51  ;;  %2176 = vmatpush1.msra.mxu0 %v4697_v52 }
0x1357   :  { %2106 = vmatprep.subr.mxu1 %v4704_v61  ;;  %2177 = vmatprep.subr.mxu0 %v4709_v8 }
0x1358   :  { %2107 = vmatpush1.msra.mxu1 %v4716_v40  ;;  %2178 = vmatpush1.msra.mxu0 %v4721_v47 }
0x1359   :  { %2108 = vmatprep.subr.mxu1 %v4728_v28  ;;  %2179 = vmatprep.subr.mxu0 %v4733_v35 }
0x135a   :  { %2109 = vmatpush1.msra.mxu1 %v4740_v1  ;;  %2180 = vmatpush1.msra.mxu0 %v4745_v38 }
0x135b   :  { %2110 = vmatprep.subr.mxu1 %v4752_v3  ;;  %2181 = vmatprep.subr.mxu0 %v4757_v6 }
0x135c   :  { %2111 = vmatpush1.msra.mxu1 %v4764_v41  ;;  %2182 = vmatpush1.msra.mxu0 %v4769_v36 }
0x135d   :  { %2112 = vmatprep.subr.mxu1 %v4784_v48  ;;  %2183 = vmatprep.subr.mxu0 %v4789_v9 }
0x135e   :  { %2113 = vmatpush1.msra.mxu1 %v4796_v11  ;;  %2184 = vmatpush1.msra.mxu0 %v6055_v16 }
0x135f   :  { %2114 = vmatprep.subr.mxu1 %v6056_v57  ;;  %2185 = vmatprep.subr.mxu0 %v6057_v2 }
0x1360   :  { %2115 = vmatpush1.msra.mxu1 %v6058_v29  ;;  %2186 = vmatpush1.msra.mxu0 %v6059_v7 }
0x1361   :  { %2116 = vmatprep.subr.mxu1 %v6060_v45  ;;  %2187 = vmatprep.subr.mxu0 %v6061_v34  ;;  %v6071_v45 = vmov 0.0   ;;  %v6072_v34 = vld [vmem:[#allocation30_spill] sm:$0xff] }
0x1362   :  { %2117 = vmatpush1.msra.mxu1 %v6062_v37  ;;  %2188 = vmatpush1.msra.mxu0 %v6063_v5  ;;  %v6073_v5 = vld [vmem:[#allocation9_spill] sm:$0xff] }
0x1363   :  { %2118 = vmatprep.subr.mxu1 %v6064_v10  ;;  %2189 = vmatprep.subr.mxu0 %v6065_v12  ;;  %v6074_v10 = vld [vmem:[#allocation10_spill] sm:$0xff] }
0x1364   :  { %2119 = vmatpush1.msra.mxu1 %v6066_v30  ;;  %2190 = vmatpush1.msra.mxu0 %v6067_v39 }
0x1365   :  { %2120 = vmatprep.subr.mxu1 %v6068_v50  ;;  %2191 = vmatprep.subr.mxu0 %v6069_v43  ;;  %v6075_v43 = vld [vmem:[#allocation34_spill] sm:$0xff] }
0x1366   :  { %2121 = vmatpush1.msra.mxu1 %v6070_v46  ;;  %2154 = vmatprep.mubr.f32.mxu1 %v6071_v45 }
0x1367   :  { %2192 = vmatpush1.msra.mxu0 %v6072_v34  ;;  %2225 = vmatprep.mubr.f32.mxu0 %v6071_v45  ;;  %v6076_v45 = vld [vmem:[#allocation38_spill] sm:$0xff] }
0x1368   :  { %2278 = vmatprep.subr.mxu1 %v6073_v5  ;;  %2349 = vmatprep.subr.mxu0 %v6074_v10 }
0x1407   :  { %v1968_v12 = vpop.f32.mrf.mxu1  ;;  %v2039_v46 = vpop.f32.mrf.mxu0 }
0x1408   :  { %v2048_v30 = vrot.slane %v1968_v12, 6  ;;  %v2050_v34 = vrot.slane %v2039_v46, 6  ;;  %v2080_v46 = vrot.slane %v5023_v53, 6  ;;  %v6077_v53 = vld [vmem:[#allocation11_spill] sm:$0xff] }
0x1409   :  { %v1970_v37 = vpop.f32.mrf.mxu1  ;;  %v2041_v57 = vpop.f32.mrf.mxu0 }
0x140a   :  { %v2056_v39 = vadd.f32 %v2048_v30, %v4998_v33  ;;  %v2049_v50 = vrot.slane %v1970_v37, 6  ;;  %v2058_v16 = vadd.f32 %v2050_v34, %v6076_v45  ;;  %v2051_v5 = vrot.slane %v2041_v57, 6 }
0x140c   :  { %v3377_v7 = vmul.f32 -1.442695, %v2056_v39  ;;  %v2057_v29 = vadd.f32 %v2049_v50, %v6075_v43  ;;  %v3379_v11 = vmul.f32 -1.442695, %v2058_v16  ;;  %v2059_v12 = vadd.f32 %v2051_v5, %v5020_v32  ;;  %v6079_v50 = vld [vmem:[#allocation13_spill] sm:$0xff] }
0x140e   :  { %3664 = vpow2.f32 %v3377_v7  ;;  %v3378_v2 = vmul.f32 -1.442695, %v2057_v29 }
0x1410   :  { %3666 = vpow2.f32 %v3378_v2 }
0x1411   :  { %3668 = vpow2.f32 %v3379_v11 }
0x141b   :  { %v3665_v10 = vpop.eup %3664 }
0x141c   :  { %v2069_v9 = vadd.f32 1.0, %v3665_v10  ;;  %v6078_v10 = vld [vmem:[#allocation12_spill] sm:$0xff] }
0x141d   :  { %v3667_v48 = vpop.eup %3666 }
0x141e   :  { %3670 = vrcp.f32 %v2069_v9  ;;  %v2070_v37 = vadd.f32 1.0, %v3667_v48  ;;  %v3669_v7 = vpop.eup %3668 }
0x141f   :  { %3672 = vtanh.f32 %v2059_v12  ;;  %v2071_v39 = vadd.f32 1.0, %v3669_v7  ;;  %v6080_v12 = vld [vmem:[#allocation14_spill] sm:$0xff]  ;;  %v6082_v7 = vld [vmem:[#allocation16_spill] sm:$0xff] }
0x1420   :  { %3674 = vrcp.f32 %v2070_v37  ;;  %v6081_v37 = vld [vmem:[#allocation15_spill] sm:$0xff] }
0x1421   :  { %3676 = vrcp.f32 %v2071_v39  ;;  %v6087_v39 = vld [vmem:[#allocation21_spill] sm:$0xff] }
0x142b   :  { %v3671_v30 = vpop.eup %3670 }
0x142c   :  { %v3673_v29 = vpop.eup %3672 }
0x142d   :  { %v3675_v2 = vpop.eup %3674  ;;  %v2083_v57 = vmul.f32 %v3673_v29, %v3671_v30  ;;  %v6083_v30 = vld [vmem:[#allocation17_spill] sm:$0xff]  ;;  %v6084_v29 = vld [vmem:[#allocation18_spill] sm:$0xff] }
0x142e   :  { %v2082_v34 = vmul.f32 %v3675_v2, %v2080_v46  ;;  %v3677_v5 = vpop.eup %3676  ;;  %v6085_v46 = vld [vmem:[#allocation19_spill] sm:$0xff]  ;;  %v6086_v2 = vld [vmem:[#allocation20_spill] sm:$0xff] }
0x1430   :  { %v5097_v16 = vadd.f32 %v2083_v57, %v2082_v34  ;;  %v6088_v34 = vld [vmem:[#allocation22_spill] sm:$0xff]  ;;  %v6089_v57 = vld [vmem:[#allocation23_spill] sm:$0xff] }
0x1432   :  { %3678 = vtanh.f32 %v5097_v16 }
0x143f   :  { %v3679_v11 = vpop.eup %3678 }
0x1440   :  { %v2086_v9 = vmul.f32 %v3679_v11, %v3677_v5  ;;  %v6090_v5 = vld [vmem:[#allocation24_spill] sm:$0xff]  ;;  %v6091_v11 = vld [vmem:[#allocation25_spill] sm:$0xff] }
0x1442   :  { %v2088_v48 = vrot.slane %v2086_v9, 2  ;;  %v6092_v9 = vld [vmem:[#allocation26_spill] sm:$0xff] }
0x1444   :  { %2155 = vmatmul.mubr.f32.vlgmr.msra.gmra.mxu1 %v2088_v48  ;;  %2226 = vmatmul.mubr.f32.vlgmr.msra.gmra.mxu0 %v2088_v48  ;;  %v6093_v48 = vld [vmem:[#allocation27_spill] sm:$0xff] }
0x1445   :  { %2279 = vmatpush1.msra.mxu1 %v4526_v44  ;;  %2350 = vmatpush1.msra.mxu0 %v4533_v13 }
0x1446   :  { %2280 = vmatprep.subr.mxu1 %v4538_v14  ;;  %2351 = vmatprep.subr.mxu0 %v4543_v15 }
0x1447   :  { %2281 = vmatpush1.msra.mxu1 %v4550_v17  ;;  %2352 = vmatpush1.msra.mxu0 %v4555_v18 }
0x1448   :  { %2282 = vmatprep.subr.mxu1 %v4560_v19  ;;  %2353 = vmatprep.subr.mxu0 %v4567_v20 }
0x1449   :  { %2283 = vmatpush1.msra.mxu1 %v4572_v21  ;;  %2354 = vmatpush1.msra.mxu0 %v4577_v22 }
0x144a   :  { %2284 = vmatprep.subr.mxu1 %v4584_v23  ;;  %2355 = vmatprep.subr.mxu0 %v4589_v24 }
0x144b   :  { %2285 = vmatpush1.msra.mxu1 %v4596_v25  ;;  %2356 = vmatpush1.msra.mxu0 %v4601_v26 }
0x144c   :  { %2286 = vmatprep.subr.mxu1 %v4608_v31  ;;  %2357 = vmatprep.subr.mxu0 %v4613_v27 }
0x144d   :  { %2287 = vmatpush1.msra.mxu1 %v4620_v55  ;;  %2358 = vmatpush1.msra.mxu0 %v4625_v49 }
0x144e   :  { %2288 = vmatprep.subr.mxu1 %v4632_v56  ;;  %2359 = vmatprep.subr.mxu0 %v4637_v58 }
0x144f   :  { %2289 = vmatpush1.msra.mxu1 %v4644_v54  ;;  %2360 = vmatpush1.msra.mxu0 %v4649_v42 }
0x1450   :  { %2290 = vmatprep.subr.mxu1 %v4656_v59  ;;  %2361 = vmatprep.subr.mxu0 %v4661_v62 }
0x1451   :  { %2291 = vmatpush1.msra.mxu1 %v4668_v63  ;;  %2362 = vmatpush1.msra.mxu0 %v4673_v0 }
0x1452   :  { %2292 = vmatprep.subr.mxu1 %v4680_v4  ;;  %2363 = vmatprep.subr.mxu0 %v4685_v60 }
0x1453   :  { %2293 = vmatpush1.msra.mxu1 %v4692_v51  ;;  %2364 = vmatpush1.msra.mxu0 %v4697_v52 }
0x1454   :  { %2294 = vmatprep.subr.mxu1 %v4704_v61  ;;  %2365 = vmatprep.subr.mxu0 %v4709_v8 }
0x1455   :  { %2295 = vmatpush1.msra.mxu1 %v4716_v40  ;;  %2366 = vmatpush1.msra.mxu0 %v4721_v47 }
0x1456   :  { %2296 = vmatprep.subr.mxu1 %v4728_v28  ;;  %2367 = vmatprep.subr.mxu0 %v4733_v35 }
0x1457   :  { %2297 = vmatpush1.msra.mxu1 %v4740_v1  ;;  %2368 = vmatpush1.msra.mxu0 %v4745_v38 }
0x1458   :  { %2298 = vmatprep.subr.mxu1 %v4752_v3  ;;  %2369 = vmatprep.subr.mxu0 %v4757_v6 }
0x1459   :  { %2299 = vmatpush1.msra.mxu1 %v4764_v41  ;;  %2370 = vmatpush1.msra.mxu0 %v4769_v36 }
0x145a   :  { %2300 = vmatprep.subr.mxu1 %v6077_v53  ;;  %2371 = vmatprep.subr.mxu0 %v6078_v10 }
0x145b   :  { %2301 = vmatpush1.msra.mxu1 %v6079_v50  ;;  %2372 = vmatpush1.msra.mxu0 %v6080_v12 }
0x145c   :  { %2302 = vmatprep.subr.mxu1 %v6081_v37  ;;  %2373 = vmatprep.subr.mxu0 %v6082_v7 }
0x145d   :  { %2303 = vmatpush1.msra.mxu1 %v6083_v30  ;;  %2374 = vmatpush1.msra.mxu0 %v6084_v29  ;;  %v6094_v30 = vld [vmem:[#allocation28_spill] sm:$0xff]  ;;  %v6095_v29 = vld [vmem:[#allocation29_spill] sm:$0xff] }
0x145e   :  { %2304 = vmatprep.subr.mxu1 %v6085_v46  ;;  %2375 = vmatprep.subr.mxu0 %v6086_v2  ;;  %v6096_v46 = vmov 0.0   ;;  %v6097_v2 = vld [vmem:[#allocation30_spill] sm:$0xff] }
0x145f   :  { %2305 = vmatpush1.msra.mxu1 %v6087_v39  ;;  %2376 = vmatpush1.msra.mxu0 %v6088_v34  ;;  %v6098_v34 = vld [vmem:[#allocation9_spill] sm:$0xff] }
0x1460   :  { %2306 = vmatprep.subr.mxu1 %v6089_v57  ;;  %2377 = vmatprep.subr.mxu0 %v6090_v5  ;;  %v6099_v57 = vld [vmem:[#allocation10_spill] sm:$0xff] }
0x1461   :  { %2307 = vmatpush1.msra.mxu1 %v6091_v11  ;;  %2378 = vmatpush1.msra.mxu0 %v6092_v9 }
0x1462   :  { %2308 = vmatprep.subr.mxu1 %v6093_v48  ;;  %2379 = vmatprep.subr.mxu0 %v6094_v30 }
0x1463   :  { %2309 = vmatpush1.msra.mxu1 %v6095_v29  ;;  %2342 = vmatprep.mubr.f32.mxu1 %v6096_v46 }
0x1464   :  { %2380 = vmatpush1.msra.mxu0 %v6097_v2  ;;  %2413 = vmatprep.mubr.f32.mxu0 %v6096_v46 }
0x1465   :  { %2466 = vmatprep.subr.mxu1 %v6098_v34  ;;  %2537 = vmatprep.subr.mxu0 %v6099_v57 }
0x1504   :  { %v2156_v5 = vpop.f32.mrf.mxu1  ;;  %v2227_v29 = vpop.f32.mrf.mxu0 }
0x1505   :  { %v2236_v11 = vrot.slane %v2156_v5, 4  ;;  %v2238_v2 = vrot.slane %v2227_v29, 4 }
0x1506   :  { %v2158_v39 = vpop.f32.mrf.mxu1  ;;  %v2229_v12 = vpop.f32.mrf.mxu0 }
0x1507   :  { %v2244_v9 = vadd.f32 %v2236_v11, %v4998_v33  ;;  %v2237_v48 = vrot.slane %v2158_v39, 4  ;;  %v2246_v46 = vadd.f32 %v2238_v2, %v6076_v45  ;;  %v2239_v34 = vrot.slane %v2229_v12, 4 }
0x1509   :  { %v3380_v7 = vmul.f32 -1.442695, %v2244_v9  ;;  %v2245_v30 = vadd.f32 %v2237_v48, %v6075_v43  ;;  %v3382_v50 = vmul.f32 -1.442695, %v2246_v46  ;;  %v2247_v5 = vadd.f32 %v2239_v34, %v5020_v32 }
0x150b   :  { %3680 = vpow2.f32 %v3380_v7  ;;  %v3381_v37 = vmul.f32 -1.442695, %v2245_v30 }
0x150d   :  { %3682 = vpow2.f32 %v3381_v37  ;;  %v2268_v37 = vrot.slane %v5097_v16, 6 }
0x150e   :  { %3684 = vpow2.f32 %v3382_v50 }
0x1518   :  { %v3681_v57 = vpop.eup %3680 }
0x1519   :  { %v2257_v10 = vadd.f32 1.0, %v3681_v57 }
0x151a   :  { %v3683_v53 = vpop.eup %3682 }
0x151b   :  { %3686 = vrcp.f32 %v2257_v10  ;;  %v2258_v39 = vadd.f32 1.0, %v3683_v53  ;;  %v3685_v7 = vpop.eup %3684 }
0x151c   :  { %3688 = vtanh.f32 %v2247_v5  ;;  %v2259_v9 = vadd.f32 1.0, %v3685_v7 }
0x151d   :  { %3690 = vrcp.f32 %v2258_v39 }
0x151e   :  { %3692 = vrcp.f32 %v2259_v9  ;;  %v5267_v9 = vld [vmem:[%s5888_s5 + $0x1f0] sm:$0xff] }
0x1528   :  { %v3687_v11 = vpop.eup %3686 }
0x1529   :  { %v3689_v30 = vpop.eup %3688 }
0x152a   :  { %v3691_v29 = vpop.eup %3690  ;;  %v2271_v12 = vmul.f32 %v3689_v30, %v3687_v11 }
0x152b   :  { %v2270_v2 = vmul.f32 %v3691_v29, %v2268_v37  ;;  %v3693_v48 = vpop.eup %3692  ;;  %v5261_v29 = vld [vmem:[%s5888_s5 + $0x1e0] sm:$0xff] }
0x152d   :  { %v5171_v46 = vadd.f32 %v2271_v12, %v2270_v2  ;;  %v5273_v2 = vld [vmem:[%s5888_s5 + $0x1c8] sm:$0xff]  ;;  %v5279_v12 = vld [vmem:[%s5888_s5 + $0x1d8] sm:$0xff] }
0x152f   :  { %3694 = vtanh.f32 %v5171_v46  ;;  %v2456_v34 = vrot.slane %v5171_v46, 6  ;;  %v5285_v46 = vld [vmem:[%s5888_s5 + $0x1c0] sm:$0xff] }
0x153c   :  { %v3695_v50 = vpop.eup %3694 }
0x153d   :  { %v2274_v10 = vmul.f32 %v3695_v50, %v3693_v48  ;;  %v5291_v48 = vld [vmem:[%s5888_s5 + $0x1d0] sm:$0xff]  ;;  %v5297_v50 = vld [vmem:[%s5888_s5 + $0x1a8] sm:$0xff] }
0x153f   :  { %v2276_v53 = vrot.slane %v2274_v10, 4  ;;  %v5303_v10 = vld [vmem:[%s5888_s5 + $0x1b8] sm:$0xff] }
0x1541   :  { %2343 = vmatmul.mubr.f32.vlgmr.msra.gmra.mxu1 %v2276_v53  ;;  %2414 = vmatmul.mubr.f32.vlgmr.msra.gmra.mxu0 %v2276_v53  ;;  %v5309_v53 = vld [vmem:[%s5888_s5 + $0x1a0] sm:$0xff] }
0x1542   :  { %2467 = vmatpush1.msra.mxu1 %v4526_v44  ;;  %2538 = vmatpush1.msra.mxu0 %v4533_v13  ;;  %v6100_v44 = vld [vmem:[#allocation11_spill] sm:$0xff]  ;;  %v6101_v13 = vld [vmem:[#allocation12_spill] sm:$0xff] }
0x1543   :  { %2468 = vmatprep.subr.mxu1 %v4538_v14  ;;  %2539 = vmatprep.subr.mxu0 %v4543_v15  ;;  %v6102_v14 = vld [vmem:[#allocation13_spill] sm:$0xff]  ;;  %v6103_v15 = vld [vmem:[#allocation14_spill] sm:$0xff] }
0x1544   :  { %2469 = vmatpush1.msra.mxu1 %v4550_v17  ;;  %2540 = vmatpush1.msra.mxu0 %v4555_v18  ;;  %v6104_v17 = vld [vmem:[#allocation15_spill] sm:$0xff]  ;;  %v6105_v18 = vld [vmem:[#allocation16_spill] sm:$0xff] }
0x1545   :  { %2470 = vmatprep.subr.mxu1 %v4560_v19  ;;  %2541 = vmatprep.subr.mxu0 %v4567_v20  ;;  %v6106_v19 = vld [vmem:[#allocation17_spill] sm:$0xff]  ;;  %v6107_v20 = vld [vmem:[#allocation18_spill] sm:$0xff] }
0x1546   :  { %2471 = vmatpush1.msra.mxu1 %v4572_v21  ;;  %2542 = vmatpush1.msra.mxu0 %v4577_v22  ;;  %v6108_v21 = vld [vmem:[#allocation19_spill] sm:$0xff]  ;;  %v6109_v22 = vld [vmem:[#allocation20_spill] sm:$0xff] }
0x1547   :  { %2472 = vmatprep.subr.mxu1 %v4584_v23  ;;  %2543 = vmatprep.subr.mxu0 %v4589_v24  ;;  %v6110_v23 = vld [vmem:[#allocation21_spill] sm:$0xff]  ;;  %v6111_v24 = vld [vmem:[#allocation22_spill] sm:$0xff] }
0x1548   :  { %2473 = vmatpush1.msra.mxu1 %v4596_v25  ;;  %2544 = vmatpush1.msra.mxu0 %v4601_v26  ;;  %v6112_v25 = vld [vmem:[#allocation23_spill] sm:$0xff]  ;;  %v6113_v26 = vld [vmem:[#allocation24_spill] sm:$0xff] }
0x1549   :  { %2474 = vmatprep.subr.mxu1 %v4608_v31  ;;  %2545 = vmatprep.subr.mxu0 %v4613_v27  ;;  %v6114_v31 = vld [vmem:[#allocation25_spill] sm:$0xff]  ;;  %v6115_v27 = vld [vmem:[#allocation26_spill] sm:$0xff] }
0x154a   :  { %2475 = vmatpush1.msra.mxu1 %v4620_v55  ;;  %2546 = vmatpush1.msra.mxu0 %v4625_v49  ;;  %v6116_v55 = vld [vmem:[#allocation27_spill] sm:$0xff]  ;;  %v6117_v49 = vld [vmem:[#allocation28_spill] sm:$0xff] }
0x154b   :  { %2476 = vmatprep.subr.mxu1 %v4632_v56  ;;  %2547 = vmatprep.subr.mxu0 %v4637_v58  ;;  %v6118_v56 = vld [vmem:[#allocation29_spill] sm:$0xff]  ;;  %v6119_v58 = vmov 0.0  }
0x154c   :  { %2477 = vmatpush1.msra.mxu1 %v4644_v54  ;;  %2548 = vmatpush1.msra.mxu0 %v4649_v42  ;;  %v6120_v54 = vld [vmem:[#allocation30_spill] sm:$0xff]  ;;  %v5241_v42 = vld [vmem:[%s5888_s5 + $0x1e8] sm:$0xff] }
0x154d   :  { %2478 = vmatprep.subr.mxu1 %v4656_v59  ;;  %2549 = vmatprep.subr.mxu0 %v4661_v62  ;;  %6121 = vst [vmem:[#allocation34_spill] sm:$0xff] %v5241_v42  ;;  %v5247_v59 = vld [vmem:[%s5888_s5 + $0x1f8] sm:$0xff] }
0x154e   :  { %2479 = vmatpush1.msra.mxu1 %v4668_v63  ;;  %2550 = vmatpush1.msra.mxu0 %v4673_v0  ;;  %6122 = vst [vmem:[#allocation38_spill] sm:$0xff] %v5247_v59 }
0x154f   :  { %2480 = vmatprep.subr.mxu1 %v4680_v4  ;;  %2551 = vmatprep.subr.mxu0 %v4685_v60 }
0x1550   :  { %2481 = vmatpush1.msra.mxu1 %v4692_v51  ;;  %2552 = vmatpush1.msra.mxu0 %v4697_v52 }
0x1551   :  { %2482 = vmatprep.subr.mxu1 %v4704_v61  ;;  %2553 = vmatprep.subr.mxu0 %v4709_v8 }
0x1552   :  { %2483 = vmatpush1.msra.mxu1 %v4716_v40  ;;  %2554 = vmatpush1.msra.mxu0 %v4721_v47 }
0x1553   :  { %2484 = vmatprep.subr.mxu1 %v4728_v28  ;;  %2555 = vmatprep.subr.mxu0 %v4733_v35 }
0x1554   :  { %2485 = vmatpush1.msra.mxu1 %v4740_v1  ;;  %2556 = vmatpush1.msra.mxu0 %v4745_v38 }
0x1555   :  { %2486 = vmatprep.subr.mxu1 %v4752_v3  ;;  %2557 = vmatprep.subr.mxu0 %v4757_v6 }
0x1556   :  { %2487 = vmatpush1.msra.mxu1 %v4764_v41  ;;  %2558 = vmatpush1.msra.mxu0 %v4769_v36 }
0x1557   :  { %2488 = vmatprep.subr.mxu1 %v6100_v44  ;;  %2559 = vmatprep.subr.mxu0 %v6101_v13  ;;  %v5315_v44 = vld [vmem:[%s5888_s5 + $0x1b0] sm:$0xff]  ;;  %v5321_v13 = vld [vmem:[%s5888_s5 + $0x188] sm:$0xff] }
0x1558   :  { %2489 = vmatpush1.msra.mxu1 %v6102_v14  ;;  %2560 = vmatpush1.msra.mxu0 %v6103_v15  ;;  %v5327_v14 = vld [vmem:[%s5888_s5 + $0x198] sm:$0xff]  ;;  %v5333_v15 = vld [vmem:[%s5888_s5 + $0x180] sm:$0xff] }
0x1559   :  { %2490 = vmatprep.subr.mxu1 %v6104_v17  ;;  %2561 = vmatprep.subr.mxu0 %v6105_v18  ;;  %v5339_v17 = vld [vmem:[%s5888_s5 + $0x190] sm:$0xff]  ;;  %v5345_v18 = vld [vmem:[%s5888_s5 + $0x168] sm:$0xff] }
0x155a   :  { %2491 = vmatpush1.msra.mxu1 %v6106_v19  ;;  %2562 = vmatpush1.msra.mxu0 %v6107_v20  ;;  %v5351_v19 = vld [vmem:[%s5888_s5 + $0x178] sm:$0xff]  ;;  %v5357_v20 = vld [vmem:[%s5888_s5 + $0x160] sm:$0xff] }
0x155b   :  { %2492 = vmatprep.subr.mxu1 %v6108_v21  ;;  %2563 = vmatprep.subr.mxu0 %v6109_v22  ;;  %v5363_v21 = vld [vmem:[%s5888_s5 + $0x170] sm:$0xff]  ;;  %v5369_v22 = vld [vmem:[%s5888_s5 + $0x148] sm:$0xff] }
0x155c   :  { %2493 = vmatpush1.msra.mxu1 %v6110_v23  ;;  %2564 = vmatpush1.msra.mxu0 %v6111_v24  ;;  %v5375_v23 = vld [vmem:[%s5888_s5 + $0x158] sm:$0xff]  ;;  %v5381_v24 = vld [vmem:[%s5888_s5 + $0x140] sm:$0xff] }
0x155d   :  { %2494 = vmatprep.subr.mxu1 %v6112_v25  ;;  %2565 = vmatprep.subr.mxu0 %v6113_v26  ;;  %v5387_v25 = vld [vmem:[%s5888_s5 + $0x150] sm:$0xff]  ;;  %v5393_v26 = vld [vmem:[%s5888_s5 + $0x128] sm:$0xff] }
0x155e   :  { %2495 = vmatpush1.msra.mxu1 %v6114_v31  ;;  %2566 = vmatpush1.msra.mxu0 %v6115_v27  ;;  %v5399_v31 = vld [vmem:[%s5888_s5 + $0x138] sm:$0xff]  ;;  %v5405_v27 = vld [vmem:[%s5888_s5 + $0x120] sm:$0xff] }
0x155f   :  { %2496 = vmatprep.subr.mxu1 %v6116_v55  ;;  %2567 = vmatprep.subr.mxu0 %v6117_v49  ;;  %v5411_v55 = vld [vmem:[%s5888_s5 + $0x130] sm:$0xff]  ;;  %v5417_v49 = vld [vmem:[%s5888_s5 + $0x108] sm:$0xff] }
0x1560   :  { %2497 = vmatpush1.msra.mxu1 %v6118_v56  ;;  %2530 = vmatprep.mubr.f32.mxu1 %v6119_v58  ;;  %v5423_v56 = vld [vmem:[%s5888_s5 + $0x118] sm:$0xff] }
0x1561   :  { %2568 = vmatpush1.msra.mxu0 %v6120_v54  ;;  %2601 = vmatprep.mubr.f32.mxu0 %v6119_v58  ;;  %v5429_v54 = vld [vmem:[%s5888_s5 + $0x100] sm:$0xff] }
0x1562   :  { %2639 = vmatprep.subr.mxu1 %v5241_v42  ;;  %2710 = vmatprep.subr.mxu0 %v5247_v59 }
0x1601   :  { %v2344_v62 = vpop.f32.mrf.mxu1  ;;  %v2415_v61 = vpop.f32.mrf.mxu0 }
0x1602   :  { %v2424_v63 = vrot.slane %v2344_v62, 2  ;;  %v2426_v40 = vrot.slane %v2415_v61, 2  ;;  %v5435_v62 = vld [vmem:[%s5888_s5 + $0x110] sm:$0xff]  ;;  %v5477_v61 = vld [vmem:[%s5888_s5 + $0xc0] sm:$0xff] }
0x1603   :  { %v2346_v0 = vpop.f32.mrf.mxu1  ;;  %v2417_v47 = vpop.f32.mrf.mxu0 }
0x1604   :  { %v2432_v4 = vadd.f32 %v2424_v63, %v4998_v33  ;;  %v2425_v60 = vrot.slane %v2346_v0, 2  ;;  %v2434_v28 = vadd.f32 %v2426_v40, %v6076_v45  ;;  %v2427_v35 = vrot.slane %v2417_v47, 2  ;;  %v5441_v63 = vld [vmem:[%s5888_s5 + $0xe8] sm:$0xff]  ;;  %v5447_v0 = vld [vmem:[%s5888_s5 + $0xf8] sm:$0xff] }
0x1605   :  { %v5489_v40 = vld [vmem:[%s5888_s5 + $0xa8] sm:$0xff]  ;;  %v5495_v47 = vld [vmem:[%s5888_s5 + $0xb8] sm:$0xff] }
0x1606   :  { %v3383_v51 = vmul.f32 -1.442695, %v2432_v4  ;;  %v2433_v52 = vadd.f32 %v2425_v60, %v6075_v43  ;;  %v3385_v1 = vmul.f32 -1.442695, %v2434_v28  ;;  %v2435_v3 = vadd.f32 %v2427_v35, %v5020_v32  ;;  %v5453_v4 = vld [vmem:[%s5888_s5 + $0xe0] sm:$0xff]  ;;  %v5459_v60 = vld [vmem:[%s5888_s5 + $0xf0] sm:$0xff] }
0x1607   :  { %v5501_v28 = vld [vmem:[%s5888_s5 + $0xa0] sm:$0xff]  ;;  %v5507_v35 = vld [vmem:[%s5888_s5 + $0xb0] sm:$0xff] }
0x1608   :  { %3696 = vpow2.f32 %v3383_v51  ;;  %v3384_v8 = vmul.f32 -1.442695, %v2433_v52  ;;  %v5465_v51 = vld [vmem:[%s5888_s5 + $0xc8] sm:$0xff]  ;;  %v5471_v52 = vld [vmem:[%s5888_s5 + $0xd8] sm:$0xff] }
0x160a   :  { %3698 = vpow2.f32 %v3384_v8  ;;  %v5483_v8 = vld [vmem:[%s5888_s5 + $0xd0] sm:$0xff] }
0x160b   :  { %3700 = vpow2.f32 %v3385_v1  ;;  %v5513_v1 = vld [vmem:[%s5888_s5 + $0x88] sm:$0xff] }
0x160c   :  { %6123 = vst [vmem:[#allocation9_spill] sm:$0xff] %v5513_v1 }
0x1615   :  { %v3697_v38 = vpop.eup %3696 }
0x1616   :  { %v2445_v6 = vadd.f32 1.0, %v3697_v38  ;;  %v5519_v38 = vld [vmem:[%s5888_s5 + $0x98] sm:$0xff] }
0x1617   :  { %v3699_v41 = vpop.eup %3698  ;;  %6124 = vst [vmem:[#allocation10_spill] sm:$0xff] %v5519_v38 }
0x1618   :  { %3702 = vrcp.f32 %v2445_v6  ;;  %v2446_v36 = vadd.f32 1.0, %v3699_v41  ;;  %v3701_v33 = vpop.eup %3700  ;;  %v5531_v6 = vld [vmem:[%s5888_s5 + $0x90] sm:$0xff]  ;;  %v5537_v41 = vld [vmem:[%s5888_s5 + $0x68] sm:$0xff] }
0x1619   :  { %3704 = vtanh.f32 %v2435_v3  ;;  %v2447_v5 = vadd.f32 1.0, %v3701_v33  ;;  %v5525_v3 = vld [vmem:[%s5888_s5 + $0x80] sm:$0xff]  ;;  %6126 = vst [vmem:[#allocation12_spill] sm:$0xff] %v5531_v6  ;;  %6127 = vst [vmem:[#allocation13_spill] sm:$0xff] %v5537_v41 }
0x161a   :  { %3706 = vrcp.f32 %v2446_v36  ;;  %6125 = vst [vmem:[#allocation11_spill] sm:$0xff] %v5525_v3  ;;  %v5543_v36 = vld [vmem:[%s5888_s5 + $0x78] sm:$0xff]  ;;  %v5549_v33 = vld [vmem:[%s5888_s5 + $0x60] sm:$0xff] }
0x161b   :  { %3708 = vrcp.f32 %v2447_v5  ;;  %6128 = vst [vmem:[#allocation14_spill] sm:$0xff] %v5543_v36  ;;  %6129 = vst [vmem:[#allocation15_spill] sm:$0xff] %v5549_v33  ;;  %v5579_v5 = vld [vmem:[%s5888_s5 + $0x50] sm:$0xff] }
0x161c   :  { %6134 = vst [vmem:[#allocation20_spill] sm:$0xff] %v5579_v5 }
0x1625   :  { %v3703_v43 = vpop.eup %3702 }
0x1626   :  { %v3705_v16 = vpop.eup %3704 }
0x1627   :  { %v3707_v57 = vpop.eup %3706  ;;  %v2459_v39 = vmul.f32 %v3705_v16, %v3703_v43  ;;  %v5555_v43 = vld [vmem:[%s5888_s5 + $0x70] sm:$0xff]  ;;  %v5561_v16 = vld [vmem:[%s5888_s5 + $0x48] sm:$0xff] }
0x1628   :  { %v2458_v45 = vmul.f32 %v3707_v57, %v2456_v34  ;;  %v3709_v32 = vpop.eup %3708  ;;  %6130 = vst [vmem:[#allocation16_spill] sm:$0xff] %v5555_v43  ;;  %6131 = vst [vmem:[#allocation17_spill] sm:$0xff] %v5561_v16  ;;  %v5567_v34 = vld [vmem:[%s5888_s5 + $0x58] sm:$0xff]  ;;  %v5573_v57 = vld [vmem:[%s5888_s5 + $0x40] sm:$0xff] }
0x1629   :  { %6132 = vst [vmem:[#allocation18_spill] sm:$0xff] %v5567_v34  ;;  %6133 = vst [vmem:[#allocation19_spill] sm:$0xff] %v5573_v57 }
0x162a   :  { %v5255_v7 = vadd.f32 %v2459_v39, %v2458_v45  ;;  %v5585_v45 = vld [vmem:[%s5888_s5 + $0x28] sm:$0xff]  ;;  %v5591_v39 = vld [vmem:[%s5888_s5 + $0x38] sm:$0xff] }
0x162b   :  { %6135 = vst [vmem:[#allocation21_spill] sm:$0xff] %v5585_v45  ;;  %6136 = vst [vmem:[#allocation22_spill] sm:$0xff] %v5591_v39 }
0x162c   :  { %3710 = vtanh.f32 %v5255_v7 }
0x1639   :  { %v3711_v11 = vpop.eup %3710 }
0x163a   :  { %v2462_v30 = vmul.f32 %v3711_v11, %v3709_v32  ;;  %v5597_v32 = vld [vmem:[%s5888_s5 + $0x20] sm:$0xff]  ;;  %v5603_v11 = vld [vmem:[%s5888_s5 + $0x30] sm:$0xff] }
0x163b   :  { %6137 = vst [vmem:[#allocation23_spill] sm:$0xff] %v5597_v32  ;;  %6138 = vst [vmem:[#allocation24_spill] sm:$0xff] %v5603_v11 }
0x163c   :  { %v2464_v37 = vrot.slane %v2462_v30, 6  ;;  %v5609_v30 = vld [vmem:[%s5888_s5 + $0x8] sm:$0xff] }
0x163d   :  { %6139 = vst [vmem:[#allocation25_spill] sm:$0xff] %v5609_v30 }
0x163e   :  { %2531 = vmatmul.mubr.f32.vlgmr.msra.gmra.mxu1 %v2464_v37  ;;  %2602 = vmatmul.mubr.f32.vlgmr.msra.gmra.mxu0 %v2464_v37  ;;  %v5615_v37 = vld [vmem:[%s5888_s5 + $0x18] sm:$0xff] }
0x163f   :  { %2640 = vmatpush1.msra.mxu1 %v5261_v29  ;;  %2711 = vmatpush1.msra.mxu0 %v5267_v9  ;;  %6140 = vst [vmem:[#allocation26_spill] sm:$0xff] %v5615_v37 }
0x1640   :  { %2641 = vmatprep.subr.mxu1 %v5273_v2  ;;  %2712 = vmatprep.subr.mxu0 %v5279_v12 }
0x1641   :  { %2642 = vmatpush1.msra.mxu1 %v5285_v46  ;;  %2713 = vmatpush1.msra.mxu0 %v5291_v48 }
0x1642   :  { %2643 = vmatprep.subr.mxu1 %v5297_v50  ;;  %2714 = vmatprep.subr.mxu0 %v5303_v10 }
0x1643   :  { %2644 = vmatpush1.msra.mxu1 %v5309_v53  ;;  %2715 = vmatpush1.msra.mxu0 %v5315_v44 }
0x1644   :  { %2645 = vmatprep.subr.mxu1 %v5321_v13  ;;  %2716 = vmatprep.subr.mxu0 %v5327_v14 }
0x1645   :  { %2646 = vmatpush1.msra.mxu1 %v5333_v15  ;;  %2717 = vmatpush1.msra.mxu0 %v5339_v17 }
0x1646   :  { %2647 = vmatprep.subr.mxu1 %v5345_v18  ;;  %2718 = vmatprep.subr.mxu0 %v5351_v19 }
0x1647   :  { %2648 = vmatpush1.msra.mxu1 %v5357_v20  ;;  %2719 = vmatpush1.msra.mxu0 %v5363_v21 }
0x1648   :  { %2649 = vmatprep.subr.mxu1 %v5369_v22  ;;  %2720 = vmatprep.subr.mxu0 %v5375_v23 }
0x1649   :  { %2650 = vmatpush1.msra.mxu1 %v5381_v24  ;;  %2721 = vmatpush1.msra.mxu0 %v5387_v25 }
0x164a   :  { %2651 = vmatprep.subr.mxu1 %v5393_v26  ;;  %2722 = vmatprep.subr.mxu0 %v5399_v31 }
0x164b   :  { %2652 = vmatpush1.msra.mxu1 %v5405_v27  ;;  %2723 = vmatpush1.msra.mxu0 %v5411_v55 }
0x164c   :  { %2653 = vmatprep.subr.mxu1 %v5417_v49  ;;  %2724 = vmatprep.subr.mxu0 %v5423_v56 }
0x164d   :  { %2654 = vmatpush1.msra.mxu1 %v5429_v54  ;;  %2725 = vmatpush1.msra.mxu0 %v5435_v62 }
0x164e   :  { %2655 = vmatprep.subr.mxu1 %v5441_v63  ;;  %2726 = vmatprep.subr.mxu0 %v5447_v0 }
0x164f   :  { %2656 = vmatpush1.msra.mxu1 %v5453_v4  ;;  %2727 = vmatpush1.msra.mxu0 %v5459_v60 }
0x1650   :  { %2657 = vmatprep.subr.mxu1 %v5465_v51  ;;  %2728 = vmatprep.subr.mxu0 %v5471_v52 }
0x1651   :  { %2658 = vmatpush1.msra.mxu1 %v5477_v61  ;;  %2729 = vmatpush1.msra.mxu0 %v5483_v8 }
0x1652   :  { %2659 = vmatprep.subr.mxu1 %v5489_v40  ;;  %2730 = vmatprep.subr.mxu0 %v5495_v47 }
0x1653   :  { %2660 = vmatpush1.msra.mxu1 %v5501_v28  ;;  %2731 = vmatpush1.msra.mxu0 %v5507_v35 }
0x1654   :  { %2661 = vmatprep.subr.mxu1 %v5513_v1  ;;  %2732 = vmatprep.subr.mxu0 %v5519_v38 }
0x1655   :  { %2662 = vmatpush1.msra.mxu1 %v5525_v3  ;;  %2733 = vmatpush1.msra.mxu0 %v5531_v6 }
0x1656   :  { %2663 = vmatprep.subr.mxu1 %v5537_v41  ;;  %2734 = vmatprep.subr.mxu0 %v5543_v36  ;;  %v6152_v41 = vld [vmem:[#allocation39_spill] sm:$0xff] }
0x1657   :  { %2664 = vmatpush1.msra.mxu1 %v5549_v33  ;;  %2735 = vmatpush1.msra.mxu0 %v5555_v43  ;;  %v6150_v33 = vld [vmem:[#allocation35_spill] sm:$0xff] }
0x1658   :  { %2665 = vmatprep.subr.mxu1 %v5561_v16  ;;  %2736 = vmatprep.subr.mxu0 %v5567_v34 }
0x1659   :  { %2666 = vmatpush1.msra.mxu1 %v5573_v57  ;;  %2737 = vmatpush1.msra.mxu0 %v5579_v5  ;;  %v6147_v5 = vld [vmem:[#allocation33_spill] sm:$0xff] }
0x165a   :  { %2667 = vmatprep.subr.mxu1 %v5585_v45  ;;  %2738 = vmatprep.subr.mxu0 %v5591_v39  ;;  %v6146_v45 = vld [vmem:[#allocation32_spill] sm:$0xff] }
0x165b   :  { %2668 = vmatpush1.msra.mxu1 %v5597_v32  ;;  %2739 = vmatpush1.msra.mxu0 %v5603_v11  ;;  %v5621_v32 = vld [vmem:[%s5888_s5] sm:$0xff]  ;;  %v5640_v57 = vadd.f32 %v6147_v5, %v6146_v45 }
0x165c   :  { %2669 = vmatprep.subr.mxu1 %v5609_v30  ;;  %2740 = vmatprep.subr.mxu0 %v5615_v37  ;;  %6141 = vst [vmem:[#allocation27_spill] sm:$0xff] %v5621_v32  ;;  %v5628_v30 = vld [vmem:[%s5888_s5 + $0x10] sm:$0xff]  ;;  %v6143_v37 = vld [vmem:[#allocation8_spill] sm:$0xff]  ;;  %v6144_v11 = vld [vmem:[#allocation31_spill] sm:$0xff] }
0x165d   :  { %2670 = vmatpush1.msra.mxu1 %v5621_v32  ;;  %2703 = vmatprep.mubr.f32.mxu1 %v6119_v58  ;;  %6142 = vst [vmem:[#allocation28_spill] sm:$0xff] %v5628_v30  ;;  %v5636_v39 = vadd.f32 %v6144_v11, %v6143_v37  ;;  %6148 = vst [vmem:[#allocation30_spill] sm:$0xff] %v5640_v57  ;;  %v6153_v5 = vld [vmem:[#allocation36_spill] sm:$0xff] }
0x165e   :  { %2741 = vmatpush1.msra.mxu0 %v5628_v30  ;;  %2774 = vmatprep.mubr.f32.mxu0 %v6119_v58  ;;  %v5651_v45 = vadd.f32 %v6153_v5, %v6152_v41 }
0x165f   :  { %2827 = vmatprep.subr.mxu1 %v5241_v42  ;;  %2898 = vmatprep.subr.mxu0 %v5247_v59  ;;  %6145 = vst [vmem:[#allocation29_spill] sm:$0xff] %v5636_v39  ;;  %v6149_v59 = vld [vmem:[#allocation37_spill] sm:$0xff] }
0x1660   :  { %v5646_v36 = vadd.f32 %v6150_v33, %v6149_v59 }
0x1662   :  { %6151 = vst [vmem:[#allocation8_spill] sm:$0xff] %v5646_v36 }
0x16fe   :  { %v2532_v32 = vpop.f32.mrf.mxu1  ;;  %v2603_v42 = vpop.f32.mrf.mxu0 }
0x16ff   :  { %v2608_v34 = vadd.f32 %v2532_v32, %v5636_v39  ;;  %v2610_v11 = vadd.f32 %v2603_v42, %v5646_v36  ;;  %v2632_v42 = vrot.slane %v5255_v7, 6  ;;  %v6154_v7 = vld [vmem:[#allocation13_spill] sm:$0xff] }
0x1700   :  { %v2534_v16 = vpop.f32.mrf.mxu1  ;;  %v2605_v37 = vpop.f32.mrf.mxu0 }
0x1701   :  { %v3386_v43 = vmul.f32 -1.442695, %v2608_v34  ;;  %v2609_v30 = vadd.f32 %v2534_v16, %v5640_v57  ;;  %v3388_v32 = vmul.f32 -1.442695, %v2610_v11  ;;  %v2611_v34 = vadd.f32 %v2605_v37, %v5651_v45 }
0x1703   :  { %3712 = vpow2.f32 %v3386_v43  ;;  %v3387_v58 = vmul.f32 -1.442695, %v2609_v30 }
0x1705   :  { %3714 = vpow2.f32 %v3387_v58 }
0x1706   :  { %3716 = vpow2.f32 %v3388_v32 }
0x1710   :  { %v3713_v39 = vpop.eup %3712 }
0x1711   :  { %v2621_v16 = vadd.f32 1.0, %v3713_v39 }
0x1712   :  { %v3715_v43 = vpop.eup %3714 }
0x1713   :  { %3718 = vrcp.f32 %v2621_v16  ;;  %v2622_v58 = vadd.f32 1.0, %v3715_v43  ;;  %v3717_v59 = vpop.eup %3716  ;;  %v6158_v16 = vld [vmem:[#allocation17_spill] sm:$0xff]  ;;  %v6159_v43 = vld [vmem:[#allocation18_spill] sm:$0xff] }
0x1714   :  { %3720 = vtanh.f32 %v2611_v34  ;;  %v2623_v57 = vadd.f32 1.0, %v3717_v59  ;;  %v6157_v34 = vld [vmem:[#allocation16_spill] sm:$0xff] }
0x1715   :  { %3722 = vrcp.f32 %v2622_v58  ;;  %v6160_v58 = vld [vmem:[#allocation19_spill] sm:$0xff]  ;;  %v6161_v59 = vld [vmem:[#allocation20_spill] sm:$0xff] }
0x1716   :  { %3724 = vrcp.f32 %v2623_v57  ;;  %v6156_v57 = vld [vmem:[#allocation15_spill] sm:$0xff] }
0x1720   :  { %v3719_v33 = vpop.eup %3718 }
0x1721   :  { %v3721_v30 = vpop.eup %3720 }
0x1722   :  { %v3723_v36 = vpop.eup %3722  ;;  %v2635_v5 = vmul.f32 %v3721_v30, %v3719_v33  ;;  %v6162_v33 = vld [vmem:[#allocation21_spill] sm:$0xff]  ;;  %v6163_v30 = vld [vmem:[#allocation22_spill] sm:$0xff] }
0x1723   :  { %v2634_v41 = vmul.f32 %v3723_v36, %v2632_v42  ;;  %v3725_v39 = vpop.eup %3724  ;;  %v6155_v36 = vld [vmem:[#allocation14_spill] sm:$0xff]  ;;  %v6164_v42 = vld [vmem:[#allocation23_spill] sm:$0xff] }
0x1725   :  { %v5655_v11 = vadd.f32 %v2635_v5, %v2634_v41  ;;  %v6165_v41 = vld [vmem:[#allocation24_spill] sm:$0xff]  ;;  %v6166_v5 = vld [vmem:[#allocation25_spill] sm:$0xff] }
0x1727   :  { %3726 = vtanh.f32 %v5655_v11 }
0x1734   :  { %v3727_v37 = vpop.eup %3726 }
0x1735   :  { %v2638_v32 = vmul.f32 %v3727_v37, %v3725_v39  ;;  %v6167_v39 = vld [vmem:[#allocation26_spill] sm:$0xff]  ;;  %v6168_v37 = vld [vmem:[#allocation27_spill] sm:$0xff] }
0x1737   :  { %2704 = vmatmul.mubr.f32.vlgmr.msra.gmra.mxu1 %v2638_v32  ;;  %2775 = vmatmul.mubr.f32.vlgmr.msra.gmra.mxu0 %v2638_v32  ;;  %v6169_v32 = vmov 0.0  }
0x1738   :  { %2828 = vmatpush1.msra.mxu1 %v5261_v29  ;;  %2899 = vmatpush1.msra.mxu0 %v5267_v9 }
0x1739   :  { %2829 = vmatprep.subr.mxu1 %v5273_v2  ;;  %2900 = vmatprep.subr.mxu0 %v5279_v12 }
0x173a   :  { %2830 = vmatpush1.msra.mxu1 %v5285_v46  ;;  %2901 = vmatpush1.msra.mxu0 %v5291_v48 }
0x173b   :  { %2831 = vmatprep.subr.mxu1 %v5297_v50  ;;  %2902 = vmatprep.subr.mxu0 %v5303_v10 }
0x173c   :  { %2832 = vmatpush1.msra.mxu1 %v5309_v53  ;;  %2903 = vmatpush1.msra.mxu0 %v5315_v44 }
0x173d   :  { %2833 = vmatprep.subr.mxu1 %v5321_v13  ;;  %2904 = vmatprep.subr.mxu0 %v5327_v14 }
0x173e   :  { %2834 = vmatpush1.msra.mxu1 %v5333_v15  ;;  %2905 = vmatpush1.msra.mxu0 %v5339_v17 }
0x173f   :  { %2835 = vmatprep.subr.mxu1 %v5345_v18  ;;  %2906 = vmatprep.subr.mxu0 %v5351_v19 }
0x1740   :  { %2836 = vmatpush1.msra.mxu1 %v5357_v20  ;;  %2907 = vmatpush1.msra.mxu0 %v5363_v21 }
0x1741   :  { %2837 = vmatprep.subr.mxu1 %v5369_v22  ;;  %2908 = vmatprep.subr.mxu0 %v5375_v23 }
0x1742   :  { %2838 = vmatpush1.msra.mxu1 %v5381_v24  ;;  %2909 = vmatpush1.msra.mxu0 %v5387_v25 }
0x1743   :  { %2839 = vmatprep.subr.mxu1 %v5393_v26  ;;  %2910 = vmatprep.subr.mxu0 %v5399_v31 }
0x1744   :  { %2840 = vmatpush1.msra.mxu1 %v5405_v27  ;;  %2911 = vmatpush1.msra.mxu0 %v5411_v55 }
0x1745   :  { %2841 = vmatprep.subr.mxu1 %v5417_v49  ;;  %2912 = vmatprep.subr.mxu0 %v5423_v56 }
0x1746   :  { %2842 = vmatpush1.msra.mxu1 %v5429_v54  ;;  %2913 = vmatpush1.msra.mxu0 %v5435_v62 }
0x1747   :  { %2843 = vmatprep.subr.mxu1 %v5441_v63  ;;  %2914 = vmatprep.subr.mxu0 %v5447_v0 }
0x1748   :  { %2844 = vmatpush1.msra.mxu1 %v5453_v4  ;;  %2915 = vmatpush1.msra.mxu0 %v5459_v60 }
0x1749   :  { %2845 = vmatprep.subr.mxu1 %v5465_v51  ;;  %2916 = vmatprep.subr.mxu0 %v5471_v52 }
0x174a   :  { %2846 = vmatpush1.msra.mxu1 %v5477_v61  ;;  %2917 = vmatpush1.msra.mxu0 %v5483_v8 }
0x174b   :  { %2847 = vmatprep.subr.mxu1 %v5489_v40  ;;  %2918 = vmatprep.subr.mxu0 %v5495_v47 }
0x174c   :  { %2848 = vmatpush1.msra.mxu1 %v5501_v28  ;;  %2919 = vmatpush1.msra.mxu0 %v5507_v35 }
0x174d   :  { %2849 = vmatprep.subr.mxu1 %v5513_v1  ;;  %2920 = vmatprep.subr.mxu0 %v5519_v38 }
0x174e   :  { %2850 = vmatpush1.msra.mxu1 %v5525_v3  ;;  %2921 = vmatpush1.msra.mxu0 %v5531_v6 }
0x174f   :  { %2851 = vmatprep.subr.mxu1 %v6154_v7  ;;  %2922 = vmatprep.subr.mxu0 %v6155_v36 }
0x1750   :  { %2852 = vmatpush1.msra.mxu1 %v6156_v57  ;;  %2923 = vmatpush1.msra.mxu0 %v6157_v34 }
0x1751   :  { %2853 = vmatprep.subr.mxu1 %v6158_v16  ;;  %2924 = vmatprep.subr.mxu0 %v6159_v43  ;;  %v6170_v43 = vld [vmem:[#allocation28_spill] sm:$0xff] }
0x1752   :  { %2854 = vmatpush1.msra.mxu1 %v6160_v58  ;;  %2925 = vmatpush1.msra.mxu0 %v6161_v59  ;;  %v6171_v59 = vld [vmem:[#allocation34_spill] sm:$0xff] }
0x1753   :  { %2855 = vmatprep.subr.mxu1 %v6162_v33  ;;  %2926 = vmatprep.subr.mxu0 %v6163_v30  ;;  %v6172_v33 = vld [vmem:[#allocation38_spill] sm:$0xff] }
0x1754   :  { %2856 = vmatpush1.msra.mxu1 %v6164_v42  ;;  %2927 = vmatpush1.msra.mxu0 %v6165_v41  ;;  %v6173_v41 = vld [vmem:[#allocation29_spill] sm:$0xff] }
0x1755   :  { %2857 = vmatprep.subr.mxu1 %v6166_v5  ;;  %2928 = vmatprep.subr.mxu0 %v6167_v39  ;;  %v6174_v39 = vld [vmem:[#allocation30_spill] sm:$0xff] }
0x1756   :  { %2858 = vmatpush1.msra.mxu1 %v6168_v37  ;;  %2891 = vmatprep.mubr.f32.mxu1 %v6169_v32 }
0x1757   :  { %2929 = vmatpush1.msra.mxu0 %v6170_v43  ;;  %2962 = vmatprep.mubr.f32.mxu0 %v6169_v32  ;;  %v6175_v32 = vld [vmem:[#allocation8_spill] sm:$0xff] }
0x1758   :  { %3015 = vmatprep.subr.mxu1 %v6171_v59  ;;  %3086 = vmatprep.subr.mxu0 %v6172_v33 }
0x17f7   :  { %v2705_v30 = vpop.f32.mrf.mxu1  ;;  %v2776_v37 = vpop.f32.mrf.mxu0 }
0x17f8   :  { %v2785_v42 = vrot.slane %v2705_v30, 6  ;;  %v2787_v43 = vrot.slane %v2776_v37, 6 }
0x17f9   :  { %v2707_v58 = vpop.f32.mrf.mxu1  ;;  %v2778_v7 = vpop.f32.mrf.mxu0 }
0x17fa   :  { %v2793_v16 = vadd.f32 %v2785_v42, %v6173_v41  ;;  %v2786_v5 = vrot.slane %v2707_v58, 6  ;;  %v2795_v6 = vadd.f32 %v2787_v43, %v6175_v32  ;;  %v2788_v59 = vrot.slane %v2778_v7, 6 }
0x17fc   :  { %v3389_v34 = vmul.f32 -1.442695, %v2793_v16  ;;  %v2794_v57 = vadd.f32 %v2786_v5, %v6174_v39  ;;  %v3391_v3 = vmul.f32 -1.442695, %v2795_v6  ;;  %v2796_v30 = vadd.f32 %v2788_v59, %v5651_v45 }
0x17fe   :  { %3728 = vpow2.f32 %v3389_v34  ;;  %v3390_v36 = vmul.f32 -1.442695, %v2794_v57 }
0x1800   :  { %3730 = vpow2.f32 %v3390_v36  ;;  %v2817_v36 = vrot.slane %v5655_v11, 6 }
0x1801   :  { %3732 = vpow2.f32 %v3391_v3 }
0x180b   :  { %v3729_v33 = vpop.eup %3728 }
0x180c   :  { %v2806_v38 = vadd.f32 1.0, %v3729_v33 }
0x180d   :  { %v3731_v1 = vpop.eup %3730 }
0x180e   :  { %3734 = vrcp.f32 %v2806_v38  ;;  %v2807_v16 = vadd.f32 1.0, %v3731_v1  ;;  %v3733_v34 = vpop.eup %3732 }
0x180f   :  { %3736 = vtanh.f32 %v2796_v30  ;;  %v2808_v5 = vadd.f32 1.0, %v3733_v34 }
0x1810   :  { %3738 = vrcp.f32 %v2807_v16 }
0x1811   :  { %3740 = vrcp.f32 %v2808_v5 }
0x181b   :  { %v3735_v58 = vpop.eup %3734 }
0x181c   :  { %v3737_v57 = vpop.eup %3736 }
0x181d   :  { %v3739_v42 = vpop.eup %3738  ;;  %v2820_v7 = vmul.f32 %v3737_v57, %v3735_v58 }
0x181e   :  { %v2819_v43 = vmul.f32 %v3739_v42, %v2817_v36  ;;  %v3741_v37 = vpop.eup %3740 }
0x1820   :  { %v5729_v6 = vadd.f32 %v2820_v7, %v2819_v43  ;;  %v3216_v43 = vld [vmem:[%s5890_s7 + $0x78] sm:$0xff]  ;;  %v3215_v7 = vld [vmem:[%s5890_s7 + $0x70] sm:$0xff] }
0x1822   :  { %3742 = vtanh.f32 %v5729_v6  ;;  %v3005_v59 = vrot.slane %v5729_v6, 6  ;;  %v3214_v6 = vld [vmem:[%s5890_s7 + $0x68] sm:$0xff] }
0x182f   :  { %v3743_v3 = vpop.eup %3742 }
0x1830   :  { %v2823_v38 = vmul.f32 %v3743_v3, %v3741_v37  ;;  %v3213_v37 = vld [vmem:[%s5890_s7 + $0x60] sm:$0xff]  ;;  %v3212_v3 = vld [vmem:[%s5890_s7 + $0x58] sm:$0xff] }
0x1832   :  { %v2825_v1 = vrot.slane %v2823_v38, 2  ;;  %v3211_v38 = vld [vmem:[%s5890_s7 + $0x50] sm:$0xff] }
0x1834   :  { %2892 = vmatmul.mubr.f32.vlgmr.msra.gmra.mxu1 %v2825_v1  ;;  %2963 = vmatmul.mubr.f32.vlgmr.msra.gmra.mxu0 %v2825_v1  ;;  %v3210_v1 = vld [vmem:[%s5890_s7 + $0x48] sm:$0xff] }
0x1835   :  { %3016 = vmatpush1.msra.mxu1 %v5261_v29  ;;  %3087 = vmatpush1.msra.mxu0 %v5267_v9  ;;  %v6176_v29 = vld [vmem:[#allocation9_spill] sm:$0xff]  ;;  %v6177_v9 = vld [vmem:[#allocation10_spill] sm:$0xff] }
0x1836   :  { %3017 = vmatprep.subr.mxu1 %v5273_v2  ;;  %3088 = vmatprep.subr.mxu0 %v5279_v12  ;;  %v6178_v2 = vld [vmem:[#allocation11_spill] sm:$0xff]  ;;  %v6179_v12 = vld [vmem:[#allocation12_spill] sm:$0xff] }
0x1837   :  { %3018 = vmatpush1.msra.mxu1 %v5285_v46  ;;  %3089 = vmatpush1.msra.mxu0 %v5291_v48  ;;  %v6180_v46 = vld [vmem:[#allocation13_spill] sm:$0xff]  ;;  %v6181_v48 = vld [vmem:[#allocation14_spill] sm:$0xff] }
0x1838   :  { %3019 = vmatprep.subr.mxu1 %v5297_v50  ;;  %3090 = vmatprep.subr.mxu0 %v5303_v10  ;;  %v6182_v50 = vld [vmem:[#allocation15_spill] sm:$0xff]  ;;  %v6183_v10 = vld [vmem:[#allocation16_spill] sm:$0xff] }
0x1839   :  { %3020 = vmatpush1.msra.mxu1 %v5309_v53  ;;  %3091 = vmatpush1.msra.mxu0 %v5315_v44  ;;  %v6184_v53 = vld [vmem:[#allocation17_spill] sm:$0xff]  ;;  %v6185_v44 = vld [vmem:[#allocation18_spill] sm:$0xff] }
0x183a   :  { %3021 = vmatprep.subr.mxu1 %v5321_v13  ;;  %3092 = vmatprep.subr.mxu0 %v5327_v14  ;;  %v6186_v13 = vld [vmem:[#allocation19_spill] sm:$0xff]  ;;  %v6187_v14 = vld [vmem:[#allocation20_spill] sm:$0xff] }
0x183b   :  { %3022 = vmatpush1.msra.mxu1 %v5333_v15  ;;  %3093 = vmatpush1.msra.mxu0 %v5339_v17  ;;  %v6188_v15 = vld [vmem:[#allocation21_spill] sm:$0xff]  ;;  %v6189_v17 = vld [vmem:[#allocation22_spill] sm:$0xff] }
0x183c   :  { %3023 = vmatprep.subr.mxu1 %v5345_v18  ;;  %3094 = vmatprep.subr.mxu0 %v5351_v19  ;;  %v6190_v18 = vld [vmem:[#allocation23_spill] sm:$0xff]  ;;  %v6191_v19 = vld [vmem:[#allocation24_spill] sm:$0xff] }
0x183d   :  { %3024 = vmatpush1.msra.mxu1 %v5357_v20  ;;  %3095 = vmatpush1.msra.mxu0 %v5363_v21  ;;  %v6192_v20 = vld [vmem:[#allocation25_spill] sm:$0xff]  ;;  %v6193_v21 = vld [vmem:[#allocation26_spill] sm:$0xff] }
0x183e   :  { %3025 = vmatprep.subr.mxu1 %v5369_v22  ;;  %3096 = vmatprep.subr.mxu0 %v5375_v23  ;;  %v6194_v22 = vld [vmem:[#allocation27_spill] sm:$0xff]  ;;  %v6195_v23 = vmov 0.0  }
0x183f   :  { %3026 = vmatpush1.msra.mxu1 %v5381_v24  ;;  %3097 = vmatpush1.msra.mxu0 %v5387_v25  ;;  %v6196_v24 = vld [vmem:[#allocation28_spill] sm:$0xff] }
0x1840   :  { %3027 = vmatprep.subr.mxu1 %v5393_v26  ;;  %3098 = vmatprep.subr.mxu0 %v5399_v31 }
0x1841   :  { %3028 = vmatpush1.msra.mxu1 %v5405_v27  ;;  %3099 = vmatpush1.msra.mxu0 %v5411_v55 }
0x1842   :  { %3029 = vmatprep.subr.mxu1 %v5417_v49  ;;  %3100 = vmatprep.subr.mxu0 %v5423_v56 }
0x1843   :  { %3030 = vmatpush1.msra.mxu1 %v5429_v54  ;;  %3101 = vmatpush1.msra.mxu0 %v5435_v62 }
0x1844   :  { %3031 = vmatprep.subr.mxu1 %v5441_v63  ;;  %3102 = vmatprep.subr.mxu0 %v5447_v0 }
0x1845   :  { %3032 = vmatpush1.msra.mxu1 %v5453_v4  ;;  %3103 = vmatpush1.msra.mxu0 %v5459_v60 }
0x1846   :  { %3033 = vmatprep.subr.mxu1 %v5465_v51  ;;  %3104 = vmatprep.subr.mxu0 %v5471_v52 }
0x1847   :  { %3034 = vmatpush1.msra.mxu1 %v5477_v61  ;;  %3105 = vmatpush1.msra.mxu0 %v5483_v8 }
0x1848   :  { %3035 = vmatprep.subr.mxu1 %v5489_v40  ;;  %3106 = vmatprep.subr.mxu0 %v5495_v47 }
0x1849   :  { %3036 = vmatpush1.msra.mxu1 %v5501_v28  ;;  %3107 = vmatpush1.msra.mxu0 %v5507_v35 }
0x184a   :  { %3037 = vmatprep.subr.mxu1 %v6176_v29  ;;  %3108 = vmatprep.subr.mxu0 %v6177_v9  ;;  %v3209_v29 = vld [vmem:[%s5890_s7 + $0x40] sm:$0xff]  ;;  %v3208_v9 = vld [vmem:[%s5890_s7 + $0x38] sm:$0xff] }
0x184b   :  { %3038 = vmatpush1.msra.mxu1 %v6178_v2  ;;  %3109 = vmatpush1.msra.mxu0 %v6179_v12  ;;  %v3207_v2 = vld [vmem:[%s5890_s7 + $0x30] sm:$0xff]  ;;  %v3206_v12 = vld [vmem:[%s5890_s7 + $0x28] sm:$0xff] }
0x184c   :  { %3039 = vmatprep.subr.mxu1 %v6180_v46  ;;  %3110 = vmatprep.subr.mxu0 %v6181_v48  ;;  %v3205_v46 = vld [vmem:[%s5890_s7 + $0x20] sm:$0xff]  ;;  %v3204_v48 = vld [vmem:[%s5890_s7 + $0x18] sm:$0xff] }
0x184d   :  { %3040 = vmatpush1.msra.mxu1 %v6182_v50  ;;  %3111 = vmatpush1.msra.mxu0 %v6183_v10  ;;  %v3203_v50 = vld [vmem:[%s5890_s7 + $0x10] sm:$0xff]  ;;  %v3202_v10 = vld [vmem:[%s5890_s7 + $0x8] sm:$0xff] }
0x184e   :  { %3041 = vmatprep.subr.mxu1 %v6184_v53  ;;  %3112 = vmatprep.subr.mxu0 %v6185_v44  ;;  %v3201_v53 = vld [vmem:[%s5890_s7] sm:$0xff]  ;;  %s3889_s7 = smov [#allocation4]  }
0x184f   :  { %3042 = vmatpush1.msra.mxu1 %v6186_v13  ;;  %3113 = vmatpush1.msra.mxu0 %v6187_v14  ;;  %s3315_s30 = sshll.u32 %s3889_s7, 4  ;;  %s3316_s30 = int_to_ptr.vmem [resolvable:$true] %s3315_s30 }
0x1850   :  { %3043 = vmatprep.subr.mxu1 %v6188_v15  ;;  %3114 = vmatprep.subr.mxu0 %v6189_v17  ;;  %s3842_s11 = scalar_lea.vmem %s3316_s30, 32  ;;  %p3847_p1 = scmp.lt.s32.totalorder %s3316_s30, %s3316_s30 }
0x1851   :  { %3044 = vmatpush1.msra.mxu1 %v6190_v18  ;;  %3115 = vmatpush1.msra.mxu0 %v6191_v19  ;;  %p3843_p0 = scmp.ne.s32.totalorder %s3316_s30, %s3842_s11  ;;  %p3848_p2 = scmp.lt.s32.totalorder %s3842_s11, %s3842_s11 }
0x1852   :  { %3045 = vmatprep.subr.mxu1 %v6192_v20  ;;  %3116 = vmatprep.subr.mxu0 %v6193_v21 }
0x1853   :  { %3046 = vmatpush1.msra.mxu1 %v6194_v22  ;;  %3079 = vmatprep.mubr.f32.mxu1 %v6195_v23  ;;  %p3849_p3 = por %p3848_p2, %p3847_p1 }
0x1854   :  { %3117 = vmatpush1.msra.mxu0 %v6196_v24  ;;  %3150 = vmatprep.mubr.f32.mxu0 %v6195_v23 }
0x1855   :  { %3416 = vmatprep.subr.mxu1 %v6195_v23  ;;  %p3850_p4 = pnand %p3849_p3, %p3843_p0 }
0x18f4   :  { %v2893_v25 = vpop.f32.mrf.mxu1  ;;  %v2964_v54 = vpop.f32.mrf.mxu0 }
0x18f5   :  { %v2973_v26 = vrot.slane %v2893_v25, 4  ;;  %v2975_v63 = vrot.slane %v2964_v54, 4 }
0x18f6   :  { %v2895_v31 = vpop.f32.mrf.mxu1  ;;  %v2966_v0 = vpop.f32.mrf.mxu0 }
0x18f7   :  { %v2981_v27 = vadd.f32 %v2973_v26, %v6173_v41  ;;  %v2974_v55 = vrot.slane %v2895_v31, 4  ;;  %v2983_v4 = vadd.f32 %v2975_v63, %v6175_v32  ;;  %v2976_v60 = vrot.slane %v2966_v0, 4 }
0x18f9   :  { %v3392_v49 = vmul.f32 -1.442695, %v2981_v27  ;;  %v2982_v56 = vadd.f32 %v2974_v55, %v6174_v39  ;;  %v3394_v51 = vmul.f32 -1.442695, %v2983_v4  ;;  %v2984_v61 = vadd.f32 %v2976_v60, %v5651_v45 }
0x18fb   :  { %3744 = vpow2.f32 %v3392_v49  ;;  %v3393_v62 = vmul.f32 -1.442695, %v2982_v56 }
0x18fd   :  { %3746 = vpow2.f32 %v3393_v62 }
0x18fe   :  { %3748 = vpow2.f32 %v3394_v51 }
0x1908   :  { %v3745_v52 = vpop.eup %3744 }
0x1909   :  { %v2994_v8 = vadd.f32 1.0, %v3745_v52 }
0x190a   :  { %v3747_v40 = vpop.eup %3746 }
0x190b   :  { %3750 = vrcp.f32 %v2994_v8  ;;  %v2995_v47 = vadd.f32 1.0, %v3747_v40  ;;  %v3749_v28 = vpop.eup %3748 }
0x190c   :  { %3752 = vtanh.f32 %v2984_v61  ;;  %v2996_v30 = vadd.f32 1.0, %v3749_v28 }
0x190d   :  { %3754 = vrcp.f32 %v2995_v47 }
0x190e   :  { %3756 = vrcp.f32 %v2996_v30 }
0x1918   :  { %v3751_v35 = vpop.eup %3750 }
0x1919   :  { %v3753_v11 = vpop.eup %3752 }
0x191a   :  { %v3755_v33 = vpop.eup %3754  ;;  %v3008_v34 = vmul.f32 %v3753_v11, %v3751_v35 }
0x191b   :  { %v3007_v16 = vmul.f32 %v3755_v33, %v3005_v59  ;;  %v3757_v57 = vpop.eup %3756 }
0x191d   :  { %v5802_v58 = vadd.f32 %v3008_v34, %v3007_v16 }
0x191f   :  { %3758 = vtanh.f32 %v5802_v58  ;;  %v3193_v62 = vrot.slane %v5802_v58, 6 }
0x192c   :  { %v3759_v36 = vpop.eup %3758 }
0x192d   :  { %v3011_v42 = vmul.f32 %v3759_v36, %v3757_v57 }
0x192f   :  { %v3013_v5 = vrot.slane %v3011_v42, 4 }
0x1931   :  { %3080 = vmatmul.mubr.f32.vlgmr.msra.gmra.mxu1 %v3013_v5  ;;  %3151 = vmatmul.mubr.f32.vlgmr.msra.gmra.mxu0 %v3013_v5 }
0x1932   :  { %3417 = vmatpush3.msra.mxu1 %v3216_v43  ;;  %3448 = vmatprep.mubr.msk.f32.mxu1 %vm3888_vm10, %v6195_v23 }
0x1933   :  { %3418 = vmatprep.subr.mxu1 %v6195_v23 }
0x1934   :  { %3419 = vmatpush3.msra.mxu1 %v3215_v7 }
0x1935   :  { %3420 = vmatprep.subr.mxu1 %v6195_v23 }
0x1936   :  { %3421 = vmatpush3.msra.mxu1 %v3214_v6 }
0x1937   :  { %3422 = vmatprep.subr.mxu1 %v6195_v23 }
0x1938   :  { %3423 = vmatpush3.msra.mxu1 %v3213_v37 }
0x1939   :  { %3424 = vmatprep.subr.mxu1 %v6195_v23 }
0x193a   :  { %3425 = vmatpush3.msra.mxu1 %v3212_v3 }
0x193b   :  { %3426 = vmatprep.subr.mxu1 %v6195_v23 }
0x193c   :  { %3427 = vmatpush3.msra.mxu1 %v3211_v38 }
0x193d   :  { %3428 = vmatprep.subr.mxu1 %v6195_v23 }
0x193e   :  { %3429 = vmatpush3.msra.mxu1 %v3210_v1 }
0x193f   :  { %3430 = vmatprep.subr.mxu1 %v6195_v23 }
0x1940   :  { %3431 = vmatpush3.msra.mxu1 %v3209_v29 }
0x1941   :  { %3432 = vmatprep.subr.mxu1 %v6195_v23 }
0x1942   :  { %3433 = vmatpush3.msra.mxu1 %v3208_v9 }
0x1943   :  { %3434 = vmatprep.subr.mxu1 %v6195_v23 }
0x1944   :  { %3435 = vmatpush3.msra.mxu1 %v3207_v2 }
0x1945   :  { %3436 = vmatprep.subr.mxu1 %v6195_v23 }
0x1946   :  { %3437 = vmatpush3.msra.mxu1 %v3206_v12 }
0x1947   :  { %3438 = vmatprep.subr.mxu1 %v6195_v23 }
0x1948   :  { %3439 = vmatpush3.msra.mxu1 %v3205_v46 }
0x1949   :  { %3440 = vmatprep.subr.mxu1 %v6195_v23 }
0x194a   :  { %3441 = vmatpush3.msra.mxu1 %v3204_v48 }
0x194b   :  { %3442 = vmatprep.subr.mxu1 %v6195_v23 }
0x194c   :  { %3443 = vmatpush3.msra.mxu1 %v3203_v50 }
0x194d   :  { %3444 = vmatprep.subr.mxu1 %v6195_v23 }
0x194e   :  { %3445 = vmatpush3.msra.mxu1 %v3202_v10 }
0x194f   :  { %3446 = vmatprep.subr.mxu1 %v6195_v23 }
0x1950   :  { %3447 = vmatpush3.msra.mxu1 %v3201_v53 }
0x19f1   :  { %v3081_v44 = vpop.f32.mrf.mxu1  ;;  %v3152_v20 = vpop.f32.mrf.mxu0 }
0x19f2   :  { %v3161_v13 = vrot.slane %v3081_v44, 2  ;;  %v3163_v22 = vrot.slane %v3152_v20, 2 }
0x19f3   :  { %v3083_v14 = vpop.f32.mrf.mxu1  ;;  %v3154_v24 = vpop.f32.mrf.mxu0 }
0x19f4   :  { %v3169_v15 = vadd.f32 %v3161_v13, %v6173_v41  ;;  %v3162_v17 = vrot.slane %v3083_v14, 2  ;;  %v3171_v25 = vadd.f32 %v3163_v22, %v6175_v32  ;;  %v3164_v26 = vrot.slane %v3154_v24, 2 }
0x19f6   :  { %v3395_v18 = vmul.f32 -1.442695, %v3169_v15  ;;  %v3170_v19 = vadd.f32 %v3162_v17, %v6174_v39  ;;  %v3397_v23 = vmul.f32 -1.442695, %v3171_v25  ;;  %v3172_v27 = vadd.f32 %v3164_v26, %v5651_v45 }
0x19f8   :  { %3760 = vpow2.f32 %v3395_v18  ;;  %v3396_v21 = vmul.f32 -1.442695, %v3170_v19 }
0x19fa   :  { %3762 = vpow2.f32 %v3396_v21 }
0x19fb   :  { %3764 = vpow2.f32 %v3397_v23 }
0x1a05   :  { %v3761_v31 = vpop.eup %3760 }
0x1a06   :  { %v3182_v55 = vadd.f32 1.0, %v3761_v31 }
0x1a07   :  { %v3763_v49 = vpop.eup %3762 }
0x1a08   :  { %3766 = vrcp.f32 %v3182_v55  ;;  %v3183_v41 = vadd.f32 1.0, %v3763_v49  ;;  %v3765_v39 = vpop.eup %3764 }
0x1a09   :  { %3768 = vtanh.f32 %v3172_v27  ;;  %v3184_v0 = vadd.f32 1.0, %v3765_v39 }
0x1a0a   :  { %3770 = vrcp.f32 %v3183_v41 }
0x1a0b   :  { %3772 = vrcp.f32 %v3184_v0 }
0x1a15   :  { %v3767_v56 = vpop.eup %3766 }
0x1a16   :  { %v3769_v54 = vpop.eup %3768 }
0x1a17   :  { %v3771_v63 = vpop.eup %3770  ;;  %v3196_v4 = vmul.f32 %v3769_v54, %v3767_v56 }
0x1a18   :  { %v3195_v32 = vmul.f32 %v3771_v63, %v3193_v62  ;;  %v3773_v45 = vpop.eup %3772 }
0x1a1a   :  { %v3197_v60 = vadd.f32 %v3196_v4, %v3195_v32 }
0x1a1c   :  { %3774 = vtanh.f32 %v3197_v60 }
0x1a29   :  { %v3775_v51 = vpop.eup %3774 }
0x1a2a   :  { %v3199_v52 = vmul.f32 %v3775_v51, %v3773_v45 }
0x1a2c   :  { %v3225_v61 = vrot.slane %v3199_v52, 6  ;;  %3200 = vst [vmem:[#allocation4 - $0x6] sm:$0xc0] %v3199_v52 }
0x1a2e   :  { %3449 = vmatmul.mubr.f32.vlgmr.msra.gmra.mxu1 %v3225_v61 }
0x1a2f   :  { %3853 = shalt.err (!%p3850_p4)
}
0x1a30   :  { %3318 = dma.vmem_to_hbm [thread:$0]  %s3316_s30, 32, %s5893_s10, [#allocation5]   ;;  %v3398_v8 = vld [vmem:[%s5891_s8] ss:$0 sm:$0xff]  ;;  %vm3297_vm11 = vcmask 33792  }
0x1a31   :  { %s3890_s16 = smov [#allocation2]  }
0x1a32   :  { %s3305_s17 = sshll.u32 %s3890_s16, 4  ;;  %s3306_s17 = int_to_ptr.vmem [resolvable:$true] %s3305_s17 }
0x1a33   :  { %s3862_s18 = scalar_lea.vmem %s3306_s17, 32  ;;  %p3867_p6 = scmp.lt.s32.totalorder %s3306_s17, %s3306_s17 }
0x1a34   :  { %p3863_p5 = scmp.ne.s32.totalorder %s3306_s17, %s3862_s18  ;;  %p3868_p7 = scmp.lt.s32.totalorder %s3862_s18, %s3862_s18 }
0x1a36   :  { %p3869_p8 = por %p3868_p7, %p3867_p6 }
0x1a38   :  { %p3870_p9 = pnand %p3869_p8, %p3863_p5 }
0x1aee   :  { %v3293_v40 = vpop.f32.mrf.mxu1 }
0x1aef   :  { %v3294_v47 = vadd.f32 %v3398_v8, %v3293_v40 }
0x1af0   :  { %v3450_v28 = vpop.f32.mrf.mxu1 }
0x1af1   :  { %3298 = vst.msk [vmem:[#allocation2] sm:$0x3] %vm3297_vm11, %v3294_v47 }
0x1af2   :  { %3873 = shalt.err (!%p3870_p9)
}
0x1af3   :  { %3308 = dma.vmem_to_hbm [thread:$0]  %s3306_s17, 32, %s5892_s9, [#allocation3]  }
0x1af4   :  { %3882 = dma.done.wait [#allocation3], 32  }
0x1af5   :  { %3883 = vsyncadd [#allocation3], 4294967264 }
0x1af6   :  { %3884 = dma.done.wait [#allocation5], 32  }
0x1af7   :  { %3885 = vsyncadd [#allocation5], 4294967264 }
0x1af8   :  { %3325 = vsyncpa [#allocation3], 1 }
0x1af9   :  { %3326 = vsyncpa [#allocation5], 1 }

</bundles_post_ra>
